<compile_context>
chip_gen: v7x
topology: tpu7x:2x2x1
jax: 0.10.0
libtpu: 0.0.40
codegen_flags: <defaults>
</compile_context>

<pallas_src>
import jax
import jax.numpy as jnp
from jax.experimental import pallas as pl
from jax.experimental.pallas import tpu as pltpu

LSTM_H = 32        # lstm_output_dim
LATENT = 32        # latent_dim
FUTURE = 1         # future_steps
INPUT_DIM = 1
NUM_LAYERS = 3
LN_EPS = 1e-5
DEC_PAD = 512      # decoder fc2 output (500) zero-padded to a lane multiple
OUT_W = 128        # packed lane-dense output slab width


def _stable_expm1(a):
    # exp(a) - 1 with the small-|a| cancellation removed (uses only exp/where,
    # which are guaranteed to lower on the TPU EUP/VPU).
    return jnp.where(jnp.abs(a) < 1e-3, a + 0.5 * a * a, jnp.exp(a) - 1.0)


def vae_kernel(x_ref, u_ref, lstm_w_ref, small_ref, wpack_ref, dfc2_w_ref,
               dec_misc_ref, out_ref):
    B, T = x_ref.shape
    H = LSTM_H
    f32 = jnp.float32

    # ---- packed parameter slabs -------------------------------------------
    # lstm_w (bf16, (3, H, 8H)):  [W_hh0|W_ih1], [W_hh1|W_ih2], [W_hh2|0]
    w_l0 = lstm_w_ref[0]
    w_l1 = lstm_w_ref[1]
    w_l2 = lstm_w_ref[2]

    # small (f32, (16, 128)): one parameter row each (see init_params).
    small = small_ref[...]
    w_ih0 = small[0:1]          # (1, 4H) layer-0 input weight row (g-cols x2)
    b0 = small[1:2]             # (1, 4H)
    b1 = small[2:3]
    b2 = small[3:4]
    ln_g = small[4:5, 0:H]
    ln_b = small[5:6, 0:H]
    efc1_b = small[6:7]
    efc2_b = small[7:8]         # cols 64: zero padding
    head_b = small[8:9]         # [scale_b | shape_b | 0...]
    dfc1_b = small[9:10]
    dout_b = small[10:11, 0:1]  # scalar bias of the final projection

    dec_misc = dec_misc_ref[...]            # f32 (2, 512)
    dfc2_b = dec_misc[0:1]                  # (1, 512), cols 500: zero
    dout_w = dec_misc[1:2]                  # (1, 512), cols 500: zero

    def cell(gates, c):
        # One sigmoid over the full (B, 4H) gate vreg.  The g-gate columns were
        # pre-scaled by 2 at init, so tanh(x) = 2*sigmoid(2x) - 1 reuses it.
        sg = jax.nn.sigmoid(gates)
        i = sg[:, 0 * H:1 * H]
        f = sg[:, 1 * H:2 * H]
        g = 2.0 * sg[:, 2 * H:3 * H] - 1.0
        o = sg[:, 3 * H:4 * H]
        c_new = f * c + i * g
        h_new = o * jnp.tanh(c_new)
        return h_new, c_new

    def gdot(hv, w):
        # bf16 MXU operands, f32 accumulation; elementwise math stays f32.
        return jnp.dot(hv.astype(jnp.bfloat16), w, preferred_element_type=f32)

    # Layer-0 input contributions hoisted off the recurrent chain (VPU only).
    xv = x_ref[...]                                            # (B, T)
    inp0 = [xv[:, t:t + 1] * w_ih0 + b0 for t in range(T)]

    zeros = jnp.zeros((B, H), f32)
    h = [zeros, zeros, zeros]
    c = [zeros, zeros, zeros]

    # Wavefront schedule over the 3 layers: T + 2 rounds instead of 3T cells.
    for s in range(T + NUM_LAYERS - 1):
        do0 = 0 <= s < T          # layer 0 processes t = s
        do1 = 0 <= s - 1 < T      # layer 1 processes t = s - 1
        do2 = 0 <= s - 2 < T      # layer 2 processes t = s - 2

        # All gate matmuls in a round depend only on the previous round ->
        # independent MXU pushes that pipeline.
        g0 = gdot(h[0], w_l0) if (do0 or do1) else None   # (B, 8H)
        g1 = gdot(h[1], w_l1) if (do1 or do2) else None
        g2 = gdot(h[2], w_l2) if do2 else None

        nh, nc = list(h), list(c)
        if do0:
            nh[0], nc[0] = cell(inp0[s] + g0[:, 0:4 * H], c[0])
        if do1:
            nh[1], nc[1] = cell(g0[:, 4 * H:8 * H] + g1[:, 0:4 * H] + b1, c[1])
        if do2:
            nh[2], nc[2] = cell(g1[:, 4 * H:8 * H] + g2[:, 0:4 * H] + b2, c[2])
        h, c = nh, nc

    h_last = h[2]                                              # h_n[-1]: (B, H)

    # LayerNorm over the feature axis (biased variance, like PyTorch).
    mean = jnp.mean(h_last, axis=-1, keepdims=True)
    var = jnp.mean((h_last - mean) ** 2, axis=-1, keepdims=True)
    h_ln = (h_last - mean) * jax.lax.rsqrt(var + LN_EPS) * ln_g + ln_b

    # Packed encoder/decoder weight slab (bf16, rows aligned to the bf16 tile).
    efc1_w = wpack_ref[0:32, :]        # (32, 128)
    efc2_w = wpack_ref[32:160, :]      # (128, 128), output cols 64: zero
    head_w = wpack_ref[160:288, :]     # (128, 128), [scale|shape|0], rows 64: zero
    dfc1_w = wpack_ref[288:320, :]     # (32, 128)

    # Encoder MLP (dropout is identity in eval mode).
    hid1 = jnp.maximum(gdot(h_ln, efc1_w) + efc1_b, 0.0)       # (B, 128)
    hid2 = jnp.maximum(gdot(hid1, efc2_w) + efc2_b, 0.0)       # (B, 128), 64: = 0
    heads = gdot(hid2, head_w) + head_b                        # (B, 128)
    z_scale = jnp.exp(heads[:, 0:LATENT])
    z_shape = jnp.maximum(heads[:, LATENT:2 * LATENT], 1e-6)

    # GPD reparameterization: z = scale/shape * ((1 - u)^(-shape) - 1)
    u = u_ref[...]
    a = -z_shape * jnp.log(1.0 - u)          # matches reference's (1-u)**(-shape)
    z = (z_scale / z_shape) * _stable_expm1(a)

    # Decoder MLP.
    d1 = jnp.maximum(gdot(z, dfc1_w) + dfc1_b, 0.0)            # (B, 128)
    d2 = jnp.maximum(gdot(d1, dfc2_w_ref[...]) + dfc2_b, 0.0)  # (B, 512), pads 0
    # Final 500(->512 padded)->1 projection as VPU multiply + lane reduction.
    recon = jnp.sum(d2 * dout_w, axis=-1, keepdims=True) + dout_b

    # Lane-dense packed output: [z_scale(32) | z_shape(32) | recon(1) | pad].
    pad = jnp.zeros((B, OUT_W - (2 * LATENT + FUTURE)), f32)
    out_ref[...] = jnp.concatenate([z_scale, z_shape, recon, pad], axis=-1)


def init_params(key):
    ks = iter(jax.random.split(key, 64))

    def rnd(shape, scale=0.1):
        return jax.random.normal(next(ks), shape, jnp.float32) * scale

    H = LSTM_H

    def scale_g(w):
        # Fold the tanh -> 2*sigmoid(2x) - 1 trick into the g-gate columns.
        return w.at[..., 2 * H:3 * H].multiply(2.0)

    # LSTM layer 0 (input_dim = 1).
    w_ih0 = scale_g(rnd((INPUT_DIM, 4 * H)))                      # (1, 4H)
    w_hh0 = scale_g(rnd((H, 4 * H)))
    b0 = scale_g((rnd((4 * H,)) + rnd((4 * H,)))[None, :])        # b_ih + b_hh
    # LSTM layers 1, 2.
    w_ih1 = scale_g(rnd((H, 4 * H)))
    w_hh1 = scale_g(rnd((H, 4 * H)))
    b1 = scale_g((rnd((4 * H,)) + rnd((4 * H,)))[None, :])
    w_ih2 = scale_g(rnd((H, 4 * H)))
    w_hh2 = scale_g(rnd((H, 4 * H)))
    b2 = scale_g((rnd((4 * H,)) + rnd((4 * H,)))[None, :])

    # Per-source-state combined weights for the wavefront schedule.
    w_l0 = jnp.concatenate([w_hh0, w_ih1], axis=1)                # (H, 8H)
    w_l1 = jnp.concatenate([w_hh1, w_ih2], axis=1)                # (H, 8H)
    w_l2 = jnp.concatenate([w_hh2, jnp.zeros((H, 4 * H), jnp.float32)], axis=1)
    lstm_w = jnp.stack([w_l0, w_l1, w_l2]).astype(jnp.bfloat16)   # (3, H, 8H)

    # Encoder / decoder linears (stored transposed: (in, out)).
    efc1_w, efc1_b = rnd((H, 128)), rnd((1, 128))
    efc2_w, efc2_b = rnd((128, 64)), rnd((1, 64))
    scale_w, scale_b = rnd((64, LATENT)), rnd((1, LATENT))
    shape_w, shape_b = rnd((64, LATENT)), rnd((1, LATENT))
    dfc1_w, dfc1_b = rnd((LATENT, 128)), rnd((1, 128))
    dfc2_w, dfc2_b = rnd((128, 500)), rnd((1, 500))
    dout_w, dout_b = rnd((500, FUTURE)), rnd((1, FUTURE))

    def padw(w, rows, cols):
        return jnp.pad(w, ((0, rows - w.shape[0]), (0, cols - w.shape[1])))

    head_w = jnp.concatenate([scale_w, shape_w], axis=1)          # (64, 64)
    wpack = jnp.concatenate([
        efc1_w,                       # rows   0: 32
        padw(efc2_w, 128, 128),       # rows  32:160 (out cols 64: zero)
        padw(head_w, 128, 128),       # rows 160:288 (rows 64: zero)
        dfc1_w,                       # rows 288:320
    ], axis=0).astype(jnp.bfloat16)

    dfc2_w_p = padw(dfc2_w, 128, DEC_PAD).astype(jnp.bfloat16)    # (128, 512)
    dec_misc = jnp.concatenate([
        padw(dfc2_b, 1, DEC_PAD),          # row 0: fc2 bias
        padw(dout_w.T, 1, DEC_PAD),        # row 1: out weight row
    ], axis=0)                             # (2, 512) f32

    def row128(v):
        v = jnp.asarray(v, jnp.float32).reshape(1, -1)
        return jnp.pad(v, ((0, 0), (0, 128 - v.shape[1])))

    small = jnp.concatenate([
        row128(w_ih0),                                        # 0
        row128(b0),                                           # 1
        row128(b1),                                           # 2
        row128(b2),                                           # 3
        row128(jnp.ones((1, H), jnp.float32)),                # 4 LN gamma
        row128(jnp.zeros((1, H), jnp.float32)),               # 5 LN beta
        row128(efc1_b),                                       # 6
        row128(efc2_b),                                       # 7
        row128(jnp.concatenate([scale_b, shape_b], axis=1)),  # 8
        row128(dfc1_b),                                       # 9
        row128(dout_b),                                       # 10
        jnp.zeros((5, 128), jnp.float32),                     # pad to 16 rows
    ], axis=0)

    return dict(lstm_w=lstm_w, small=small, wpack=wpack,
                dfc2_w=dfc2_w_p, dec_misc=dec_misc)


def vae_forward(x, params, u):
    """x: (B, T, 1) float32, u: (B, LATENT) uniform samples in [0, 1)."""
    B, T, _ = x.shape
    x2d = x[:, :, 0]                                       # (B, T) scalar feature

    inputs = (x2d, u, params["lstm_w"], params["small"], params["wpack"],
              params["dfc2_w"], params["dec_misc"])
    vmem_spec = pl.BlockSpec(memory_space=pltpu.MemorySpace.VMEM)
    # Gridless call: the whole problem (<0.5 MiB) fits VMEM.  For large B on
    # v7x, add a batch grid with dimension_semantics=("parallel",) to engage
    # the second TensorCore; on v5e/v6e keep it gridless and grow B per call.
    packed = pl.pallas_call(
        vae_kernel,
        out_shape=jax.ShapeDtypeStruct((B, OUT_W), jnp.float32),
        in_specs=[vmem_spec] * len(inputs),
        out_specs=vmem_spec,
    )(*inputs)

    z_scale = packed[:, 0:LATENT]
    z_shape = packed[:, LATENT:2 * LATENT]
    recon = packed[:, 2 * LATENT:2 * LATENT + FUTURE]
    return recon, z_scale, z_shape


if __name__ == "__main__":
    key = jax.random.PRNGKey(0)
    k_param, k_x, k_u = jax.random.split(key, 3)

    B, T = 8, 8    # B >= 8 keeps every vreg sublane-full (perf review)
    params = init_params(k_param)
    x = jax.random.normal(k_x, (B, T, INPUT_DIM), jnp.float32)
    # uniform samples for the GPD reparameterization (torch.rand equivalent)
    u = jax.random.uniform(k_u, (B, LATENT), jnp.float32)

    recon, z_scale, z_shape = jax.block_until_ready(vae_forward(x, params, u))

    assert recon.shape == (B, FUTURE)
    assert z_scale.shape == (B, LATENT)
    assert z_shape.shape == (B, LATENT)
    assert bool(jnp.all(jnp.isfinite(recon)))
    assert bool(jnp.all(z_scale > 0.0))
    assert bool(jnp.all(z_shape >= 1e-6))
    print("KERNEL_OK")
</pallas_src>

<mosaic_0001>
module attributes {stable_mosaic.version = 11 : i64} {
  func.func @vae_kernel(%arg0: memref<8x8xf32, #tpu.memory_space<vmem>>, %arg1: memref<8x32xf32, #tpu.memory_space<vmem>>, %arg2: memref<3x32x256xbf16, #tpu.memory_space<vmem>>, %arg3: memref<16x128xf32, #tpu.memory_space<vmem>>, %arg4: memref<320x128xbf16, #tpu.memory_space<vmem>>, %arg5: memref<128x512xbf16, #tpu.memory_space<vmem>>, %arg6: memref<2x512xf32, #tpu.memory_space<vmem>>, %arg7: memref<8x128xf32, #tpu.memory_space<vmem>>) attributes {dimension_semantics = [], scalar_prefetch = 0 : i64, scratch_operands = 0 : i64, tpu.core_type = #tpu.core_type<tc>} {
    %c0 = arith.constant 0 : index
    %c0_0 = arith.constant 0 : index
    %c0_1 = arith.constant 0 : index
    %0 = vector.load %arg2[%c0, %c0_0, %c0_1] : memref<3x32x256xbf16, #tpu.memory_space<vmem>>, vector<1x32x256xbf16>
    %1 = vector.shape_cast %0 : vector<1x32x256xbf16> to vector<32x256xbf16>
    %c1 = arith.constant 1 : index
    %c0_2 = arith.constant 0 : index
    %c0_3 = arith.constant 0 : index
    %2 = vector.load %arg2[%c1, %c0_2, %c0_3] : memref<3x32x256xbf16, #tpu.memory_space<vmem>>, vector<1x32x256xbf16>
    %3 = vector.shape_cast %2 : vector<1x32x256xbf16> to vector<32x256xbf16>
    %c2 = arith.constant 2 : index
    %c0_4 = arith.constant 0 : index
    %c0_5 = arith.constant 0 : index
    %4 = vector.load %arg2[%c2, %c0_4, %c0_5] : memref<3x32x256xbf16, #tpu.memory_space<vmem>>, vector<1x32x256xbf16>
    %5 = vector.shape_cast %4 : vector<1x32x256xbf16> to vector<32x256xbf16>
    %c0_6 = arith.constant 0 : index
    %c0_7 = arith.constant 0 : index
    %6 = vector.load %arg3[%c0_6, %c0_7] : memref<16x128xf32, #tpu.memory_space<vmem>>, vector<16x128xf32>
    %7 = vector.extract_strided_slice %6 {offsets = [0, 0], sizes = [1, 128], strides = [1, 1]} : vector<16x128xf32> to vector<1x128xf32>
    %8 = vector.extract_strided_slice %6 {offsets = [1, 0], sizes = [1, 128], strides = [1, 1]} : vector<16x128xf32> to vector<1x128xf32>
    %9 = vector.extract_strided_slice %6 {offsets = [2, 0], sizes = [1, 128], strides = [1, 1]} : vector<16x128xf32> to vector<1x128xf32>
    %10 = vector.extract_strided_slice %6 {offsets = [3, 0], sizes = [1, 128], strides = [1, 1]} : vector<16x128xf32> to vector<1x128xf32>
    %11 = vector.extract_strided_slice %6 {offsets = [4, 0], sizes = [1, 32], strides = [1, 1]} : vector<16x128xf32> to vector<1x32xf32>
    %12 = vector.extract_strided_slice %6 {offsets = [5, 0], sizes = [1, 32], strides = [1, 1]} : vector<16x128xf32> to vector<1x32xf32>
    %13 = vector.extract_strided_slice %6 {offsets = [6, 0], sizes = [1, 128], strides = [1, 1]} : vector<16x128xf32> to vector<1x128xf32>
    %14 = vector.extract_strided_slice %6 {offsets = [7, 0], sizes = [1, 128], strides = [1, 1]} : vector<16x128xf32> to vector<1x128xf32>
    %15 = vector.extract_strided_slice %6 {offsets = [8, 0], sizes = [1, 128], strides = [1, 1]} : vector<16x128xf32> to vector<1x128xf32>
    %16 = vector.extract_strided_slice %6 {offsets = [9, 0], sizes = [1, 128], strides = [1, 1]} : vector<16x128xf32> to vector<1x128xf32>
    %17 = vector.extract_strided_slice %6 {offsets = [10, 0], sizes = [1, 1], strides = [1, 1]} : vector<16x128xf32> to vector<1x1xf32>
    %c0_8 = arith.constant 0 : index
    %c0_9 = arith.constant 0 : index
    %18 = vector.load %arg6[%c0_8, %c0_9] : memref<2x512xf32, #tpu.memory_space<vmem>>, vector<2x512xf32>
    %19 = vector.extract_strided_slice %18 {offsets = [0, 0], sizes = [1, 512], strides = [1, 1]} : vector<2x512xf32> to vector<1x512xf32>
    %20 = vector.extract_strided_slice %18 {offsets = [1, 0], sizes = [1, 512], strides = [1, 1]} : vector<2x512xf32> to vector<1x512xf32>
    %c0_10 = arith.constant 0 : index
    %c0_11 = arith.constant 0 : index
    %21 = vector.load %arg0[%c0_10, %c0_11] : memref<8x8xf32, #tpu.memory_space<vmem>>, vector<8x8xf32>
    %22 = vector.extract_strided_slice %21 {offsets = [0, 0], sizes = [8, 1], strides = [1, 1]} : vector<8x8xf32> to vector<8x1xf32>
    %23 = vector.broadcast %22 : vector<8x1xf32> to vector<8x128xf32>
    %24 = vector.broadcast %7 : vector<1x128xf32> to vector<8x128xf32>
    %25 = arith.mulf %23, %24 : vector<8x128xf32>
    %26 = vector.broadcast %8 : vector<1x128xf32> to vector<8x128xf32>
    %27 = arith.addf %25, %26 : vector<8x128xf32>
    %28 = vector.extract_strided_slice %21 {offsets = [0, 1], sizes = [8, 1], strides = [1, 1]} : vector<8x8xf32> to vector<8x1xf32>
    %29 = vector.broadcast %28 : vector<8x1xf32> to vector<8x128xf32>
    %30 = vector.broadcast %7 : vector<1x128xf32> to vector<8x128xf32>
    %31 = arith.mulf %29, %30 : vector<8x128xf32>
    %32 = vector.broadcast %8 : vector<1x128xf32> to vector<8x128xf32>
    %33 = arith.addf %31, %32 : vector<8x128xf32>
    %34 = vector.extract_strided_slice %21 {offsets = [0, 2], sizes = [8, 1], strides = [1, 1]} : vector<8x8xf32> to vector<8x1xf32>
    %35 = vector.broadcast %34 : vector<8x1xf32> to vector<8x128xf32>
    %36 = vector.broadcast %7 : vector<1x128xf32> to vector<8x128xf32>
    %37 = arith.mulf %35, %36 : vector<8x128xf32>
    %38 = vector.broadcast %8 : vector<1x128xf32> to vector<8x128xf32>
    %39 = arith.addf %37, %38 : vector<8x128xf32>
    %40 = vector.extract_strided_slice %21 {offsets = [0, 3], sizes = [8, 1], strides = [1, 1]} : vector<8x8xf32> to vector<8x1xf32>
    %41 = vector.broadcast %40 : vector<8x1xf32> to vector<8x128xf32>
    %42 = vector.broadcast %7 : vector<1x128xf32> to vector<8x128xf32>
    %43 = arith.mulf %41, %42 : vector<8x128xf32>
    %44 = vector.broadcast %8 : vector<1x128xf32> to vector<8x128xf32>
    %45 = arith.addf %43, %44 : vector<8x128xf32>
    %46 = vector.extract_strided_slice %21 {offsets = [0, 4], sizes = [8, 1], strides = [1, 1]} : vector<8x8xf32> to vector<8x1xf32>
    %47 = vector.broadcast %46 : vector<8x1xf32> to vector<8x128xf32>
    %48 = vector.broadcast %7 : vector<1x128xf32> to vector<8x128xf32>
    %49 = arith.mulf %47, %48 : vector<8x128xf32>
    %50 = vector.broadcast %8 : vector<1x128xf32> to vector<8x128xf32>
    %51 = arith.addf %49, %50 : vector<8x128xf32>
    %52 = vector.extract_strided_slice %21 {offsets = [0, 5], sizes = [8, 1], strides = [1, 1]} : vector<8x8xf32> to vector<8x1xf32>
    %53 = vector.broadcast %52 : vector<8x1xf32> to vector<8x128xf32>
    %54 = vector.broadcast %7 : vector<1x128xf32> to vector<8x128xf32>
    %55 = arith.mulf %53, %54 : vector<8x128xf32>
    %56 = vector.broadcast %8 : vector<1x128xf32> to vector<8x128xf32>
    %57 = arith.addf %55, %56 : vector<8x128xf32>
    %58 = vector.extract_strided_slice %21 {offsets = [0, 6], sizes = [8, 1], strides = [1, 1]} : vector<8x8xf32> to vector<8x1xf32>
    %59 = vector.broadcast %58 : vector<8x1xf32> to vector<8x128xf32>
    %60 = vector.broadcast %7 : vector<1x128xf32> to vector<8x128xf32>
    %61 = arith.mulf %59, %60 : vector<8x128xf32>
    %62 = vector.broadcast %8 : vector<1x128xf32> to vector<8x128xf32>
    %63 = arith.addf %61, %62 : vector<8x128xf32>
    %64 = vector.extract_strided_slice %21 {offsets = [0, 7], sizes = [8, 1], strides = [1, 1]} : vector<8x8xf32> to vector<8x1xf32>
    %65 = vector.broadcast %64 : vector<8x1xf32> to vector<8x128xf32>
    %66 = vector.broadcast %7 : vector<1x128xf32> to vector<8x128xf32>
    %67 = arith.mulf %65, %66 : vector<8x128xf32>
    %68 = vector.broadcast %8 : vector<1x128xf32> to vector<8x128xf32>
    %69 = arith.addf %67, %68 : vector<8x128xf32>
    %cst = arith.constant 0.000000e+00 : f32
    %70 = vector.broadcast %cst : f32 to vector<8x32xf32>
    %71 = arith.truncf %70 : vector<8x32xf32> to vector<8x32xbf16>
    %cst_12 = arith.constant dense<0.000000e+00> : vector<8x256xf32>
    %72 = tpu.matmul %71, %1, %cst_12 {dimension_numbers = #tpu.dot_dimension_numbers<[1], [0], [0], [1], [0, 0, 1, 1], [], []>} : vector<8x32xbf16>, vector<32x256xbf16>, vector<8x256xf32> -> vector<8x256xf32>
    %73 = vector.extract_strided_slice %72 {offsets = [0, 0], sizes = [8, 128], strides = [1, 1]} : vector<8x256xf32> to vector<8x128xf32>
    %74 = arith.addf %27, %73 : vector<8x128xf32>
    %75 = arith.negf %74 : vector<8x128xf32>
    %76 = math.exp %75 : vector<8x128xf32>
    %cst_13 = arith.constant 1.000000e+00 : f32
    %77 = vector.broadcast %cst_13 : f32 to vector<8x128xf32>
    %78 = arith.addf %77, %76 : vector<8x128xf32>
    %79 = arith.divf %77, %78 : vector<8x128xf32>
    %80 = vector.extract_strided_slice %79 {offsets = [0, 0], sizes = [8, 32], strides = [1, 1]} : vector<8x128xf32> to vector<8x32xf32>
    %81 = vector.extract_strided_slice %79 {offsets = [0, 32], sizes = [8, 32], strides = [1, 1]} : vector<8x128xf32> to vector<8x32xf32>
    %82 = vector.extract_strided_slice %79 {offsets = [0, 64], sizes = [8, 32], strides = [1, 1]} : vector<8x128xf32> to vector<8x32xf32>
    %cst_14 = arith.constant 2.000000e+00 : f32
    %83 = vector.broadcast %cst_14 : f32 to vector<8x32xf32>
    %84 = arith.mulf %83, %82 : vector<8x32xf32>
    %cst_15 = arith.constant 1.000000e+00 : f32
    %85 = vector.broadcast %cst_15 : f32 to vector<8x32xf32>
    %86 = arith.subf %84, %85 : vector<8x32xf32>
    %87 = vector.extract_strided_slice %79 {offsets = [0, 96], sizes = [8, 32], strides = [1, 1]} : vector<8x128xf32> to vector<8x32xf32>
    %88 = arith.mulf %81, %70 : vector<8x32xf32>
    %89 = arith.mulf %80, %86 : vector<8x32xf32>
    %90 = arith.addf %88, %89 : vector<8x32xf32>
    %91 = math.tanh %90 : vector<8x32xf32>
    %92 = arith.mulf %87, %91 : vector<8x32xf32>
    %93 = arith.truncf %92 : vector<8x32xf32> to vector<8x32xbf16>
    %cst_16 = arith.constant dense<0.000000e+00> : vector<8x256xf32>
    %94 = tpu.matmul %93, %1, %cst_16 {dimension_numbers = #tpu.dot_dimension_numbers<[1], [0], [0], [1], [0, 0, 1, 1], [], []>} : vector<8x32xbf16>, vector<32x256xbf16>, vector<8x256xf32> -> vector<8x256xf32>
    %95 = arith.truncf %70 : vector<8x32xf32> to vector<8x32xbf16>
    %cst_17 = arith.constant dense<0.000000e+00> : vector<8x256xf32>
    %96 = tpu.matmul %95, %3, %cst_17 {dimension_numbers = #tpu.dot_dimension_numbers<[1], [0], [0], [1], [0, 0, 1, 1], [], []>} : vector<8x32xbf16>, vector<32x256xbf16>, vector<8x256xf32> -> vector<8x256xf32>
    %97 = vector.extract_strided_slice %94 {offsets = [0, 0], sizes = [8, 128], strides = [1, 1]} : vector<8x256xf32> to vector<8x128xf32>
    %98 = arith.addf %33, %97 : vector<8x128xf32>
    %99 = arith.negf %98 : vector<8x128xf32>
    %100 = math.exp %99 : vector<8x128xf32>
    %cst_18 = arith.constant 1.000000e+00 : f32
    %101 = vector.broadcast %cst_18 : f32 to vector<8x128xf32>
    %102 = arith.addf %101, %100 : vector<8x128xf32>
    %103 = arith.divf %101, %102 : vector<8x128xf32>
    %104 = vector.extract_strided_slice %103 {offsets = [0, 0], sizes = [8, 32], strides = [1, 1]} : vector<8x128xf32> to vector<8x32xf32>
    %105 = vector.extract_strided_slice %103 {offsets = [0, 32], sizes = [8, 32], strides = [1, 1]} : vector<8x128xf32> to vector<8x32xf32>
    %106 = vector.extract_strided_slice %103 {offsets = [0, 64], sizes = [8, 32], strides = [1, 1]} : vector<8x128xf32> to vector<8x32xf32>
    %cst_19 = arith.constant 2.000000e+00 : f32
    %107 = vector.broadcast %cst_19 : f32 to vector<8x32xf32>
    %108 = arith.mulf %107, %106 : vector<8x32xf32>
    %cst_20 = arith.constant 1.000000e+00 : f32
    %109 = vector.broadcast %cst_20 : f32 to vector<8x32xf32>
    %110 = arith.subf %108, %109 : vector<8x32xf32>
    %111 = vector.extract_strided_slice %103 {offsets = [0, 96], sizes = [8, 32], strides = [1, 1]} : vector<8x128xf32> to vector<8x32xf32>
    %112 = arith.mulf %105, %90 : vector<8x32xf32>
    %113 = arith.mulf %104, %110 : vector<8x32xf32>
    %114 = arith.addf %112, %113 : vector<8x32xf32>
    %115 = math.tanh %114 : vector<8x32xf32>
    %116 = arith.mulf %111, %115 : vector<8x32xf32>
    %117 = vector.extract_strided_slice %94 {offsets = [0, 128], sizes = [8, 128], strides = [1, 1]} : vector<8x256xf32> to vector<8x128xf32>
    %118 = vector.extract_strided_slice %96 {offsets = [0, 0], sizes = [8, 128], strides = [1, 1]} : vector<8x256xf32> to vector<8x128xf32>
    %119 = arith.addf %117, %118 : vector<8x128xf32>
    %120 = vector.broadcast %9 : vector<1x128xf32> to vector<8x128xf32>
    %121 = arith.addf %119, %120 : vector<8x128xf32>
    %122 = arith.negf %121 : vector<8x128xf32>
    %123 = math.exp %122 : vector<8x128xf32>
    %cst_21 = arith.constant 1.000000e+00 : f32
    %124 = vector.broadcast %cst_21 : f32 to vector<8x128xf32>
    %125 = arith.addf %124, %123 : vector<8x128xf32>
    %126 = arith.divf %124, %125 : vector<8x128xf32>
    %127 = vector.extract_strided_slice %126 {offsets = [0, 0], sizes = [8, 32], strides = [1, 1]} : vector<8x128xf32> to vector<8x32xf32>
    %128 = vector.extract_strided_slice %126 {offsets = [0, 32], sizes = [8, 32], strides = [1, 1]} : vector<8x128xf32> to vector<8x32xf32>
    %129 = vector.extract_strided_slice %126 {offsets = [0, 64], sizes = [8, 32], strides = [1, 1]} : vector<8x128xf32> to vector<8x32xf32>
    %cst_22 = arith.constant 2.000000e+00 : f32
    %130 = vector.broadcast %cst_22 : f32 to vector<8x32xf32>
    %131 = arith.mulf %130, %129 : vector<8x32xf32>
    %cst_23 = arith.constant 1.000000e+00 : f32
    %132 = vector.broadcast %cst_23 : f32 to vector<8x32xf32>
    %133 = arith.subf %131, %132 : vector<8x32xf32>
    %134 = vector.extract_strided_slice %126 {offsets = [0, 96], sizes = [8, 32], strides = [1, 1]} : vector<8x128xf32> to vector<8x32xf32>
    %135 = arith.mulf %128, %70 : vector<8x32xf32>
    %136 = arith.mulf %127, %133 : vector<8x32xf32>
    %137 = arith.addf %135, %136 : vector<8x32xf32>
    %138 = math.tanh %137 : vector<8x32xf32>
    %139 = arith.mulf %134, %138 : vector<8x32xf32>
    %140 = arith.truncf %116 : vector<8x32xf32> to vector<8x32xbf16>
    %cst_24 = arith.constant dense<0.000000e+00> : vector<8x256xf32>
    %141 = tpu.matmul %140, %1, %cst_24 {dimension_numbers = #tpu.dot_dimension_numbers<[1], [0], [0], [1], [0, 0, 1, 1], [], []>} : vector<8x32xbf16>, vector<32x256xbf16>, vector<8x256xf32> -> vector<8x256xf32>
    %142 = arith.truncf %139 : vector<8x32xf32> to vector<8x32xbf16>
    %cst_25 = arith.constant dense<0.000000e+00> : vector<8x256xf32>
    %143 = tpu.matmul %142, %3, %cst_25 {dimension_numbers = #tpu.dot_dimension_numbers<[1], [0], [0], [1], [0, 0, 1, 1], [], []>} : vector<8x32xbf16>, vector<32x256xbf16>, vector<8x256xf32> -> vector<8x256xf32>
    %144 = arith.truncf %70 : vector<8x32xf32> to vector<8x32xbf16>
    %cst_26 = arith.constant dense<0.000000e+00> : vector<8x256xf32>
    %145 = tpu.matmul %144, %5, %cst_26 {dimension_numbers = #tpu.dot_dimension_numbers<[1], [0], [0], [1], [0, 0, 1, 1], [], []>} : vector<8x32xbf16>, vector<32x256xbf16>, vector<8x256xf32> -> vector<8x256xf32>
    %146 = vector.extract_strided_slice %141 {offsets = [0, 0], sizes = [8, 128], strides = [1, 1]} : vector<8x256xf32> to vector<8x128xf32>
    %147 = arith.addf %39, %146 : vector<8x128xf32>
    %148 = arith.negf %147 : vector<8x128xf32>
    %149 = math.exp %148 : vector<8x128xf32>
    %cst_27 = arith.constant 1.000000e+00 : f32
    %150 = vector.broadcast %cst_27 : f32 to vector<8x128xf32>
    %151 = arith.addf %150, %149 : vector<8x128xf32>
    %152 = arith.divf %150, %151 : vector<8x128xf32>
    %153 = vector.extract_strided_slice %152 {offsets = [0, 0], sizes = [8, 32], strides = [1, 1]} : vector<8x128xf32> to vector<8x32xf32>
    %154 = vector.extract_strided_slice %152 {offsets = [0, 32], sizes = [8, 32], strides = [1, 1]} : vector<8x128xf32> to vector<8x32xf32>
    %155 = vector.extract_strided_slice %152 {offsets = [0, 64], sizes = [8, 32], strides = [1, 1]} : vector<8x128xf32> to vector<8x32xf32>
    %cst_28 = arith.constant 2.000000e+00 : f32
    %156 = vector.broadcast %cst_28 : f32 to vector<8x32xf32>
    %157 = arith.mulf %156, %155 : vector<8x32xf32>
    %cst_29 = arith.constant 1.000000e+00 : f32
    %158 = vector.broadcast %cst_29 : f32 to vector<8x32xf32>
    %159 = arith.subf %157, %158 : vector<8x32xf32>
    %160 = vector.extract_strided_slice %152 {offsets = [0, 96], sizes = [8, 32], strides = [1, 1]} : vector<8x128xf32> to vector<8x32xf32>
    %161 = arith.mulf %154, %114 : vector<8x32xf32>
    %162 = arith.mulf %153, %159 : vector<8x32xf32>
    %163 = arith.addf %161, %162 : vector<8x32xf32>
    %164 = math.tanh %163 : vector<8x32xf32>
    %165 = arith.mulf %160, %164 : vector<8x32xf32>
    %166 = vector.extract_strided_slice %141 {offsets = [0, 128], sizes = [8, 128], strides = [1, 1]} : vector<8x256xf32> to vector<8x128xf32>
    %167 = vector.extract_strided_slice %143 {offsets = [0, 0], sizes = [8, 128], strides = [1, 1]} : vector<8x256xf32> to vector<8x128xf32>
    %168 = arith.addf %166, %167 : vector<8x128xf32>
    %169 = vector.broadcast %9 : vector<1x128xf32> to vector<8x128xf32>
    %170 = arith.addf %168, %169 : vector<8x128xf32>
    %171 = arith.negf %170 : vector<8x128xf32>
    %172 = math.exp %171 : vector<8x128xf32>
    %cst_30 = arith.constant 1.000000e+00 : f32
    %173 = vector.broadcast %cst_30 : f32 to vector<8x128xf32>
    %174 = arith.addf %173, %172 : vector<8x128xf32>
    %175 = arith.divf %173, %174 : vector<8x128xf32>
    %176 = vector.extract_strided_slice %175 {offsets = [0, 0], sizes = [8, 32], strides = [1, 1]} : vector<8x128xf32> to vector<8x32xf32>
    %177 = vector.extract_strided_slice %175 {offsets = [0, 32], sizes = [8, 32], strides = [1, 1]} : vector<8x128xf32> to vector<8x32xf32>
    %178 = vector.extract_strided_slice %175 {offsets = [0, 64], sizes = [8, 32], strides = [1, 1]} : vector<8x128xf32> to vector<8x32xf32>
    %cst_31 = arith.constant 2.000000e+00 : f32
    %179 = vector.broadcast %cst_31 : f32 to vector<8x32xf32>
    %180 = arith.mulf %179, %178 : vector<8x32xf32>
    %cst_32 = arith.constant 1.000000e+00 : f32
    %181 = vector.broadcast %cst_32 : f32 to vector<8x32xf32>
    %182 = arith.subf %180, %181 : vector<8x32xf32>
    %183 = vector.extract_strided_slice %175 {offsets = [0, 96], sizes = [8, 32], strides = [1, 1]} : vector<8x128xf32> to vector<8x32xf32>
    %184 = arith.mulf %177, %137 : vector<8x32xf32>
    %185 = arith.mulf %176, %182 : vector<8x32xf32>
    %186 = arith.addf %184, %185 : vector<8x32xf32>
    %187 = math.tanh %186 : vector<8x32xf32>
    %188 = arith.mulf %183, %187 : vector<8x32xf32>
    %189 = vector.extract_strided_slice %143 {offsets = [0, 128], sizes = [8, 128], strides = [1, 1]} : vector<8x256xf32> to vector<8x128xf32>
    %190 = vector.extract_strided_slice %145 {offsets = [0, 0], sizes = [8, 128], strides = [1, 1]} : vector<8x256xf32> to vector<8x128xf32>
    %191 = arith.addf %189, %190 : vector<8x128xf32>
    %192 = vector.broadcast %10 : vector<1x128xf32> to vector<8x128xf32>
    %193 = arith.addf %191, %192 : vector<8x128xf32>
    %194 = arith.negf %193 : vector<8x128xf32>
    %195 = math.exp %194 : vector<8x128xf32>
    %cst_33 = arith.constant 1.000000e+00 : f32
    %196 = vector.broadcast %cst_33 : f32 to vector<8x128xf32>
    %197 = arith.addf %196, %195 : vector<8x128xf32>
    %198 = arith.divf %196, %197 : vector<8x128xf32>
    %199 = vector.extract_strided_slice %198 {offsets = [0, 0], sizes = [8, 32], strides = [1, 1]} : vector<8x128xf32> to vector<8x32xf32>
    %200 = vector.extract_strided_slice %198 {offsets = [0, 32], sizes = [8, 32], strides = [1, 1]} : vector<8x128xf32> to vector<8x32xf32>
    %201 = vector.extract_strided_slice %198 {offsets = [0, 64], sizes = [8, 32], strides = [1, 1]} : vector<8x128xf32> to vector<8x32xf32>
    %cst_34 = arith.constant 2.000000e+00 : f32
    %202 = vector.broadcast %cst_34 : f32 to vector<8x32xf32>
    %203 = arith.mulf %202, %201 : vector<8x32xf32>
    %cst_35 = arith.constant 1.000000e+00 : f32
    %204 = vector.broadcast %cst_35 : f32 to vector<8x32xf32>
    %205 = arith.subf %203, %204 : vector<8x32xf32>
    %206 = vector.extract_strided_slice %198 {offsets = [0, 96], sizes = [8, 32], strides = [1, 1]} : vector<8x128xf32> to vector<8x32xf32>
    %207 = arith.mulf %200, %70 : vector<8x32xf32>
    %208 = arith.mulf %199, %205 : vector<8x32xf32>
    %209 = arith.addf %207, %208 : vector<8x32xf32>
    %210 = math.tanh %209 : vector<8x32xf32>
    %211 = arith.mulf %206, %210 : vector<8x32xf32>
    %212 = arith.truncf %165 : vector<8x32xf32> to vector<8x32xbf16>
    %cst_36 = arith.constant dense<0.000000e+00> : vector<8x256xf32>
    %213 = tpu.matmul %212, %1, %cst_36 {dimension_numbers = #tpu.dot_dimension_numbers<[1], [0], [0], [1], [0, 0, 1, 1], [], []>} : vector<8x32xbf16>, vector<32x256xbf16>, vector<8x256xf32> -> vector<8x256xf32>
    %214 = arith.truncf %188 : vector<8x32xf32> to vector<8x32xbf16>
    %cst_37 = arith.constant dense<0.000000e+00> : vector<8x256xf32>
    %215 = tpu.matmul %214, %3, %cst_37 {dimension_numbers = #tpu.dot_dimension_numbers<[1], [0], [0], [1], [0, 0, 1, 1], [], []>} : vector<8x32xbf16>, vector<32x256xbf16>, vector<8x256xf32> -> vector<8x256xf32>
    %216 = arith.truncf %211 : vector<8x32xf32> to vector<8x32xbf16>
    %cst_38 = arith.constant dense<0.000000e+00> : vector<8x256xf32>
    %217 = tpu.matmul %216, %5, %cst_38 {dimension_numbers = #tpu.dot_dimension_numbers<[1], [0], [0], [1], [0, 0, 1, 1], [], []>} : vector<8x32xbf16>, vector<32x256xbf16>, vector<8x256xf32> -> vector<8x256xf32>
    %218 = vector.extract_strided_slice %213 {offsets = [0, 0], sizes = [8, 128], strides = [1, 1]} : vector<8x256xf32> to vector<8x128xf32>
    %219 = arith.addf %45, %218 : vector<8x128xf32>
    %220 = arith.negf %219 : vector<8x128xf32>
    %221 = math.exp %220 : vector<8x128xf32>
    %cst_39 = arith.constant 1.000000e+00 : f32
    %222 = vector.broadcast %cst_39 : f32 to vector<8x128xf32>
    %223 = arith.addf %222, %221 : vector<8x128xf32>
    %224 = arith.divf %222, %223 : vector<8x128xf32>
    %225 = vector.extract_strided_slice %224 {offsets = [0, 0], sizes = [8, 32], strides = [1, 1]} : vector<8x128xf32> to vector<8x32xf32>
    %226 = vector.extract_strided_slice %224 {offsets = [0, 32], sizes = [8, 32], strides = [1, 1]} : vector<8x128xf32> to vector<8x32xf32>
    %227 = vector.extract_strided_slice %224 {offsets = [0, 64], sizes = [8, 32], strides = [1, 1]} : vector<8x128xf32> to vector<8x32xf32>
    %cst_40 = arith.constant 2.000000e+00 : f32
    %228 = vector.broadcast %cst_40 : f32 to vector<8x32xf32>
    %229 = arith.mulf %228, %227 : vector<8x32xf32>
    %cst_41 = arith.constant 1.000000e+00 : f32
    %230 = vector.broadcast %cst_41 : f32 to vector<8x32xf32>
    %231 = arith.subf %229, %230 : vector<8x32xf32>
    %232 = vector.extract_strided_slice %224 {offsets = [0, 96], sizes = [8, 32], strides = [1, 1]} : vector<8x128xf32> to vector<8x32xf32>
    %233 = arith.mulf %226, %163 : vector<8x32xf32>
    %234 = arith.mulf %225, %231 : vector<8x32xf32>
    %235 = arith.addf %233, %234 : vector<8x32xf32>
    %236 = math.tanh %235 : vector<8x32xf32>
    %237 = arith.mulf %232, %236 : vector<8x32xf32>
    %238 = vector.extract_strided_slice %213 {offsets = [0, 128], sizes = [8, 128], strides = [1, 1]} : vector<8x256xf32> to vector<8x128xf32>
    %239 = vector.extract_strided_slice %215 {offsets = [0, 0], sizes = [8, 128], strides = [1, 1]} : vector<8x256xf32> to vector<8x128xf32>
    %240 = arith.addf %238, %239 : vector<8x128xf32>
    %241 = vector.broadcast %9 : vector<1x128xf32> to vector<8x128xf32>
    %242 = arith.addf %240, %241 : vector<8x128xf32>
    %243 = arith.negf %242 : vector<8x128xf32>
    %244 = math.exp %243 : vector<8x128xf32>
    %cst_42 = arith.constant 1.000000e+00 : f32
    %245 = vector.broadcast %cst_42 : f32 to vector<8x128xf32>
    %246 = arith.addf %245, %244 : vector<8x128xf32>
    %247 = arith.divf %245, %246 : vector<8x128xf32>
    %248 = vector.extract_strided_slice %247 {offsets = [0, 0], sizes = [8, 32], strides = [1, 1]} : vector<8x128xf32> to vector<8x32xf32>
    %249 = vector.extract_strided_slice %247 {offsets = [0, 32], sizes = [8, 32], strides = [1, 1]} : vector<8x128xf32> to vector<8x32xf32>
    %250 = vector.extract_strided_slice %247 {offsets = [0, 64], sizes = [8, 32], strides = [1, 1]} : vector<8x128xf32> to vector<8x32xf32>
    %cst_43 = arith.constant 2.000000e+00 : f32
    %251 = vector.broadcast %cst_43 : f32 to vector<8x32xf32>
    %252 = arith.mulf %251, %250 : vector<8x32xf32>
    %cst_44 = arith.constant 1.000000e+00 : f32
    %253 = vector.broadcast %cst_44 : f32 to vector<8x32xf32>
    %254 = arith.subf %252, %253 : vector<8x32xf32>
    %255 = vector.extract_strided_slice %247 {offsets = [0, 96], sizes = [8, 32], strides = [1, 1]} : vector<8x128xf32> to vector<8x32xf32>
    %256 = arith.mulf %249, %186 : vector<8x32xf32>
    %257 = arith.mulf %248, %254 : vector<8x32xf32>
    %258 = arith.addf %256, %257 : vector<8x32xf32>
    %259 = math.tanh %258 : vector<8x32xf32>
    %260 = arith.mulf %255, %259 : vector<8x32xf32>
    %261 = vector.extract_strided_slice %215 {offsets = [0, 128], sizes = [8, 128], strides = [1, 1]} : vector<8x256xf32> to vector<8x128xf32>
    %262 = vector.extract_strided_slice %217 {offsets = [0, 0], sizes = [8, 128], strides = [1, 1]} : vector<8x256xf32> to vector<8x128xf32>
    %263 = arith.addf %261, %262 : vector<8x128xf32>
    %264 = vector.broadcast %10 : vector<1x128xf32> to vector<8x128xf32>
    %265 = arith.addf %263, %264 : vector<8x128xf32>
    %266 = arith.negf %265 : vector<8x128xf32>
    %267 = math.exp %266 : vector<8x128xf32>
    %cst_45 = arith.constant 1.000000e+00 : f32
    %268 = vector.broadcast %cst_45 : f32 to vector<8x128xf32>
    %269 = arith.addf %268, %267 : vector<8x128xf32>
    %270 = arith.divf %268, %269 : vector<8x128xf32>
    %271 = vector.extract_strided_slice %270 {offsets = [0, 0], sizes = [8, 32], strides = [1, 1]} : vector<8x128xf32> to vector<8x32xf32>
    %272 = vector.extract_strided_slice %270 {offsets = [0, 32], sizes = [8, 32], strides = [1, 1]} : vector<8x128xf32> to vector<8x32xf32>
    %273 = vector.extract_strided_slice %270 {offsets = [0, 64], sizes = [8, 32], strides = [1, 1]} : vector<8x128xf32> to vector<8x32xf32>
    %cst_46 = arith.constant 2.000000e+00 : f32
    %274 = vector.broadcast %cst_46 : f32 to vector<8x32xf32>
    %275 = arith.mulf %274, %273 : vector<8x32xf32>
    %cst_47 = arith.constant 1.000000e+00 : f32
    %276 = vector.broadcast %cst_47 : f32 to vector<8x32xf32>
    %277 = arith.subf %275, %276 : vector<8x32xf32>
    %278 = vector.extract_strided_slice %270 {offsets = [0, 96], sizes = [8, 32], strides = [1, 1]} : vector<8x128xf32> to vector<8x32xf32>
    %279 = arith.mulf %272, %209 : vector<8x32xf32>
    %280 = arith.mulf %271, %277 : vector<8x32xf32>
    %281 = arith.addf %279, %280 : vector<8x32xf32>
    %282 = math.tanh %281 : vector<8x32xf32>
    %283 = arith.mulf %278, %282 : vector<8x32xf32>
    %284 = arith.truncf %237 : vector<8x32xf32> to vector<8x32xbf16>
    %cst_48 = arith.constant dense<0.000000e+00> : vector<8x256xf32>
    %285 = tpu.matmul %284, %1, %cst_48 {dimension_numbers = #tpu.dot_dimension_numbers<[1], [0], [0], [1], [0, 0, 1, 1], [], []>} : vector<8x32xbf16>, vector<32x256xbf16>, vector<8x256xf32> -> vector<8x256xf32>
    %286 = arith.truncf %260 : vector<8x32xf32> to vector<8x32xbf16>
    %cst_49 = arith.constant dense<0.000000e+00> : vector<8x256xf32>
    %287 = tpu.matmul %286, %3, %cst_49 {dimension_numbers = #tpu.dot_dimension_numbers<[1], [0], [0], [1], [0, 0, 1, 1], [], []>} : vector<8x32xbf16>, vector<32x256xbf16>, vector<8x256xf32> -> vector<8x256xf32>
    %288 = arith.truncf %283 : vector<8x32xf32> to vector<8x32xbf16>
    %cst_50 = arith.constant dense<0.000000e+00> : vector<8x256xf32>
    %289 = tpu.matmul %288, %5, %cst_50 {dimension_numbers = #tpu.dot_dimension_numbers<[1], [0], [0], [1], [0, 0, 1, 1], [], []>} : vector<8x32xbf16>, vector<32x256xbf16>, vector<8x256xf32> -> vector<8x256xf32>
    %290 = vector.extract_strided_slice %285 {offsets = [0, 0], sizes = [8, 128], strides = [1, 1]} : vector<8x256xf32> to vector<8x128xf32>
    %291 = arith.addf %51, %290 : vector<8x128xf32>
    %292 = arith.negf %291 : vector<8x128xf32>
    %293 = math.exp %292 : vector<8x128xf32>
    %cst_51 = arith.constant 1.000000e+00 : f32
    %294 = vector.broadcast %cst_51 : f32 to vector<8x128xf32>
    %295 = arith.addf %294, %293 : vector<8x128xf32>
    %296 = arith.divf %294, %295 : vector<8x128xf32>
    %297 = vector.extract_strided_slice %296 {offsets = [0, 0], sizes = [8, 32], strides = [1, 1]} : vector<8x128xf32> to vector<8x32xf32>
    %298 = vector.extract_strided_slice %296 {offsets = [0, 32], sizes = [8, 32], strides = [1, 1]} : vector<8x128xf32> to vector<8x32xf32>
    %299 = vector.extract_strided_slice %296 {offsets = [0, 64], sizes = [8, 32], strides = [1, 1]} : vector<8x128xf32> to vector<8x32xf32>
    %cst_52 = arith.constant 2.000000e+00 : f32
    %300 = vector.broadcast %cst_52 : f32 to vector<8x32xf32>
    %301 = arith.mulf %300, %299 : vector<8x32xf32>
    %cst_53 = arith.constant 1.000000e+00 : f32
    %302 = vector.broadcast %cst_53 : f32 to vector<8x32xf32>
    %303 = arith.subf %301, %302 : vector<8x32xf32>
    %304 = vector.extract_strided_slice %296 {offsets = [0, 96], sizes = [8, 32], strides = [1, 1]} : vector<8x128xf32> to vector<8x32xf32>
    %305 = arith.mulf %298, %235 : vector<8x32xf32>
    %306 = arith.mulf %297, %303 : vector<8x32xf32>
    %307 = arith.addf %305, %306 : vector<8x32xf32>
    %308 = math.tanh %307 : vector<8x32xf32>
    %309 = arith.mulf %304, %308 : vector<8x32xf32>
    %310 = vector.extract_strided_slice %285 {offsets = [0, 128], sizes = [8, 128], strides = [1, 1]} : vector<8x256xf32> to vector<8x128xf32>
    %311 = vector.extract_strided_slice %287 {offsets = [0, 0], sizes = [8, 128], strides = [1, 1]} : vector<8x256xf32> to vector<8x128xf32>
    %312 = arith.addf %310, %311 : vector<8x128xf32>
    %313 = vector.broadcast %9 : vector<1x128xf32> to vector<8x128xf32>
    %314 = arith.addf %312, %313 : vector<8x128xf32>
    %315 = arith.negf %314 : vector<8x128xf32>
    %316 = math.exp %315 : vector<8x128xf32>
    %cst_54 = arith.constant 1.000000e+00 : f32
    %317 = vector.broadcast %cst_54 : f32 to vector<8x128xf32>
    %318 = arith.addf %317, %316 : vector<8x128xf32>
    %319 = arith.divf %317, %318 : vector<8x128xf32>
    %320 = vector.extract_strided_slice %319 {offsets = [0, 0], sizes = [8, 32], strides = [1, 1]} : vector<8x128xf32> to vector<8x32xf32>
    %321 = vector.extract_strided_slice %319 {offsets = [0, 32], sizes = [8, 32], strides = [1, 1]} : vector<8x128xf32> to vector<8x32xf32>
    %322 = vector.extract_strided_slice %319 {offsets = [0, 64], sizes = [8, 32], strides = [1, 1]} : vector<8x128xf32> to vector<8x32xf32>
    %cst_55 = arith.constant 2.000000e+00 : f32
    %323 = vector.broadcast %cst_55 : f32 to vector<8x32xf32>
    %324 = arith.mulf %323, %322 : vector<8x32xf32>
    %cst_56 = arith.constant 1.000000e+00 : f32
    %325 = vector.broadcast %cst_56 : f32 to vector<8x32xf32>
    %326 = arith.subf %324, %325 : vector<8x32xf32>
    %327 = vector.extract_strided_slice %319 {offsets = [0, 96], sizes = [8, 32], strides = [1, 1]} : vector<8x128xf32> to vector<8x32xf32>
    %328 = arith.mulf %321, %258 : vector<8x32xf32>
    %329 = arith.mulf %320, %326 : vector<8x32xf32>
    %330 = arith.addf %328, %329 : vector<8x32xf32>
    %331 = math.tanh %330 : vector<8x32xf32>
    %332 = arith.mulf %327, %331 : vector<8x32xf32>
    %333 = vector.extract_strided_slice %287 {offsets = [0, 128], sizes = [8, 128], strides = [1, 1]} : vector<8x256xf32> to vector<8x128xf32>
    %334 = vector.extract_strided_slice %289 {offsets = [0, 0], sizes = [8, 128], strides = [1, 1]} : vector<8x256xf32> to vector<8x128xf32>
    %335 = arith.addf %333, %334 : vector<8x128xf32>
    %336 = vector.broadcast %10 : vector<1x128xf32> to vector<8x128xf32>
    %337 = arith.addf %335, %336 : vector<8x128xf32>
    %338 = arith.negf %337 : vector<8x128xf32>
    %339 = math.exp %338 : vector<8x128xf32>
    %cst_57 = arith.constant 1.000000e+00 : f32
    %340 = vector.broadcast %cst_57 : f32 to vector<8x128xf32>
    %341 = arith.addf %340, %339 : vector<8x128xf32>
    %342 = arith.divf %340, %341 : vector<8x128xf32>
    %343 = vector.extract_strided_slice %342 {offsets = [0, 0], sizes = [8, 32], strides = [1, 1]} : vector<8x128xf32> to vector<8x32xf32>
    %344 = vector.extract_strided_slice %342 {offsets = [0, 32], sizes = [8, 32], strides = [1, 1]} : vector<8x128xf32> to vector<8x32xf32>
    %345 = vector.extract_strided_slice %342 {offsets = [0, 64], sizes = [8, 32], strides = [1, 1]} : vector<8x128xf32> to vector<8x32xf32>
    %cst_58 = arith.constant 2.000000e+00 : f32
    %346 = vector.broadcast %cst_58 : f32 to vector<8x32xf32>
    %347 = arith.mulf %346, %345 : vector<8x32xf32>
    %cst_59 = arith.constant 1.000000e+00 : f32
    %348 = vector.broadcast %cst_59 : f32 to vector<8x32xf32>
    %349 = arith.subf %347, %348 : vector<8x32xf32>
    %350 = vector.extract_strided_slice %342 {offsets = [0, 96], sizes = [8, 32], strides = [1, 1]} : vector<8x128xf32> to vector<8x32xf32>
    %351 = arith.mulf %344, %281 : vector<8x32xf32>
    %352 = arith.mulf %343, %349 : vector<8x32xf32>
    %353 = arith.addf %351, %352 : vector<8x32xf32>
    %354 = math.tanh %353 : vector<8x32xf32>
    %355 = arith.mulf %350, %354 : vector<8x32xf32>
    %356 = arith.truncf %309 : vector<8x32xf32> to vector<8x32xbf16>
    %cst_60 = arith.constant dense<0.000000e+00> : vector<8x256xf32>
    %357 = tpu.matmul %356, %1, %cst_60 {dimension_numbers = #tpu.dot_dimension_numbers<[1], [0], [0], [1], [0, 0, 1, 1], [], []>} : vector<8x32xbf16>, vector<32x256xbf16>, vector<8x256xf32> -> vector<8x256xf32>
    %358 = arith.truncf %332 : vector<8x32xf32> to vector<8x32xbf16>
    %cst_61 = arith.constant dense<0.000000e+00> : vector<8x256xf32>
    %359 = tpu.matmul %358, %3, %cst_61 {dimension_numbers = #tpu.dot_dimension_numbers<[1], [0], [0], [1], [0, 0, 1, 1], [], []>} : vector<8x32xbf16>, vector<32x256xbf16>, vector<8x256xf32> -> vector<8x256xf32>
    %360 = arith.truncf %355 : vector<8x32xf32> to vector<8x32xbf16>
    %cst_62 = arith.constant dense<0.000000e+00> : vector<8x256xf32>
    %361 = tpu.matmul %360, %5, %cst_62 {dimension_numbers = #tpu.dot_dimension_numbers<[1], [0], [0], [1], [0, 0, 1, 1], [], []>} : vector<8x32xbf16>, vector<32x256xbf16>, vector<8x256xf32> -> vector<8x256xf32>
    %362 = vector.extract_strided_slice %357 {offsets = [0, 0], sizes = [8, 128], strides = [1, 1]} : vector<8x256xf32> to vector<8x128xf32>
    %363 = arith.addf %57, %362 : vector<8x128xf32>
    %364 = arith.negf %363 : vector<8x128xf32>
    %365 = math.exp %364 : vector<8x128xf32>
    %cst_63 = arith.constant 1.000000e+00 : f32
    %366 = vector.broadcast %cst_63 : f32 to vector<8x128xf32>
    %367 = arith.addf %366, %365 : vector<8x128xf32>
    %368 = arith.divf %366, %367 : vector<8x128xf32>
    %369 = vector.extract_strided_slice %368 {offsets = [0, 0], sizes = [8, 32], strides = [1, 1]} : vector<8x128xf32> to vector<8x32xf32>
    %370 = vector.extract_strided_slice %368 {offsets = [0, 32], sizes = [8, 32], strides = [1, 1]} : vector<8x128xf32> to vector<8x32xf32>
    %371 = vector.extract_strided_slice %368 {offsets = [0, 64], sizes = [8, 32], strides = [1, 1]} : vector<8x128xf32> to vector<8x32xf32>
    %cst_64 = arith.constant 2.000000e+00 : f32
    %372 = vector.broadcast %cst_64 : f32 to vector<8x32xf32>
    %373 = arith.mulf %372, %371 : vector<8x32xf32>
    %cst_65 = arith.constant 1.000000e+00 : f32
    %374 = vector.broadcast %cst_65 : f32 to vector<8x32xf32>
    %375 = arith.subf %373, %374 : vector<8x32xf32>
    %376 = vector.extract_strided_slice %368 {offsets = [0, 96], sizes = [8, 32], strides = [1, 1]} : vector<8x128xf32> to vector<8x32xf32>
    %377 = arith.mulf %370, %307 : vector<8x32xf32>
    %378 = arith.mulf %369, %375 : vector<8x32xf32>
    %379 = arith.addf %377, %378 : vector<8x32xf32>
    %380 = math.tanh %379 : vector<8x32xf32>
    %381 = arith.mulf %376, %380 : vector<8x32xf32>
    %382 = vector.extract_strided_slice %357 {offsets = [0, 128], sizes = [8, 128], strides = [1, 1]} : vector<8x256xf32> to vector<8x128xf32>
    %383 = vector.extract_strided_slice %359 {offsets = [0, 0], sizes = [8, 128], strides = [1, 1]} : vector<8x256xf32> to vector<8x128xf32>
    %384 = arith.addf %382, %383 : vector<8x128xf32>
    %385 = vector.broadcast %9 : vector<1x128xf32> to vector<8x128xf32>
    %386 = arith.addf %384, %385 : vector<8x128xf32>
    %387 = arith.negf %386 : vector<8x128xf32>
    %388 = math.exp %387 : vector<8x128xf32>
    %cst_66 = arith.constant 1.000000e+00 : f32
    %389 = vector.broadcast %cst_66 : f32 to vector<8x128xf32>
    %390 = arith.addf %389, %388 : vector<8x128xf32>
    %391 = arith.divf %389, %390 : vector<8x128xf32>
    %392 = vector.extract_strided_slice %391 {offsets = [0, 0], sizes = [8, 32], strides = [1, 1]} : vector<8x128xf32> to vector<8x32xf32>
    %393 = vector.extract_strided_slice %391 {offsets = [0, 32], sizes = [8, 32], strides = [1, 1]} : vector<8x128xf32> to vector<8x32xf32>
    %394 = vector.extract_strided_slice %391 {offsets = [0, 64], sizes = [8, 32], strides = [1, 1]} : vector<8x128xf32> to vector<8x32xf32>
    %cst_67 = arith.constant 2.000000e+00 : f32
    %395 = vector.broadcast %cst_67 : f32 to vector<8x32xf32>
    %396 = arith.mulf %395, %394 : vector<8x32xf32>
    %cst_68 = arith.constant 1.000000e+00 : f32
    %397 = vector.broadcast %cst_68 : f32 to vector<8x32xf32>
    %398 = arith.subf %396, %397 : vector<8x32xf32>
    %399 = vector.extract_strided_slice %391 {offsets = [0, 96], sizes = [8, 32], strides = [1, 1]} : vector<8x128xf32> to vector<8x32xf32>
    %400 = arith.mulf %393, %330 : vector<8x32xf32>
    %401 = arith.mulf %392, %398 : vector<8x32xf32>
    %402 = arith.addf %400, %401 : vector<8x32xf32>
    %403 = math.tanh %402 : vector<8x32xf32>
    %404 = arith.mulf %399, %403 : vector<8x32xf32>
    %405 = vector.extract_strided_slice %359 {offsets = [0, 128], sizes = [8, 128], strides = [1, 1]} : vector<8x256xf32> to vector<8x128xf32>
    %406 = vector.extract_strided_slice %361 {offsets = [0, 0], sizes = [8, 128], strides = [1, 1]} : vector<8x256xf32> to vector<8x128xf32>
    %407 = arith.addf %405, %406 : vector<8x128xf32>
    %408 = vector.broadcast %10 : vector<1x128xf32> to vector<8x128xf32>
    %409 = arith.addf %407, %408 : vector<8x128xf32>
    %410 = arith.negf %409 : vector<8x128xf32>
    %411 = math.exp %410 : vector<8x128xf32>
    %cst_69 = arith.constant 1.000000e+00 : f32
    %412 = vector.broadcast %cst_69 : f32 to vector<8x128xf32>
    %413 = arith.addf %412, %411 : vector<8x128xf32>
    %414 = arith.divf %412, %413 : vector<8x128xf32>
    %415 = vector.extract_strided_slice %414 {offsets = [0, 0], sizes = [8, 32], strides = [1, 1]} : vector<8x128xf32> to vector<8x32xf32>
    %416 = vector.extract_strided_slice %414 {offsets = [0, 32], sizes = [8, 32], strides = [1, 1]} : vector<8x128xf32> to vector<8x32xf32>
    %417 = vector.extract_strided_slice %414 {offsets = [0, 64], sizes = [8, 32], strides = [1, 1]} : vector<8x128xf32> to vector<8x32xf32>
    %cst_70 = arith.constant 2.000000e+00 : f32
    %418 = vector.broadcast %cst_70 : f32 to vector<8x32xf32>
    %419 = arith.mulf %418, %417 : vector<8x32xf32>
    %cst_71 = arith.constant 1.000000e+00 : f32
    %420 = vector.broadcast %cst_71 : f32 to vector<8x32xf32>
    %421 = arith.subf %419, %420 : vector<8x32xf32>
    %422 = vector.extract_strided_slice %414 {offsets = [0, 96], sizes = [8, 32], strides = [1, 1]} : vector<8x128xf32> to vector<8x32xf32>
    %423 = arith.mulf %416, %353 : vector<8x32xf32>
    %424 = arith.mulf %415, %421 : vector<8x32xf32>
    %425 = arith.addf %423, %424 : vector<8x32xf32>
    %426 = math.tanh %425 : vector<8x32xf32>
    %427 = arith.mulf %422, %426 : vector<8x32xf32>
    %428 = arith.truncf %381 : vector<8x32xf32> to vector<8x32xbf16>
    %cst_72 = arith.constant dense<0.000000e+00> : vector<8x256xf32>
    %429 = tpu.matmul %428, %1, %cst_72 {dimension_numbers = #tpu.dot_dimension_numbers<[1], [0], [0], [1], [0, 0, 1, 1], [], []>} : vector<8x32xbf16>, vector<32x256xbf16>, vector<8x256xf32> -> vector<8x256xf32>
    %430 = arith.truncf %404 : vector<8x32xf32> to vector<8x32xbf16>
    %cst_73 = arith.constant dense<0.000000e+00> : vector<8x256xf32>
    %431 = tpu.matmul %430, %3, %cst_73 {dimension_numbers = #tpu.dot_dimension_numbers<[1], [0], [0], [1], [0, 0, 1, 1], [], []>} : vector<8x32xbf16>, vector<32x256xbf16>, vector<8x256xf32> -> vector<8x256xf32>
    %432 = arith.truncf %427 : vector<8x32xf32> to vector<8x32xbf16>
    %cst_74 = arith.constant dense<0.000000e+00> : vector<8x256xf32>
    %433 = tpu.matmul %432, %5, %cst_74 {dimension_numbers = #tpu.dot_dimension_numbers<[1], [0], [0], [1], [0, 0, 1, 1], [], []>} : vector<8x32xbf16>, vector<32x256xbf16>, vector<8x256xf32> -> vector<8x256xf32>
    %434 = vector.extract_strided_slice %429 {offsets = [0, 0], sizes = [8, 128], strides = [1, 1]} : vector<8x256xf32> to vector<8x128xf32>
    %435 = arith.addf %63, %434 : vector<8x128xf32>
    %436 = arith.negf %435 : vector<8x128xf32>
    %437 = math.exp %436 : vector<8x128xf32>
    %cst_75 = arith.constant 1.000000e+00 : f32
    %438 = vector.broadcast %cst_75 : f32 to vector<8x128xf32>
    %439 = arith.addf %438, %437 : vector<8x128xf32>
    %440 = arith.divf %438, %439 : vector<8x128xf32>
    %441 = vector.extract_strided_slice %440 {offsets = [0, 0], sizes = [8, 32], strides = [1, 1]} : vector<8x128xf32> to vector<8x32xf32>
    %442 = vector.extract_strided_slice %440 {offsets = [0, 32], sizes = [8, 32], strides = [1, 1]} : vector<8x128xf32> to vector<8x32xf32>
    %443 = vector.extract_strided_slice %440 {offsets = [0, 64], sizes = [8, 32], strides = [1, 1]} : vector<8x128xf32> to vector<8x32xf32>
    %cst_76 = arith.constant 2.000000e+00 : f32
    %444 = vector.broadcast %cst_76 : f32 to vector<8x32xf32>
    %445 = arith.mulf %444, %443 : vector<8x32xf32>
    %cst_77 = arith.constant 1.000000e+00 : f32
    %446 = vector.broadcast %cst_77 : f32 to vector<8x32xf32>
    %447 = arith.subf %445, %446 : vector<8x32xf32>
    %448 = vector.extract_strided_slice %440 {offsets = [0, 96], sizes = [8, 32], strides = [1, 1]} : vector<8x128xf32> to vector<8x32xf32>
    %449 = arith.mulf %442, %379 : vector<8x32xf32>
    %450 = arith.mulf %441, %447 : vector<8x32xf32>
    %451 = arith.addf %449, %450 : vector<8x32xf32>
    %452 = math.tanh %451 : vector<8x32xf32>
    %453 = arith.mulf %448, %452 : vector<8x32xf32>
    %454 = vector.extract_strided_slice %429 {offsets = [0, 128], sizes = [8, 128], strides = [1, 1]} : vector<8x256xf32> to vector<8x128xf32>
    %455 = vector.extract_strided_slice %431 {offsets = [0, 0], sizes = [8, 128], strides = [1, 1]} : vector<8x256xf32> to vector<8x128xf32>
    %456 = arith.addf %454, %455 : vector<8x128xf32>
    %457 = vector.broadcast %9 : vector<1x128xf32> to vector<8x128xf32>
    %458 = arith.addf %456, %457 : vector<8x128xf32>
    %459 = arith.negf %458 : vector<8x128xf32>
    %460 = math.exp %459 : vector<8x128xf32>
    %cst_78 = arith.constant 1.000000e+00 : f32
    %461 = vector.broadcast %cst_78 : f32 to vector<8x128xf32>
    %462 = arith.addf %461, %460 : vector<8x128xf32>
    %463 = arith.divf %461, %462 : vector<8x128xf32>
    %464 = vector.extract_strided_slice %463 {offsets = [0, 0], sizes = [8, 32], strides = [1, 1]} : vector<8x128xf32> to vector<8x32xf32>
    %465 = vector.extract_strided_slice %463 {offsets = [0, 32], sizes = [8, 32], strides = [1, 1]} : vector<8x128xf32> to vector<8x32xf32>
    %466 = vector.extract_strided_slice %463 {offsets = [0, 64], sizes = [8, 32], strides = [1, 1]} : vector<8x128xf32> to vector<8x32xf32>
    %cst_79 = arith.constant 2.000000e+00 : f32
    %467 = vector.broadcast %cst_79 : f32 to vector<8x32xf32>
    %468 = arith.mulf %467, %466 : vector<8x32xf32>
    %cst_80 = arith.constant 1.000000e+00 : f32
    %469 = vector.broadcast %cst_80 : f32 to vector<8x32xf32>
    %470 = arith.subf %468, %469 : vector<8x32xf32>
    %471 = vector.extract_strided_slice %463 {offsets = [0, 96], sizes = [8, 32], strides = [1, 1]} : vector<8x128xf32> to vector<8x32xf32>
    %472 = arith.mulf %465, %402 : vector<8x32xf32>
    %473 = arith.mulf %464, %470 : vector<8x32xf32>
    %474 = arith.addf %472, %473 : vector<8x32xf32>
    %475 = math.tanh %474 : vector<8x32xf32>
    %476 = arith.mulf %471, %475 : vector<8x32xf32>
    %477 = vector.extract_strided_slice %431 {offsets = [0, 128], sizes = [8, 128], strides = [1, 1]} : vector<8x256xf32> to vector<8x128xf32>
    %478 = vector.extract_strided_slice %433 {offsets = [0, 0], sizes = [8, 128], strides = [1, 1]} : vector<8x256xf32> to vector<8x128xf32>
    %479 = arith.addf %477, %478 : vector<8x128xf32>
    %480 = vector.broadcast %10 : vector<1x128xf32> to vector<8x128xf32>
    %481 = arith.addf %479, %480 : vector<8x128xf32>
    %482 = arith.negf %481 : vector<8x128xf32>
    %483 = math.exp %482 : vector<8x128xf32>
    %cst_81 = arith.constant 1.000000e+00 : f32
    %484 = vector.broadcast %cst_81 : f32 to vector<8x128xf32>
    %485 = arith.addf %484, %483 : vector<8x128xf32>
    %486 = arith.divf %484, %485 : vector<8x128xf32>
    %487 = vector.extract_strided_slice %486 {offsets = [0, 0], sizes = [8, 32], strides = [1, 1]} : vector<8x128xf32> to vector<8x32xf32>
    %488 = vector.extract_strided_slice %486 {offsets = [0, 32], sizes = [8, 32], strides = [1, 1]} : vector<8x128xf32> to vector<8x32xf32>
    %489 = vector.extract_strided_slice %486 {offsets = [0, 64], sizes = [8, 32], strides = [1, 1]} : vector<8x128xf32> to vector<8x32xf32>
    %cst_82 = arith.constant 2.000000e+00 : f32
    %490 = vector.broadcast %cst_82 : f32 to vector<8x32xf32>
    %491 = arith.mulf %490, %489 : vector<8x32xf32>
    %cst_83 = arith.constant 1.000000e+00 : f32
    %492 = vector.broadcast %cst_83 : f32 to vector<8x32xf32>
    %493 = arith.subf %491, %492 : vector<8x32xf32>
    %494 = vector.extract_strided_slice %486 {offsets = [0, 96], sizes = [8, 32], strides = [1, 1]} : vector<8x128xf32> to vector<8x32xf32>
    %495 = arith.mulf %488, %425 : vector<8x32xf32>
    %496 = arith.mulf %487, %493 : vector<8x32xf32>
    %497 = arith.addf %495, %496 : vector<8x32xf32>
    %498 = math.tanh %497 : vector<8x32xf32>
    %499 = arith.mulf %494, %498 : vector<8x32xf32>
    %500 = arith.truncf %453 : vector<8x32xf32> to vector<8x32xbf16>
    %cst_84 = arith.constant dense<0.000000e+00> : vector<8x256xf32>
    %501 = tpu.matmul %500, %1, %cst_84 {dimension_numbers = #tpu.dot_dimension_numbers<[1], [0], [0], [1], [0, 0, 1, 1], [], []>} : vector<8x32xbf16>, vector<32x256xbf16>, vector<8x256xf32> -> vector<8x256xf32>
    %502 = arith.truncf %476 : vector<8x32xf32> to vector<8x32xbf16>
    %cst_85 = arith.constant dense<0.000000e+00> : vector<8x256xf32>
    %503 = tpu.matmul %502, %3, %cst_85 {dimension_numbers = #tpu.dot_dimension_numbers<[1], [0], [0], [1], [0, 0, 1, 1], [], []>} : vector<8x32xbf16>, vector<32x256xbf16>, vector<8x256xf32> -> vector<8x256xf32>
    %504 = arith.truncf %499 : vector<8x32xf32> to vector<8x32xbf16>
    %cst_86 = arith.constant dense<0.000000e+00> : vector<8x256xf32>
    %505 = tpu.matmul %504, %5, %cst_86 {dimension_numbers = #tpu.dot_dimension_numbers<[1], [0], [0], [1], [0, 0, 1, 1], [], []>} : vector<8x32xbf16>, vector<32x256xbf16>, vector<8x256xf32> -> vector<8x256xf32>
    %506 = vector.extract_strided_slice %501 {offsets = [0, 0], sizes = [8, 128], strides = [1, 1]} : vector<8x256xf32> to vector<8x128xf32>
    %507 = arith.addf %69, %506 : vector<8x128xf32>
    %508 = arith.negf %507 : vector<8x128xf32>
    %509 = math.exp %508 : vector<8x128xf32>
    %cst_87 = arith.constant 1.000000e+00 : f32
    %510 = vector.broadcast %cst_87 : f32 to vector<8x128xf32>
    %511 = arith.addf %510, %509 : vector<8x128xf32>
    %512 = arith.divf %510, %511 : vector<8x128xf32>
    %513 = vector.extract_strided_slice %512 {offsets = [0, 0], sizes = [8, 32], strides = [1, 1]} : vector<8x128xf32> to vector<8x32xf32>
    %514 = vector.extract_strided_slice %512 {offsets = [0, 32], sizes = [8, 32], strides = [1, 1]} : vector<8x128xf32> to vector<8x32xf32>
    %515 = vector.extract_strided_slice %512 {offsets = [0, 64], sizes = [8, 32], strides = [1, 1]} : vector<8x128xf32> to vector<8x32xf32>
    %cst_88 = arith.constant 2.000000e+00 : f32
    %516 = vector.broadcast %cst_88 : f32 to vector<8x32xf32>
    %517 = arith.mulf %516, %515 : vector<8x32xf32>
    %cst_89 = arith.constant 1.000000e+00 : f32
    %518 = vector.broadcast %cst_89 : f32 to vector<8x32xf32>
    %519 = arith.subf %517, %518 : vector<8x32xf32>
    %520 = vector.extract_strided_slice %512 {offsets = [0, 96], sizes = [8, 32], strides = [1, 1]} : vector<8x128xf32> to vector<8x32xf32>
    %521 = arith.mulf %514, %451 : vector<8x32xf32>
    %522 = arith.mulf %513, %519 : vector<8x32xf32>
    %523 = arith.addf %521, %522 : vector<8x32xf32>
    %524 = math.tanh %523 : vector<8x32xf32>
    %525 = arith.mulf %520, %524 : vector<8x32xf32>
    %526 = vector.extract_strided_slice %501 {offsets = [0, 128], sizes = [8, 128], strides = [1, 1]} : vector<8x256xf32> to vector<8x128xf32>
    %527 = vector.extract_strided_slice %503 {offsets = [0, 0], sizes = [8, 128], strides = [1, 1]} : vector<8x256xf32> to vector<8x128xf32>
    %528 = arith.addf %526, %527 : vector<8x128xf32>
    %529 = vector.broadcast %9 : vector<1x128xf32> to vector<8x128xf32>
    %530 = arith.addf %528, %529 : vector<8x128xf32>
    %531 = arith.negf %530 : vector<8x128xf32>
    %532 = math.exp %531 : vector<8x128xf32>
    %cst_90 = arith.constant 1.000000e+00 : f32
    %533 = vector.broadcast %cst_90 : f32 to vector<8x128xf32>
    %534 = arith.addf %533, %532 : vector<8x128xf32>
    %535 = arith.divf %533, %534 : vector<8x128xf32>
    %536 = vector.extract_strided_slice %535 {offsets = [0, 0], sizes = [8, 32], strides = [1, 1]} : vector<8x128xf32> to vector<8x32xf32>
    %537 = vector.extract_strided_slice %535 {offsets = [0, 32], sizes = [8, 32], strides = [1, 1]} : vector<8x128xf32> to vector<8x32xf32>
    %538 = vector.extract_strided_slice %535 {offsets = [0, 64], sizes = [8, 32], strides = [1, 1]} : vector<8x128xf32> to vector<8x32xf32>
    %cst_91 = arith.constant 2.000000e+00 : f32
    %539 = vector.broadcast %cst_91 : f32 to vector<8x32xf32>
    %540 = arith.mulf %539, %538 : vector<8x32xf32>
    %cst_92 = arith.constant 1.000000e+00 : f32
    %541 = vector.broadcast %cst_92 : f32 to vector<8x32xf32>
    %542 = arith.subf %540, %541 : vector<8x32xf32>
    %543 = vector.extract_strided_slice %535 {offsets = [0, 96], sizes = [8, 32], strides = [1, 1]} : vector<8x128xf32> to vector<8x32xf32>
    %544 = arith.mulf %537, %474 : vector<8x32xf32>
    %545 = arith.mulf %536, %542 : vector<8x32xf32>
    %546 = arith.addf %544, %545 : vector<8x32xf32>
    %547 = math.tanh %546 : vector<8x32xf32>
    %548 = arith.mulf %543, %547 : vector<8x32xf32>
    %549 = vector.extract_strided_slice %503 {offsets = [0, 128], sizes = [8, 128], strides = [1, 1]} : vector<8x256xf32> to vector<8x128xf32>
    %550 = vector.extract_strided_slice %505 {offsets = [0, 0], sizes = [8, 128], strides = [1, 1]} : vector<8x256xf32> to vector<8x128xf32>
    %551 = arith.addf %549, %550 : vector<8x128xf32>
    %552 = vector.broadcast %10 : vector<1x128xf32> to vector<8x128xf32>
    %553 = arith.addf %551, %552 : vector<8x128xf32>
    %554 = arith.negf %553 : vector<8x128xf32>
    %555 = math.exp %554 : vector<8x128xf32>
    %cst_93 = arith.constant 1.000000e+00 : f32
    %556 = vector.broadcast %cst_93 : f32 to vector<8x128xf32>
    %557 = arith.addf %556, %555 : vector<8x128xf32>
    %558 = arith.divf %556, %557 : vector<8x128xf32>
    %559 = vector.extract_strided_slice %558 {offsets = [0, 0], sizes = [8, 32], strides = [1, 1]} : vector<8x128xf32> to vector<8x32xf32>
    %560 = vector.extract_strided_slice %558 {offsets = [0, 32], sizes = [8, 32], strides = [1, 1]} : vector<8x128xf32> to vector<8x32xf32>
    %561 = vector.extract_strided_slice %558 {offsets = [0, 64], sizes = [8, 32], strides = [1, 1]} : vector<8x128xf32> to vector<8x32xf32>
    %cst_94 = arith.constant 2.000000e+00 : f32
    %562 = vector.broadcast %cst_94 : f32 to vector<8x32xf32>
    %563 = arith.mulf %562, %561 : vector<8x32xf32>
    %cst_95 = arith.constant 1.000000e+00 : f32
    %564 = vector.broadcast %cst_95 : f32 to vector<8x32xf32>
    %565 = arith.subf %563, %564 : vector<8x32xf32>
    %566 = vector.extract_strided_slice %558 {offsets = [0, 96], sizes = [8, 32], strides = [1, 1]} : vector<8x128xf32> to vector<8x32xf32>
    %567 = arith.mulf %560, %497 : vector<8x32xf32>
    %568 = arith.mulf %559, %565 : vector<8x32xf32>
    %569 = arith.addf %567, %568 : vector<8x32xf32>
    %570 = math.tanh %569 : vector<8x32xf32>
    %571 = arith.mulf %566, %570 : vector<8x32xf32>
    %572 = arith.truncf %525 : vector<8x32xf32> to vector<8x32xbf16>
    %cst_96 = arith.constant dense<0.000000e+00> : vector<8x256xf32>
    %573 = tpu.matmul %572, %1, %cst_96 {dimension_numbers = #tpu.dot_dimension_numbers<[1], [0], [0], [1], [0, 0, 1, 1], [], []>} : vector<8x32xbf16>, vector<32x256xbf16>, vector<8x256xf32> -> vector<8x256xf32>
    %574 = arith.truncf %548 : vector<8x32xf32> to vector<8x32xbf16>
    %cst_97 = arith.constant dense<0.000000e+00> : vector<8x256xf32>
    %575 = tpu.matmul %574, %3, %cst_97 {dimension_numbers = #tpu.dot_dimension_numbers<[1], [0], [0], [1], [0, 0, 1, 1], [], []>} : vector<8x32xbf16>, vector<32x256xbf16>, vector<8x256xf32> -> vector<8x256xf32>
    %576 = arith.truncf %571 : vector<8x32xf32> to vector<8x32xbf16>
    %cst_98 = arith.constant dense<0.000000e+00> : vector<8x256xf32>
    %577 = tpu.matmul %576, %5, %cst_98 {dimension_numbers = #tpu.dot_dimension_numbers<[1], [0], [0], [1], [0, 0, 1, 1], [], []>} : vector<8x32xbf16>, vector<32x256xbf16>, vector<8x256xf32> -> vector<8x256xf32>
    %578 = vector.extract_strided_slice %573 {offsets = [0, 128], sizes = [8, 128], strides = [1, 1]} : vector<8x256xf32> to vector<8x128xf32>
    %579 = vector.extract_strided_slice %575 {offsets = [0, 0], sizes = [8, 128], strides = [1, 1]} : vector<8x256xf32> to vector<8x128xf32>
    %580 = arith.addf %578, %579 : vector<8x128xf32>
    %581 = vector.broadcast %9 : vector<1x128xf32> to vector<8x128xf32>
    %582 = arith.addf %580, %581 : vector<8x128xf32>
    %583 = arith.negf %582 : vector<8x128xf32>
    %584 = math.exp %583 : vector<8x128xf32>
    %cst_99 = arith.constant 1.000000e+00 : f32
    %585 = vector.broadcast %cst_99 : f32 to vector<8x128xf32>
    %586 = arith.addf %585, %584 : vector<8x128xf32>
    %587 = arith.divf %585, %586 : vector<8x128xf32>
    %588 = vector.extract_strided_slice %587 {offsets = [0, 0], sizes = [8, 32], strides = [1, 1]} : vector<8x128xf32> to vector<8x32xf32>
    %589 = vector.extract_strided_slice %587 {offsets = [0, 32], sizes = [8, 32], strides = [1, 1]} : vector<8x128xf32> to vector<8x32xf32>
    %590 = vector.extract_strided_slice %587 {offsets = [0, 64], sizes = [8, 32], strides = [1, 1]} : vector<8x128xf32> to vector<8x32xf32>
    %cst_100 = arith.constant 2.000000e+00 : f32
    %591 = vector.broadcast %cst_100 : f32 to vector<8x32xf32>
    %592 = arith.mulf %591, %590 : vector<8x32xf32>
    %cst_101 = arith.constant 1.000000e+00 : f32
    %593 = vector.broadcast %cst_101 : f32 to vector<8x32xf32>
    %594 = arith.subf %592, %593 : vector<8x32xf32>
    %595 = vector.extract_strided_slice %587 {offsets = [0, 96], sizes = [8, 32], strides = [1, 1]} : vector<8x128xf32> to vector<8x32xf32>
    %596 = arith.mulf %589, %546 : vector<8x32xf32>
    %597 = arith.mulf %588, %594 : vector<8x32xf32>
    %598 = arith.addf %596, %597 : vector<8x32xf32>
    %599 = math.tanh %598 : vector<8x32xf32>
    %600 = arith.mulf %595, %599 : vector<8x32xf32>
    %601 = vector.extract_strided_slice %575 {offsets = [0, 128], sizes = [8, 128], strides = [1, 1]} : vector<8x256xf32> to vector<8x128xf32>
    %602 = vector.extract_strided_slice %577 {offsets = [0, 0], sizes = [8, 128], strides = [1, 1]} : vector<8x256xf32> to vector<8x128xf32>
    %603 = arith.addf %601, %602 : vector<8x128xf32>
    %604 = vector.broadcast %10 : vector<1x128xf32> to vector<8x128xf32>
    %605 = arith.addf %603, %604 : vector<8x128xf32>
    %606 = arith.negf %605 : vector<8x128xf32>
    %607 = math.exp %606 : vector<8x128xf32>
    %cst_102 = arith.constant 1.000000e+00 : f32
    %608 = vector.broadcast %cst_102 : f32 to vector<8x128xf32>
    %609 = arith.addf %608, %607 : vector<8x128xf32>
    %610 = arith.divf %608, %609 : vector<8x128xf32>
    %611 = vector.extract_strided_slice %610 {offsets = [0, 0], sizes = [8, 32], strides = [1, 1]} : vector<8x128xf32> to vector<8x32xf32>
    %612 = vector.extract_strided_slice %610 {offsets = [0, 32], sizes = [8, 32], strides = [1, 1]} : vector<8x128xf32> to vector<8x32xf32>
    %613 = vector.extract_strided_slice %610 {offsets = [0, 64], sizes = [8, 32], strides = [1, 1]} : vector<8x128xf32> to vector<8x32xf32>
    %cst_103 = arith.constant 2.000000e+00 : f32
    %614 = vector.broadcast %cst_103 : f32 to vector<8x32xf32>
    %615 = arith.mulf %614, %613 : vector<8x32xf32>
    %cst_104 = arith.constant 1.000000e+00 : f32
    %616 = vector.broadcast %cst_104 : f32 to vector<8x32xf32>
    %617 = arith.subf %615, %616 : vector<8x32xf32>
    %618 = vector.extract_strided_slice %610 {offsets = [0, 96], sizes = [8, 32], strides = [1, 1]} : vector<8x128xf32> to vector<8x32xf32>
    %619 = arith.mulf %612, %569 : vector<8x32xf32>
    %620 = arith.mulf %611, %617 : vector<8x32xf32>
    %621 = arith.addf %619, %620 : vector<8x32xf32>
    %622 = math.tanh %621 : vector<8x32xf32>
    %623 = arith.mulf %618, %622 : vector<8x32xf32>
    %624 = arith.truncf %600 : vector<8x32xf32> to vector<8x32xbf16>
    %cst_105 = arith.constant dense<0.000000e+00> : vector<8x256xf32>
    %625 = tpu.matmul %624, %3, %cst_105 {dimension_numbers = #tpu.dot_dimension_numbers<[1], [0], [0], [1], [0, 0, 1, 1], [], []>} : vector<8x32xbf16>, vector<32x256xbf16>, vector<8x256xf32> -> vector<8x256xf32>
    %626 = arith.truncf %623 : vector<8x32xf32> to vector<8x32xbf16>
    %cst_106 = arith.constant dense<0.000000e+00> : vector<8x256xf32>
    %627 = tpu.matmul %626, %5, %cst_106 {dimension_numbers = #tpu.dot_dimension_numbers<[1], [0], [0], [1], [0, 0, 1, 1], [], []>} : vector<8x32xbf16>, vector<32x256xbf16>, vector<8x256xf32> -> vector<8x256xf32>
    %628 = vector.extract_strided_slice %625 {offsets = [0, 128], sizes = [8, 128], strides = [1, 1]} : vector<8x256xf32> to vector<8x128xf32>
    %629 = vector.extract_strided_slice %627 {offsets = [0, 0], sizes = [8, 128], strides = [1, 1]} : vector<8x256xf32> to vector<8x128xf32>
    %630 = arith.addf %628, %629 : vector<8x128xf32>
    %631 = vector.broadcast %10 : vector<1x128xf32> to vector<8x128xf32>
    %632 = arith.addf %630, %631 : vector<8x128xf32>
    %633 = arith.negf %632 : vector<8x128xf32>
    %634 = math.exp %633 : vector<8x128xf32>
    %cst_107 = arith.constant 1.000000e+00 : f32
    %635 = vector.broadcast %cst_107 : f32 to vector<8x128xf32>
    %636 = arith.addf %635, %634 : vector<8x128xf32>
    %637 = arith.divf %635, %636 : vector<8x128xf32>
    %638 = vector.extract_strided_slice %637 {offsets = [0, 0], sizes = [8, 32], strides = [1, 1]} : vector<8x128xf32> to vector<8x32xf32>
    %639 = vector.extract_strided_slice %637 {offsets = [0, 32], sizes = [8, 32], strides = [1, 1]} : vector<8x128xf32> to vector<8x32xf32>
    %640 = vector.extract_strided_slice %637 {offsets = [0, 64], sizes = [8, 32], strides = [1, 1]} : vector<8x128xf32> to vector<8x32xf32>
    %cst_108 = arith.constant 2.000000e+00 : f32
    %641 = vector.broadcast %cst_108 : f32 to vector<8x32xf32>
    %642 = arith.mulf %641, %640 : vector<8x32xf32>
    %cst_109 = arith.constant 1.000000e+00 : f32
    %643 = vector.broadcast %cst_109 : f32 to vector<8x32xf32>
    %644 = arith.subf %642, %643 : vector<8x32xf32>
    %645 = vector.extract_strided_slice %637 {offsets = [0, 96], sizes = [8, 32], strides = [1, 1]} : vector<8x128xf32> to vector<8x32xf32>
    %646 = arith.mulf %639, %621 : vector<8x32xf32>
    %647 = arith.mulf %638, %644 : vector<8x32xf32>
    %648 = arith.addf %646, %647 : vector<8x32xf32>
    %649 = math.tanh %648 : vector<8x32xf32>
    %650 = arith.mulf %645, %649 : vector<8x32xf32>
    %cst_110 = arith.constant dense<0.000000e+00> : vector<8xf32>
    %651 = vector.multi_reduction <add>, %650, %cst_110 [1] : vector<8x32xf32> to vector<8xf32>
    %652 = vector.shape_cast %651 : vector<8xf32> to vector<8x1xf32>
    %cst_111 = arith.constant 3.200000e+01 : f32
    %653 = vector.broadcast %cst_111 : f32 to vector<8x1xf32>
    %654 = arith.divf %652, %653 : vector<8x1xf32>
    %655 = vector.broadcast %654 : vector<8x1xf32> to vector<8x32xf32>
    %656 = arith.subf %650, %655 : vector<8x32xf32>
    %657 = arith.mulf %656, %656 : vector<8x32xf32>
    %cst_112 = arith.constant dense<0.000000e+00> : vector<8xf32>
    %658 = vector.multi_reduction <add>, %657, %cst_112 [1] : vector<8x32xf32> to vector<8xf32>
    %659 = vector.shape_cast %658 : vector<8xf32> to vector<8x1xf32>
    %cst_113 = arith.constant 3.200000e+01 : f32
    %660 = vector.broadcast %cst_113 : f32 to vector<8x1xf32>
    %661 = arith.divf %659, %660 : vector<8x1xf32>
    %662 = vector.broadcast %654 : vector<8x1xf32> to vector<8x32xf32>
    %663 = arith.subf %650, %662 : vector<8x32xf32>
    %cst_114 = arith.constant 9.99999974E-6 : f32
    %664 = vector.broadcast %cst_114 : f32 to vector<8x1xf32>
    %665 = arith.addf %661, %664 : vector<8x1xf32>
    %666 = math.rsqrt %665 : vector<8x1xf32>
    %667 = vector.broadcast %666 : vector<8x1xf32> to vector<8x32xf32>
    %668 = arith.mulf %663, %667 : vector<8x32xf32>
    %669 = vector.broadcast %11 : vector<1x32xf32> to vector<8x32xf32>
    %670 = arith.mulf %668, %669 : vector<8x32xf32>
    %671 = vector.broadcast %12 : vector<1x32xf32> to vector<8x32xf32>
    %672 = arith.addf %670, %671 : vector<8x32xf32>
    %c0_115 = arith.constant 0 : index
    %c0_116 = arith.constant 0 : index
    %673 = vector.load %arg4[%c0_115, %c0_116] : memref<320x128xbf16, #tpu.memory_space<vmem>>, vector<32x128xbf16>
    %c32 = arith.constant 32 : index
    %c0_117 = arith.constant 0 : index
    %674 = vector.load %arg4[%c32, %c0_117] : memref<320x128xbf16, #tpu.memory_space<vmem>>, vector<128x128xbf16>
    %c160 = arith.constant 160 : index
    %c0_118 = arith.constant 0 : index
    %675 = vector.load %arg4[%c160, %c0_118] : memref<320x128xbf16, #tpu.memory_space<vmem>>, vector<128x128xbf16>
    %c288 = arith.constant 288 : index
    %c0_119 = arith.constant 0 : index
    %676 = vector.load %arg4[%c288, %c0_119] : memref<320x128xbf16, #tpu.memory_space<vmem>>, vector<32x128xbf16>
    %677 = arith.truncf %672 : vector<8x32xf32> to vector<8x32xbf16>
    %cst_120 = arith.constant dense<0.000000e+00> : vector<8x128xf32>
    %678 = tpu.matmul %677, %673, %cst_120 {dimension_numbers = #tpu.dot_dimension_numbers<[1], [0], [0], [1], [0, 0, 1, 1], [], []>} : vector<8x32xbf16>, vector<32x128xbf16>, vector<8x128xf32> -> vector<8x128xf32>
    %679 = vector.broadcast %13 : vector<1x128xf32> to vector<8x128xf32>
    %680 = arith.addf %678, %679 : vector<8x128xf32>
    %cst_121 = arith.constant 0.000000e+00 : f32
    %681 = vector.broadcast %cst_121 : f32 to vector<8x128xf32>
    %682 = arith.maximumf %680, %681 : vector<8x128xf32>
    %683 = arith.truncf %682 : vector<8x128xf32> to vector<8x128xbf16>
    %cst_122 = arith.constant dense<0.000000e+00> : vector<8x128xf32>
    %684 = tpu.matmul %683, %674, %cst_122 {dimension_numbers = #tpu.dot_dimension_numbers<[1], [0], [0], [1], [0, 0, 1, 1], [], []>} : vector<8x128xbf16>, vector<128x128xbf16>, vector<8x128xf32> -> vector<8x128xf32>
    %685 = vector.broadcast %14 : vector<1x128xf32> to vector<8x128xf32>
    %686 = arith.addf %684, %685 : vector<8x128xf32>
    %cst_123 = arith.constant 0.000000e+00 : f32
    %687 = vector.broadcast %cst_123 : f32 to vector<8x128xf32>
    %688 = arith.maximumf %686, %687 : vector<8x128xf32>
    %689 = arith.truncf %688 : vector<8x128xf32> to vector<8x128xbf16>
    %cst_124 = arith.constant dense<0.000000e+00> : vector<8x128xf32>
    %690 = tpu.matmul %689, %675, %cst_124 {dimension_numbers = #tpu.dot_dimension_numbers<[1], [0], [0], [1], [0, 0, 1, 1], [], []>} : vector<8x128xbf16>, vector<128x128xbf16>, vector<8x128xf32> -> vector<8x128xf32>
    %691 = vector.broadcast %15 : vector<1x128xf32> to vector<8x128xf32>
    %692 = arith.addf %690, %691 : vector<8x128xf32>
    %693 = vector.extract_strided_slice %692 {offsets = [0, 0], sizes = [8, 32], strides = [1, 1]} : vector<8x128xf32> to vector<8x32xf32>
    %694 = math.exp %693 : vector<8x32xf32>
    %695 = vector.extract_strided_slice %692 {offsets = [0, 32], sizes = [8, 32], strides = [1, 1]} : vector<8x128xf32> to vector<8x32xf32>
    %cst_125 = arith.constant 9.99999997E-7 : f32
    %696 = vector.broadcast %cst_125 : f32 to vector<8x32xf32>
    %697 = arith.maximumf %695, %696 : vector<8x32xf32>
    %c0_126 = arith.constant 0 : index
    %c0_127 = arith.constant 0 : index
    %698 = vector.load %arg1[%c0_126, %c0_127] : memref<8x32xf32, #tpu.memory_space<vmem>>, vector<8x32xf32>
    %cst_128 = arith.constant 0.000000e+00 : f32
    %699 = vector.broadcast %cst_128 : f32 to vector<8x32xf32>
    %700 = arith.subf %699, %697 : vector<8x32xf32>
    %cst_129 = arith.constant 1.000000e+00 : f32
    %701 = vector.broadcast %cst_129 : f32 to vector<8x32xf32>
    %702 = arith.subf %701, %698 : vector<8x32xf32>
    %703 = math.log %702 : vector<8x32xf32>
    %704 = arith.mulf %700, %703 : vector<8x32xf32>
    %705 = arith.divf %694, %697 : vector<8x32xf32>
    %706 = math.absf %704 : vector<8x32xf32>
    %cst_130 = arith.constant 1.000000e-03 : f32
    %707 = vector.broadcast %cst_130 : f32 to vector<8x32xf32>
    %708 = arith.cmpf olt, %706, %707 : vector<8x32xf32>
    %cst_131 = arith.constant 5.000000e-01 : f32
    %709 = vector.broadcast %cst_131 : f32 to vector<8x32xf32>
    %710 = arith.mulf %709, %704 : vector<8x32xf32>
    %711 = arith.mulf %710, %704 : vector<8x32xf32>
    %712 = arith.addf %704, %711 : vector<8x32xf32>
    %713 = math.exp %704 : vector<8x32xf32>
    %cst_132 = arith.constant 1.000000e+00 : f32
    %714 = vector.broadcast %cst_132 : f32 to vector<8x32xf32>
    %715 = arith.subf %713, %714 : vector<8x32xf32>
    %716 = arith.select %708, %712, %715 : vector<8x32xi1>, vector<8x32xf32>
    %717 = arith.mulf %705, %716 : vector<8x32xf32>
    %718 = arith.truncf %717 : vector<8x32xf32> to vector<8x32xbf16>
    %cst_133 = arith.constant dense<0.000000e+00> : vector<8x128xf32>
    %719 = tpu.matmul %718, %676, %cst_133 {dimension_numbers = #tpu.dot_dimension_numbers<[1], [0], [0], [1], [0, 0, 1, 1], [], []>} : vector<8x32xbf16>, vector<32x128xbf16>, vector<8x128xf32> -> vector<8x128xf32>
    %720 = vector.broadcast %16 : vector<1x128xf32> to vector<8x128xf32>
    %721 = arith.addf %719, %720 : vector<8x128xf32>
    %cst_134 = arith.constant 0.000000e+00 : f32
    %722 = vector.broadcast %cst_134 : f32 to vector<8x128xf32>
    %723 = arith.maximumf %721, %722 : vector<8x128xf32>
    %c0_135 = arith.constant 0 : index
    %c0_136 = arith.constant 0 : index
    %724 = vector.load %arg5[%c0_135, %c0_136] : memref<128x512xbf16, #tpu.memory_space<vmem>>, vector<128x512xbf16>
    %725 = arith.truncf %723 : vector<8x128xf32> to vector<8x128xbf16>
    %cst_137 = arith.constant dense<0.000000e+00> : vector<8x512xf32>
    %726 = tpu.matmul %725, %724, %cst_137 {dimension_numbers = #tpu.dot_dimension_numbers<[1], [0], [0], [1], [0, 0, 1, 1], [], []>} : vector<8x128xbf16>, vector<128x512xbf16>, vector<8x512xf32> -> vector<8x512xf32>
    %727 = vector.broadcast %19 : vector<1x512xf32> to vector<8x512xf32>
    %728 = arith.addf %726, %727 : vector<8x512xf32>
    %cst_138 = arith.constant 0.000000e+00 : f32
    %729 = vector.broadcast %cst_138 : f32 to vector<8x512xf32>
    %730 = arith.maximumf %728, %729 : vector<8x512xf32>
    %731 = vector.broadcast %20 : vector<1x512xf32> to vector<8x512xf32>
    %732 = arith.mulf %730, %731 : vector<8x512xf32>
    %cst_139 = arith.constant dense<0.000000e+00> : vector<8xf32>
    %733 = vector.multi_reduction <add>, %732, %cst_139 [1] : vector<8x512xf32> to vector<8xf32>
    %734 = vector.shape_cast %733 : vector<8xf32> to vector<8x1xf32>
    %735 = vector.broadcast %17 : vector<1x1xf32> to vector<8x1xf32>
    %736 = arith.addf %734, %735 : vector<8x1xf32>
    %cst_140 = arith.constant 0.000000e+00 : f32
    %737 = vector.broadcast %cst_140 : f32 to vector<8x63xf32>
    %738 = tpu.concatenate %694, %697, %736, %737 in 1 : vector<8x32xf32>, vector<8x32xf32>, vector<8x1xf32>, vector<8x63xf32> -> vector<8x128xf32>
    %c0_141 = arith.constant 0 : index
    %c0_142 = arith.constant 0 : index
    %739 = vector.load %arg7[%c0_141, %c0_142] : memref<8x128xf32, #tpu.memory_space<vmem>>, vector<8x128xf32>
    tpu.vector_store %arg7[%c0_141, %c0_142], %738 {strides = array<i32>} : memref<8x128xf32, #tpu.memory_space<vmem>>, vector<8x128xf32>,
    return
  }
}

</mosaic_0001>

<bundles_post_ra>
// kernel: tpu_custom_call.1
= control target key start
LH: loop header
LB: loop body
LE: loop exit
PB: predicated region body
PF: predicated region fallthrough
CT: control target
= control target key end

     0   :  { %12 = vsyncpa [#allocation3], 0  ;;  %s4311_s0 = inlined_call_operand.hbm [shape: f32[8,8], index: 0, kind: input, shape index: {}]   ;;  %s4312_s1 = inlined_call_operand.hbm [shape: f32[8,32], index: 1, kind: input, shape index: {}]   ;;  %s4313_s2 = inlined_call_operand.hbm [shape: bf16[3,32,256], index: 2, kind: input, shape index: {}]   ;;  %s4314_s3 = inlined_call_operand.hbm [shape: f32[16,128], index: 3, kind: input, shape index: {}]   ;;  %s4315_s4 = inlined_call_operand.hbm [shape: bf16[320,128], index: 4, kind: input, shape index: {}]   ;;  %s4316_s5 = inlined_call_operand.hbm [shape: bf16[128,512], index: 5, kind: input, shape index: {}]   ;;  %s4317_s6 = inlined_call_operand.vmem [shape: f32[2,512], index: 6, kind: input, shape index: {}]   ;;  %s4318_s7 = inlined_call_operand.hbm [shape: f32[8,128], index: 7, kind: output, shape index: {}]  }
   0x1   :  { %13 = vsyncpa [#allocation6], 0 }
   0x2   :  { %14 = vsyncpa [#allocation9], 0 }
   0x3   :  { %15 = vsyncpa [#allocation12], 0 }
   0x4   :  { %16 = vsyncpa [#allocation4], 0  ;;  %s3596_s24 = smov [#allocation5]   ;;  %s3432_s28 = scalar_lea.hbm %s4312_s1, 128 }
   0x5   :  { %s33_s25 = sshll.u32 %s3596_s24, 4  ;;  %p3433_p0 = scmp.ne.s32.totalorder %s4312_s1, %s3432_s28  ;;  %s34_s25 = int_to_ptr.vmem [resolvable:$true] %s33_s25 }
   0x6   :  { %p3436_p1 = scmp.lt.u32.totalorder %s3432_s28, %s4312_s1 }
   0x8   :  { %p3438_p2 = pnand %p3436_p1, %p3433_p0 }
   0xa   :  { %3441 = shalt.err (!%p3438_p2)
}
   0xb   :  { %s3442_s10 = scalar_lea.vmem %s34_s25, 128  ;;  %p3447_p4 = scmp.lt.s32.totalorder %s34_s25, %s34_s25 }
   0xc   :  { %p3443_p3 = scmp.ne.s32.totalorder %s34_s25, %s3442_s10  ;;  %p3448_p5 = scmp.lt.s32.totalorder %s3442_s10, %s3442_s10 }
   0xe   :  { %p3449_p6 = por %p3448_p5, %p3447_p4 }
  0x10   :  { %p3450_p7 = pnand %p3449_p6, %p3443_p3 }
  0x12   :  { %3453 = shalt.err (!%p3450_p7)
}
  0x13   :  { %36 = dma.hbm_to_vmem [thread:$0]  %s4312_s1, 128, %s34_s25, [#allocation6]  }
  0x14   :  { %s3597_s13 = smov [#allocation8]   ;;  %s3598_s15 = smov [#allocation2]  }
  0x15   :  { %s54_s14 = sshll.u32 %s3597_s13, 4  ;;  %s23_s16 = sshll.u32 %s3598_s15, 4  ;;  %s55_s14 = int_to_ptr.vmem [resolvable:$true] %s54_s14  ;;  %s24_s16 = int_to_ptr.vmem [resolvable:$true] %s23_s16 }
  0x16   :  { %s3454_s19 = scalar_lea.hbm %s4314_s3, 256 }
  0x17   :  { %p3455_p8 = scmp.ne.s32.totalorder %s4314_s3, %s3454_s19  ;;  %p3458_p9 = scmp.lt.u32.totalorder %s3454_s19, %s4314_s3 }
  0x19   :  { %p3460_p10 = pnand %p3458_p9, %p3455_p8 }
  0x1b   :  { %3463 = shalt.err (!%p3460_p10)
}
  0x1c   :  { %s3464_s1 = scalar_lea.vmem %s55_s14, 256  ;;  %p3469_p12 = scmp.lt.s32.totalorder %s55_s14, %s55_s14 }
  0x1d   :  { %p3465_p11 = scmp.ne.s32.totalorder %s55_s14, %s3464_s1  ;;  %p3470_p13 = scmp.lt.s32.totalorder %s3464_s1, %s3464_s1 }
  0x1f   :  { %p3471_p0 = por %p3470_p13, %p3469_p12 }
  0x21   :  { %p3472_p1 = pnand %p3471_p0, %p3465_p11 }
  0x23   :  { %3475 = shalt.err (!%p3472_p1)
}
  0x24   :  { %s3599_s24 = smov 128   ;;  %s3600_s25 = smov 8  }
  0x25   :  { %60 = dma.hbm_to_vmem [thread:$0]  %s4314_s3, 256, %s55_s14, [#allocation9], %s3599_s24, %s3599_s24, %s3600_s25  }
  0x26   :  { %s3476_s30 = scalar_lea.hbm %s4311_s0, 128 }
  0x27   :  { %p3477_p2 = scmp.ne.s32.totalorder %s4311_s0, %s3476_s30  ;;  %p3480_p3 = scmp.lt.u32.totalorder %s3476_s30, %s4311_s0 }
  0x29   :  { %p3482_p4 = pnand %p3480_p3, %p3477_p2 }
  0x2b   :  { %3485 = shalt.err (!%p3482_p4)
}
  0x2c   :  { %s3486_s12 = scalar_lea.vmem %s24_s16, 128  ;;  %p3491_p6 = scmp.lt.s32.totalorder %s24_s16, %s24_s16 }
  0x2d   :  { %p3487_p5 = scmp.ne.s32.totalorder %s24_s16, %s3486_s12  ;;  %p3492_p7 = scmp.lt.s32.totalorder %s3486_s12, %s3486_s12 }
  0x2f   :  { %p3493_p8 = por %p3492_p7, %p3491_p6 }
  0x31   :  { %p3494_p9 = pnand %p3493_p8, %p3487_p5 }
  0x33   :  { %3497 = shalt.err (!%p3494_p9)
}
  0x34   :  { %26 = dma.hbm_to_vmem [thread:$0]  %s4311_s0, 128, %s24_s16, [#allocation3]  }
  0x35   :  { %s3601_s14 = smov [#allocation7]   ;;  %s3602_s17 = smov [#allocation10]  }
  0x36   :  { %s42_s15 = sshll.u32 %s3601_s14, 4  ;;  %s66_s18 = sshll.u32 %s3602_s17, 4  ;;  %s43_s15 = int_to_ptr.vmem [resolvable:$true] %s42_s15  ;;  %s67_s18 = int_to_ptr.vmem [resolvable:$true] %s66_s18 }
  0x37   :  { %s3498_s21 = scalar_lea.hbm %s4313_s2, 1536 }
  0x38   :  { %p3499_p10 = scmp.ne.s32.totalorder %s4313_s2, %s3498_s21  ;;  %p3502_p11 = scmp.lt.u32.totalorder %s3498_s21, %s4313_s2 }
  0x3a   :  { %p3504_p12 = pnand %p3502_p11, %p3499_p10 }
  0x3c   :  { %3507 = shalt.err (!%p3504_p12)
}
  0x3d   :  { %s3508_s0 = scalar_lea.vmem %s43_s15, 1536  ;;  %p3513_p0 = scmp.lt.s32.totalorder %s43_s15, %s43_s15 }
  0x3e   :  { %p3509_p13 = scmp.ne.s32.totalorder %s43_s15, %s3508_s0  ;;  %p3514_p1 = scmp.lt.s32.totalorder %s3508_s0, %s3508_s0 }
  0x40   :  { %p3515_p2 = por %p3514_p1, %p3513_p0 }
  0x42   :  { %p3516_p3 = pnand %p3515_p2, %p3509_p13 }
  0x44   :  { %3519 = shalt.err (!%p3516_p3)
}
  0x45   :  { %48 = dma.hbm_to_vmem [thread:$0]  %s4313_s2, 1536, %s43_s15, [#allocation6], %s3599_s24, %s3599_s24, %s3600_s25  }
  0x46   :  { %s3520_s30 = scalar_lea.hbm %s4315_s4, 2560 }
  0x47   :  { %p3521_p4 = scmp.ne.s32.totalorder %s4315_s4, %s3520_s30  ;;  %p3524_p5 = scmp.lt.u32.totalorder %s3520_s30, %s4315_s4 }
  0x49   :  { %p3526_p6 = pnand %p3524_p5, %p3521_p4 }
  0x4b   :  { %3529 = shalt.err (!%p3526_p6)
}
  0x4c   :  { %s3530_s12 = scalar_lea.vmem %s67_s18, 2560  ;;  %p3535_p8 = scmp.lt.s32.totalorder %s67_s18, %s67_s18 }
  0x4d   :  { %p3531_p7 = scmp.ne.s32.totalorder %s67_s18, %s3530_s12  ;;  %p3536_p9 = scmp.lt.s32.totalorder %s3530_s12, %s3530_s12 }
  0x4f   :  { %p3537_p10 = por %p3536_p9, %p3535_p8 }
  0x51   :  { %p3538_p11 = pnand %p3537_p10, %p3531_p7 }
  0x53   :  { %3541 = shalt.err (!%p3538_p11)
}
  0x54   :  { %s3603_s2 = smov 64   ;;  %s3604_s24 = smov 4  }
  0x55   :  { %72 = dma.hbm_to_vmem [thread:$0]  %s4315_s4, 2560, %s67_s18, [#allocation9], %s3603_s2, %s3603_s2, %s3604_s24  }
  0x56   :  { %s3605_s13 = smov [#allocation11]   ;;  %s3542_s19 = scalar_lea.hbm %s4316_s5, 4096 }
  0x57   :  { %s78_s14 = sshll.u32 %s3605_s13, 4  ;;  %p3543_p12 = scmp.ne.s32.totalorder %s4316_s5, %s3542_s19  ;;  %s79_s14 = int_to_ptr.vmem [resolvable:$true] %s78_s14 }
  0x58   :  { %p3546_p13 = scmp.lt.u32.totalorder %s3542_s19, %s4316_s5 }
  0x5a   :  { %p3548_p0 = pnand %p3546_p13, %p3543_p12 }
  0x5c   :  { %3551 = shalt.err (!%p3548_p0)
}
  0x5d   :  { %s3552_s1 = scalar_lea.vmem %s79_s14, 4096  ;;  %p3557_p2 = scmp.lt.s32.totalorder %s79_s14, %s79_s14 }
  0x5e   :  { %p3553_p1 = scmp.ne.s32.totalorder %s79_s14, %s3552_s1  ;;  %p3558_p3 = scmp.lt.s32.totalorder %s3552_s1, %s3552_s1 }
  0x60   :  { %p3559_p4 = por %p3558_p3, %p3557_p2 }
  0x62   :  { %p3560_p5 = pnand %p3559_p4, %p3553_p1 }
  0x64   :  { %3563 = shalt.err (!%p3560_p5)
}
  0x65   :  { %s3606_s4 = smov 256   ;;  %s3607_s18 = smov 16  }
  0x66   :  { %84 = dma.hbm_to_vmem [thread:$0]  %s4316_s5, 4096, %s79_s14, [#allocation12], %s3606_s4, %s3606_s4, %s3607_s18  }
  0x67   :  { %3586 = dma.done.wait [#allocation3], 128  }
  0x68   :  { %3587 = vsyncadd [#allocation3], 4294967168 }
  0x69   :  { %3588 = dma.done.wait [#allocation6], 1664  }
  0x6a   :  { %3589 = vsyncadd [#allocation6], 4294965632 }
  0x6b   :  { %3590 = dma.done.wait [#allocation9], 2816  }
  0x6c   :  { %3591 = vsyncadd [#allocation9], 4294964480 }
  0x6d   :  { %3592 = dma.done.wait [#allocation12], 4096  }
  0x6e   :  { %3593 = vsyncadd [#allocation12], 4294963200  ;;  %v3608_v0 = vmov 0   ;;  %v3744_v1 = vld [vmem:[#allocation7 + $0x4] ss:$8 sps:$4 sm:$0xff]   ;;  %v3751_v4 = vld [vmem:[#allocation2] sm:$0xff]  ;;  %v129_v6 = vlaneseq }
  0x6f   :  { %237 = vmatprep.mubr.bf16.mxu0 %v3608_v0  ;;  %3170 = vset.pattern.permute.xlu0 %v3608_v0  ;;  %v3746_v2 = vld [vmem:[#allocation7] ss:$8 sps:$4 sm:$0xff]   ;;  %v3749_v3 = vld [vmem:[#allocation7 + $0x14] ss:$8 sps:$4 sm:$0xff]   ;;  %v3755_v5 = vld [vmem:[#allocation7 + $0x10] ss:$8 sps:$4 sm:$0xff]  }
  0x70   :  { %310 = vmatprep.mubr.bf16.mxu1 %v3608_v0  ;;  %205 = vmatprep.subr.bf16.mxu0 %v3744_v1  ;;  %v3766_v7 = vshrl.u32 %v129_v6, 7  ;;  %v3771_v9 = vld [vmem:[#allocation8] sm:$0xff]  ;;  %s3609_s5 = smov 32   ;;  %v3795_v34 = vld [vmem:[#allocation7 + $0x34] ss:$8 sps:$4 sm:$0xff]   ;;  %v3610_v37 = vmov 1  }
  0x71   :  { %278 = vmatprep.subr.bf16.mxu1 %v3744_v1  ;;  %206 = vmatpush1.bf16.msra.mxu0 %v3746_v2  ;;  %v3791_v32 = vld [vmem:[#allocation7 + $0x24] ss:$8 sps:$4 sm:$0xff]   ;;  %v3793_v33 = vld [vmem:[#allocation7 + $0x20] ss:$8 sps:$4 sm:$0xff]   ;;  %v3799_v35 = vld [vmem:[#allocation7 + $0x30] ss:$8 sps:$4 sm:$0xff]  }
  0x72   :  { %126 = vperm.xlu0 %3170, %v3751_v4   ;;  %207 = vmatprep.subr.bf16.mxu0 %v3749_v3  ;;  %v3769_v8 = vsub.s32 0, %v3766_v7  ;;  %v3778_v11 = vsub.s32 1, %v3766_v7  ;;  %vm201_vm0 = vcmask 261120   ;;  %v3820_v48 = vsub.s32 2, %v3766_v7  ;;  %s3617_s16 = smov 96  }
  0x73   :  { %279 = vmatpush1.bf16.msra.mxu1 %v3746_v2  ;;  %3171 = vset.pattern.permute.xlu1 %v3610_v37  ;;  %v3611_v37 = vmov 2   ;;  %vm3619_vm1 = vmmov 0   ;;  %vm2904_vm3 = vcmask 523264   ;;  %vm2906_vm4 = vcmask 531456  }
  0x74   :  { %280 = vmatprep.subr.bf16.mxu1 %v3749_v3  ;;  %v3775_v10 = vrot.slane %v3771_v9, %v3769_v8  ;;  %v3783_v14 = vrot.slane %v3771_v9, %v3778_v11  ;;  %v3825_v51 = vrot.slane %v3771_v9, %v3820_v48 }
  0x75   :  { %208 = vmatpush1.bf16.msra.mxu0 %v3755_v5 }
  0x76   :  { %339 = vmatprep.subr.bf16.mxu0 %v3791_v32  ;;  %3172 = vset.pattern.permute.xlu0 %v3611_v37 }
  0x77   :  { %281 = vmatpush1.bf16.msra.mxu1 %v3755_v5 }
  0x78   :  { %443 = vmatprep.subr.bf16.mxu1 %v3744_v1  ;;  %238 = vmatmul.mubr.bf16.vlgmr.msra.gmra.mrb[0].mxu0 %v3608_v0 }
  0x79   :  { %371 = vmatprep.mubr.bf16.mxu0 %v3608_v0  ;;  %340 = vmatpush1.bf16.msra.mxu0 %v3793_v33 }
  0x7a   :  { %341 = vmatprep.subr.bf16.mxu0 %v3795_v34 }
  0x7d   :  { %342 = vmatpush1.bf16.msra.mxu0 %v3799_v35 }
  0x7e   :  { %491 = vmatprep.subr.bf16.mxu0 %v3791_v32 }
  0x80   :  { %372 = vmatmul.mubr.bf16.vlgmr.msra.gmra.mrb[4].mxu0 %v3608_v0 }
  0x81   :  { %492 = vmatpush1.bf16.msra.mxu0 %v3793_v33  ;;  %523 = vmatprep.mubr.bf16.mxu0 %v3608_v0 }
  0x82   :  { %493 = vmatprep.subr.bf16.mxu0 %v3795_v34 }
  0x85   :  { %494 = vmatpush1.bf16.msra.mxu0 %v3799_v35 }
  0x86   :  { %683 = vmatprep.subr.bf16.mxu0 %v3744_v1 }
  0xf1   :  { %v127_v12 = vpop.permute.xlu0 %126 }
  0xf2   :  { %v133_v13 = vmul.f32 %v3775_v10, %v127_v12 }
  0xf4   :  { %v138_v15 = vadd.f32 %v3783_v14, %v133_v13 }
 0x14b   :  { %v239_v16 = vpop.f32.mrb[0].mxu0 }
 0x14c   :  { %v245_v17 = vadd.f32 %v239_v16, %v138_v15  ;;  %v241_v18 = vpop.f32.mrb[1].mxu0 }
 0x14d   :  { %v242_v19 = vpop.f32.mrb[2].mxu0 }
 0x14e   :  { %v2931_v20 = vmul.f32 -1.442695, %v245_v17  ;;  %v243_v21 = vpop.f32.mrb[3].mxu0 }
 0x150   :  { %3264 = vpow2.f32 %v2931_v20 }
 0x153   :  { %v373_v42 = vpop.f32.mrb[4].mxu0 }
 0x154   :  { %v375_v43 = vpop.f32.mrb[5].mxu0 }
 0x155   :  { %v376_v44 = vpop.f32.mrb[6].mxu0  ;;  %v3849_v43 = vld [vmem:[#allocation7 + $0x54] ss:$8 sps:$4 sm:$0xff]  }
 0x156   :  { %v377_v45 = vpop.f32.mrb[7].mxu0 }
 0x157   :  { %v3853_v45 = vld [vmem:[#allocation7 + $0x50] ss:$8 sps:$4 sm:$0xff]  }
 0x15a   :  { %v3265_v22 = vpop.eup %3264 }
 0x15b   :  { %v249_v23 = vadd.f32 1.0, %v3265_v22 }
 0x15d   :  { %3266 = vrcp.f32 %v249_v23 }
 0x167   :  { %v3267_v24 = vpop.eup %3266 }
 0x168   :  { %v252_v25 = vmul.f32 2.0, %v3267_v24  ;;  %v254_v29 = vmul.f32 0.0, %v3267_v24 }
 0x16a   :  { %v2932_v26 = vadd.f32 -1.0, %v252_v25 }
 0x16c   :  { %256 = vrot.lane.b32.xlu0 %v2932_v26, %s3603_s2 }
 0x1de   :  { %v257_v27 = vpop.permute.xlu0 %256 }
 0x1df   :  { %v259_v28 = vmul.f32 %v3267_v24, %v257_v27 }
 0x1e1   :  { %261 = vrot.lane.b32.xlu1 %v259_v28, %s3609_s5  ;;  %v3839_v28 = vld [vmem:[#allocation7 + $0x44] ss:$8 sps:$4 sm:$0xff]  }
 0x253   :  { %v262_v30 = vpop.permute.xlu1 %261 }
 0x254   :  { %v3788_v31 = vadd.f32 %v262_v30, %v254_v29 }
 0x256   :  { %3268 = vtanh.f32 %v3788_v31 }
 0x260   :  { %v3269_v36 = vpop.eup %3268 }
 0x261   :  { %267 = vrot.lane.b32.xlu1 %v3269_v36, %s3603_s2 }
 0x265   :  { %140 = vperm.xlu1 %3171, %v3751_v4  }
 0x2d3   :  { %v268_v38 = vpop.permute.xlu1 %267 }
 0x2d4   :  { %v270_v39 = vmul.f32 %v3267_v24, %v268_v38 }
 0x2d6   :  { %v271_v40 = vpack.c.bf16 %v270_v39, %v270_v39 }
 0x2d8   :  { %273 = vrot.lane.b32.xlu0 %v271_v40, %s3609_s5 }
 0x2e4   :  { %v141_v46 = vpop.permute.xlu1 %140 }
 0x2e5   :  { %v143_v47 = vmul.f32 %v141_v46, %v3775_v10 }
 0x2e7   :  { %v144_v49 = vadd.f32 %v143_v47, %v3783_v14 }
 0x34a   :  { %v274_v41 = vpop.permute.xlu0 %273 }
 0x34b   :  { %2933 = vmatmul.mubr.msk.bf16.vlgmr.msra.gmra.mrb[0].mxu1 %vm201_vm0, %v274_v41 }
 0x34c   :  { %444 = vmatpush1.bf16.msra.mxu1 %v3746_v2  ;;  %475 = vmatprep.mubr.bf16.mxu1 %v3608_v0 }
 0x34d   :  { %445 = vmatprep.subr.bf16.mxu1 %v3749_v3 }
 0x350   :  { %446 = vmatpush1.bf16.msra.mxu1 %v3755_v5 }
 0x351   :  { %552 = vmatprep.subr.bf16.mxu1 %v3839_v28 }
 0x41e   :  { %v312_v50 = vpop.f32.mrb[0].mxu1 }
 0x41f   :  { %v379_v52 = vadd.f32 %v312_v50, %v144_v49  ;;  %v314_v53 = vpop.f32.mrb[1].mxu1 }
 0x420   :  { %v405_v54 = vadd.f32 %v373_v42, %v314_v53  ;;  %v316_v55 = vpop.f32.mrb[2].mxu1  ;;  %v3847_v42 = vld [vmem:[#allocation7 + $0x40] ss:$8 sps:$4 sm:$0xff]  }
 0x421   :  { %v2938_v56 = vmul.f32 -1.442695, %v379_v52  ;;  %v317_v57 = vpop.f32.mrb[3].mxu1 }
 0x422   :  { %v410_v58 = vadd.f32 %v3825_v51, %v405_v54 }
 0x423   :  { %3270 = vpow2.f32 %v2938_v56 }
 0x424   :  { %v2940_v59 = vmul.f32 -1.442695, %v410_v58 }
 0x426   :  { %3272 = vpow2.f32 %v2940_v59  ;;  %v648_v59 = vsub.s32 3, %v3766_v7 }
 0x42d   :  { %v3271_v60 = vpop.eup %3270 }
 0x42e   :  { %v383_v61 = vadd.f32 1.0, %v3271_v60 }
 0x430   :  { %v3273_v62 = vpop.eup %3272  ;;  %3274 = vrcp.f32 %v383_v61 }
 0x431   :  { %v414_v63 = vadd.f32 1.0, %v3273_v62 }
 0x433   :  { %3276 = vrcp.f32 %v414_v63 }
 0x43a   :  { %v3275_v6 = vpop.eup %3274 }
 0x43b   :  { %v386_v12 = vmul.f32 2.0, %v3275_v6  ;;  %v388_v22 = vmul.f32 %v3275_v6, %v3788_v31 }
 0x43d   :  { %v3277_v13 = vpop.eup %3276  ;;  %v2939_v15 = vadd.f32 -1.0, %v386_v12  ;;  %v3878_v12 = vrot.slane %v3771_v9, %v648_v59 }
 0x43e   :  { %v417_v16 = vmul.f32 2.0, %v3277_v13  ;;  %v419_v25 = vmul.f32 0.0, %v3277_v13 }
 0x43f   :  { %390 = vrot.lane.b32.xlu0 %v2939_v15, %s3603_s2 }
 0x440   :  { %v2941_v17 = vadd.f32 -1.0, %v417_v16 }
 0x442   :  { %421 = vrot.lane.b32.xlu1 %v2941_v17, %s3603_s2 }
 0x4b1   :  { %v391_v18 = vpop.permute.xlu0 %390 }
 0x4b2   :  { %v393_v19 = vmul.f32 %v3275_v6, %v391_v18 }
 0x4b4   :  { %395 = vrot.lane.b32.xlu0 %v393_v19, %s3609_s5  ;;  %v422_v20 = vpop.permute.xlu1 %421 }
 0x4b5   :  { %v424_v21 = vmul.f32 %v3277_v13, %v422_v20 }
 0x4b7   :  { %426 = vrot.lane.b32.xlu1 %v424_v21, %s3609_s5 }
 0x526   :  { %v396_v23 = vpop.permute.xlu0 %395 }
 0x527   :  { %v3833_v24 = vadd.f32 %v396_v23, %v388_v22 }
 0x529   :  { %3278 = vtanh.f32 %v3833_v24  ;;  %v427_v26 = vpop.permute.xlu1 %426 }
 0x52a   :  { %v3836_v27 = vadd.f32 %v427_v26, %v419_v25 }
 0x52c   :  { %3280 = vtanh.f32 %v3836_v27 }
 0x533   :  { %v3279_v29 = vpop.eup %3278 }
 0x534   :  { %401 = vrot.lane.b32.xlu0 %v3279_v29, %s3603_s2 }
 0x536   :  { %v3281_v30 = vpop.eup %3280 }
 0x537   :  { %432 = vrot.lane.b32.xlu1 %v3281_v30, %s3603_s2 }
 0x5a6   :  { %v402_v31 = vpop.permute.xlu0 %401 }
 0x5a7   :  { %v404_v36 = vmul.f32 %v3275_v6, %v402_v31 }
 0x5a9   :  { %v436_v38 = vpack.c.bf16 %v404_v36, %v404_v36  ;;  %v433_v39 = vpop.permute.xlu1 %432 }
 0x5aa   :  { %v435_v40 = vmul.f32 %v3277_v13, %v433_v39 }
 0x5ab   :  { %438 = vrot.lane.b32.xlu0 %v436_v38, %s3609_s5 }
 0x5ac   :  { %v484_v41 = vpack.c.bf16 %v435_v40, %v435_v40 }
 0x5ae   :  { %486 = vrot.lane.b32.xlu1 %v484_v41, %s3609_s5 }
 0x5af   :  { %146 = vperm.xlu0 %3172, %v3751_v4  }
 0x61d   :  { %v439_v44 = vpop.permute.xlu0 %438 }
 0x61e   :  { %2942 = vmatmul.mubr.msk.bf16.vlgmr.msra.gmra.mrb[4].mxu1 %vm201_vm0, %v439_v44 }
 0x61f   :  { %553 = vmatpush1.bf16.msra.mxu1 %v3847_v42  ;;  %584 = vmatprep.mubr.bf16.mxu1 %v3608_v0 }
 0x620   :  { %v487_v46 = vpop.permute.xlu1 %486  ;;  %554 = vmatprep.subr.bf16.mxu1 %v3849_v43 }
 0x621   :  { %2943 = vmatmul.mubr.msk.bf16.vlgmr.msra.gmra.mrb[8].mxu0 %vm201_vm0, %v487_v46 }
 0x622   :  { %684 = vmatpush1.bf16.msra.mxu0 %v3746_v2  ;;  %715 = vmatprep.mubr.bf16.mxu0 %v3608_v0 }
 0x623   :  { %555 = vmatpush1.bf16.msra.mxu1 %v3853_v45  ;;  %685 = vmatprep.subr.bf16.mxu0 %v3749_v3 }
 0x624   :  { %731 = vmatprep.subr.bf16.mxu1 %v3791_v32 }
 0x626   :  { %585 = vmatmul.mubr.bf16.vlgmr.msra.gmra.mrb[8].mxu1 %v3608_v0  ;;  %686 = vmatpush1.bf16.msra.mxu0 %v3755_v5 }
 0x627   :  { %732 = vmatpush1.bf16.msra.mxu1 %v3793_v33  ;;  %779 = vmatprep.subr.bf16.mxu0 %v3839_v28 }
 0x628   :  { %733 = vmatprep.subr.bf16.mxu1 %v3795_v34  ;;  %763 = vmatprep.mubr.bf16.mxu1 %v3608_v0 }
 0x62b   :  { %734 = vmatpush1.bf16.msra.mxu1 %v3799_v35 }
 0x62c   :  { %906 = vmatprep.subr.bf16.mxu1 %v3744_v1 }
 0x62e   :  { %v147_v47 = vpop.permute.xlu0 %146 }
 0x62f   :  { %v149_v49 = vmul.f32 %v147_v47, %v3775_v10 }
 0x631   :  { %v150_v50 = vadd.f32 %v149_v49, %v3783_v14 }
 0x6f1   :  { %v477_v52 = vpop.f32.mrb[4].mxu1 }
 0x6f2   :  { %v592_v53 = vadd.f32 %v477_v52, %v150_v50  ;;  %v479_v54 = vpop.f32.mrb[5].mxu1 }
 0x6f3   :  { %v481_v55 = vpop.f32.mrb[6].mxu1 }
 0x6f4   :  { %v2948_v56 = vmul.f32 -1.442695, %v592_v53  ;;  %v482_v57 = vpop.f32.mrb[7].mxu1  ;;  %v525_v58 = vpop.f32.mrb[8].mxu0 }
 0x6f5   :  { %v618_v60 = vadd.f32 %v525_v58, %v479_v54  ;;  %v527_v61 = vpop.f32.mrb[9].mxu0 }
 0x6f6   :  { %3282 = vpow2.f32 %v2948_v56  ;;  %v529_v62 = vpop.f32.mrb[10].mxu0 }
 0x6f7   :  { %v619_v63 = vadd.f32 %v618_v60, %v3825_v51  ;;  %v530_v6 = vpop.f32.mrb[11].mxu0 }
 0x6f9   :  { %v2950_v13 = vmul.f32 -1.442695, %v619_v63  ;;  %v586_v15 = vpop.f32.mrb[8].mxu1 }
 0x6fa   :  { %v645_v16 = vadd.f32 %v586_v15, %v527_v61  ;;  %v588_v17 = vpop.f32.mrb[9].mxu1 }
 0x6fb   :  { %3284 = vpow2.f32 %v2950_v13  ;;  %v589_v18 = vpop.f32.mrb[10].mxu1  ;;  %v3612_v17 = vmov 3  }
 0x6fc   :  { %v650_v19 = vadd.f32 %v3878_v12, %v645_v16  ;;  %v590_v20 = vpop.f32.mrb[11].mxu1  ;;  %3173 = vset.pattern.permute.xlu0 %v3612_v17 }
 0x6fe   :  { %v2952_v21 = vmul.f32 -1.442695, %v650_v19 }
 0x700   :  { %v3283_v22 = vpop.eup %3282  ;;  %3286 = vpow2.f32 %v2952_v21 }
 0x701   :  { %v596_v23 = vadd.f32 1.0, %v3283_v22 }
 0x703   :  { %3288 = vrcp.f32 %v596_v23 }
 0x705   :  { %v3285_v25 = vpop.eup %3284 }
 0x706   :  { %v623_v26 = vadd.f32 1.0, %v3285_v25 }
 0x708   :  { %3290 = vrcp.f32 %v623_v26 }
 0x70a   :  { %v3287_v29 = vpop.eup %3286 }
 0x70b   :  { %v654_v9 = vadd.f32 1.0, %v3287_v29 }
 0x70d   :  { %v3289_v30 = vpop.eup %3288  ;;  %3292 = vrcp.f32 %v654_v9 }
 0x70e   :  { %v599_v31 = vmul.f32 2.0, %v3289_v30  ;;  %v601_v54 = vmul.f32 %v3289_v30, %v3833_v24 }
 0x710   :  { %v2949_v36 = vadd.f32 -1.0, %v599_v31 }
 0x712   :  { %v3291_v37 = vpop.eup %3290  ;;  %603 = vrot.lane.b32.xlu1 %v2949_v36, %s3603_s2 }
 0x713   :  { %v626_v38 = vmul.f32 2.0, %v3291_v37  ;;  %v628_v57 = vmul.f32 %v3291_v37, %v3836_v27 }
 0x715   :  { %v2951_v39 = vadd.f32 -1.0, %v626_v38 }
 0x717   :  { %v3293_v40 = vpop.eup %3292  ;;  %630 = vrot.lane.b32.xlu1 %v2951_v39, %s3603_s2 }
 0x718   :  { %v657_v41 = vmul.f32 2.0, %v3293_v40  ;;  %v659_v61 = vmul.f32 0.0, %v3293_v40 }
 0x71a   :  { %v2953_v44 = vadd.f32 -1.0, %v657_v41 }
 0x71c   :  { %661 = vrot.lane.b32.xlu0 %v2953_v44, %s3603_s2 }
 0x784   :  { %v604_v46 = vpop.permute.xlu1 %603 }
 0x785   :  { %v606_v47 = vmul.f32 %v3289_v30, %v604_v46 }
 0x787   :  { %608 = vrot.lane.b32.xlu1 %v606_v47, %s3609_s5 }
 0x789   :  { %v631_v49 = vpop.permute.xlu1 %630 }
 0x78a   :  { %v633_v50 = vmul.f32 %v3291_v37, %v631_v49 }
 0x78c   :  { %635 = vrot.lane.b32.xlu0 %v633_v50, %s3609_s5 }
 0x78e   :  { %v662_v52 = vpop.permute.xlu0 %661 }
 0x78f   :  { %v664_v53 = vmul.f32 %v3293_v40, %v662_v52 }
 0x791   :  { %666 = vrot.lane.b32.xlu1 %v664_v53, %s3609_s5 }
 0x7f9   :  { %v609_v55 = vpop.permute.xlu1 %608 }
 0x7fa   :  { %v3888_v56 = vadd.f32 %v609_v55, %v601_v54 }
 0x7fc   :  { %3294 = vtanh.f32 %v3888_v56 }
 0x7fe   :  { %v636_v58 = vpop.permute.xlu0 %635 }
 0x7ff   :  { %v3892_v60 = vadd.f32 %v636_v58, %v628_v57 }
 0x801   :  { %3296 = vtanh.f32 %v3892_v60 }
 0x803   :  { %v667_v62 = vpop.permute.xlu1 %666 }
 0x804   :  { %v3895_v63 = vadd.f32 %v667_v62, %v659_v61 }
 0x806   :  { %v3295_v6 = vpop.eup %3294  ;;  %3298 = vtanh.f32 %v3895_v63 }
 0x807   :  { %614 = vrot.lane.b32.xlu0 %v3295_v6, %s3603_s2 }
 0x80b   :  { %v3297_v24 = vpop.eup %3296 }
 0x80c   :  { %641 = vrot.lane.b32.xlu1 %v3297_v24, %s3603_s2 }
 0x810   :  { %v3299_v13 = vpop.eup %3298 }
 0x811   :  { %672 = vrot.lane.b32.xlu0 %v3299_v13, %s3603_s2 }
 0x879   :  { %v615_v27 = vpop.permute.xlu0 %614 }
 0x87a   :  { %v617_v15 = vmul.f32 %v3289_v30, %v615_v27 }
 0x87c   :  { %v676_v16 = vpack.c.bf16 %v617_v15, %v617_v15 }
 0x87e   :  { %v642_v18 = vpop.permute.xlu1 %641  ;;  %678 = vrot.lane.b32.xlu1 %v676_v16, %s3609_s5 }
 0x87f   :  { %v644_v19 = vmul.f32 %v3291_v37, %v642_v18 }
 0x881   :  { %v724_v20 = vpack.c.bf16 %v644_v19, %v644_v19 }
 0x883   :  { %726 = vrot.lane.b32.xlu0 %v724_v20, %s3609_s5  ;;  %v673_v21 = vpop.permute.xlu0 %672 }
 0x884   :  { %v675_v22 = vmul.f32 %v3293_v40, %v673_v21 }
 0x886   :  { %v772_v23 = vpack.c.bf16 %v675_v22, %v675_v22 }
 0x887   :  { %152 = vperm.xlu0 %3173, %v3751_v4  }
 0x888   :  { %774 = vrot.lane.b32.xlu1 %v772_v23, %s3609_s5 }
 0x8f0   :  { %v679_v25 = vpop.permute.xlu1 %678 }
 0x8f1   :  { %2954 = vmatmul.mubr.msk.bf16.vlgmr.msra.gmra.mrb[12].mxu0 %vm201_vm0, %v679_v25 }
 0x8f2   :  { %780 = vmatpush1.bf16.msra.mxu0 %v3847_v42  ;;  %811 = vmatprep.mubr.bf16.mxu0 %v3608_v0 }
 0x8f3   :  { %781 = vmatprep.subr.bf16.mxu0 %v3849_v43 }
 0x8f5   :  { %v727_v26 = vpop.permute.xlu0 %726 }
 0x8f6   :  { %2955 = vmatmul.mubr.msk.bf16.vlgmr.msra.gmra.mrb[12].mxu1 %vm201_vm0, %v727_v26  ;;  %782 = vmatpush1.bf16.msra.mxu0 %v3853_v45 }
 0x8f7   :  { %907 = vmatpush1.bf16.msra.mxu1 %v3746_v2  ;;  %938 = vmatprep.mubr.bf16.mxu1 %v3608_v0 }
 0x8f8   :  { %908 = vmatprep.subr.bf16.mxu1 %v3749_v3  ;;  %954 = vmatprep.subr.bf16.mxu0 %v3791_v32 }
 0x8fa   :  { %v775_v29 = vpop.permute.xlu1 %774 }
 0x8fb   :  { %2956 = vmatmul.mubr.msk.bf16.vlgmr.msra.gmra.mrb[16].mxu0 %vm201_vm0, %v775_v29  ;;  %909 = vmatpush1.bf16.msra.mxu1 %v3755_v5 }
 0x8fc   :  { %955 = vmatpush1.bf16.msra.mxu0 %v3793_v33  ;;  %1002 = vmatprep.subr.bf16.mxu1 %v3839_v28 }
 0x8fd   :  { %956 = vmatprep.subr.bf16.mxu0 %v3795_v34  ;;  %986 = vmatprep.mubr.bf16.mxu0 %v3608_v0 }
 0x900   :  { %957 = vmatpush1.bf16.msra.mxu0 %v3799_v35 }
 0x901   :  { %1129 = vmatprep.subr.bf16.mxu0 %v3744_v1 }
 0x906   :  { %v153_v9 = vpop.permute.xlu0 %152 }
 0x907   :  { %v155_v30 = vmul.f32 %v153_v9, %v3775_v10 }
 0x909   :  { %v156_v31 = vadd.f32 %v155_v30, %v3783_v14 }
 0x9c4   :  { %v717_v36 = vpop.f32.mrb[12].mxu0 }
 0x9c5   :  { %v819_v37 = vadd.f32 %v717_v36, %v156_v31  ;;  %v719_v38 = vpop.f32.mrb[13].mxu0 }
 0x9c6   :  { %v721_v39 = vpop.f32.mrb[14].mxu0 }
 0x9c7   :  { %v2957_v40 = vmul.f32 -1.442695, %v819_v37  ;;  %v722_v41 = vpop.f32.mrb[15].mxu0 }
 0x9c9   :  { %3300 = vpow2.f32 %v2957_v40  ;;  %v765_v44 = vpop.f32.mrb[12].mxu1 }
 0x9ca   :  { %v845_v46 = vadd.f32 %v765_v44, %v719_v38  ;;  %v767_v47 = vpop.f32.mrb[13].mxu1 }
 0x9cb   :  { %v769_v49 = vpop.f32.mrb[14].mxu1 }
 0x9cc   :  { %v846_v50 = vadd.f32 %v845_v46, %v3825_v51  ;;  %v770_v52 = vpop.f32.mrb[15].mxu1 }
 0x9ce   :  { %v2959_v53 = vmul.f32 -1.442695, %v846_v50  ;;  %v813_v54 = vpop.f32.mrb[16].mxu0 }
 0x9cf   :  { %v872_v55 = vadd.f32 %v813_v54, %v767_v47  ;;  %v815_v57 = vpop.f32.mrb[17].mxu0 }
 0x9d0   :  { %3302 = vpow2.f32 %v2959_v53  ;;  %v816_v58 = vpop.f32.mrb[18].mxu0 }
 0x9d1   :  { %v873_v61 = vadd.f32 %v872_v55, %v3878_v12  ;;  %v817_v62 = vpop.f32.mrb[19].mxu0 }
 0x9d3   :  { %v3301_v6 = vpop.eup %3300  ;;  %v2961_v24 = vmul.f32 -1.442695, %v873_v61 }
 0x9d4   :  { %v823_v13 = vadd.f32 1.0, %v3301_v6 }
 0x9d5   :  { %3304 = vpow2.f32 %v2961_v24 }
 0x9d6   :  { %3306 = vrcp.f32 %v823_v13 }
 0x9da   :  { %v3303_v27 = vpop.eup %3302 }
 0x9db   :  { %v850_v15 = vadd.f32 1.0, %v3303_v27 }
 0x9dd   :  { %3308 = vrcp.f32 %v850_v15 }
 0x9df   :  { %v3305_v16 = vpop.eup %3304 }
 0x9e0   :  { %v3307_v17 = vpop.eup %3306  ;;  %v877_v18 = vadd.f32 1.0, %v3305_v16 }
 0x9e1   :  { %v826_v19 = vmul.f32 2.0, %v3307_v17  ;;  %v828_v39 = vmul.f32 %v3307_v17, %v3888_v56 }
 0x9e2   :  { %3310 = vrcp.f32 %v877_v18 }
 0x9e3   :  { %v2958_v20 = vadd.f32 -1.0, %v826_v19 }
 0x9e5   :  { %830 = vrot.lane.b32.xlu1 %v2958_v20, %s3603_s2 }
 0x9e7   :  { %v3309_v21 = vpop.eup %3308 }
 0x9e8   :  { %v853_v22 = vmul.f32 2.0, %v3309_v21  ;;  %v855_v44 = vmul.f32 %v3309_v21, %v3892_v60 }
 0x9ea   :  { %v2960_v23 = vadd.f32 -1.0, %v853_v22 }
 0x9ec   :  { %v3311_v25 = vpop.eup %3310  ;;  %857 = vrot.lane.b32.xlu1 %v2960_v23, %s3603_s2 }
 0x9ed   :  { %v880_v26 = vmul.f32 2.0, %v3311_v25  ;;  %v882_v49 = vmul.f32 %v3311_v25, %v3895_v63  ;;  %v3613_v63 = vmov 4  }
 0x9ee   :  { %3174 = vset.pattern.permute.xlu0 %v3613_v63 }
 0x9ef   :  { %v2962_v29 = vadd.f32 -1.0, %v880_v26 }
 0x9f1   :  { %884 = vrot.lane.b32.xlu0 %v2962_v29, %s3603_s2 }
 0xa57   :  { %v831_v9 = vpop.permute.xlu1 %830 }
 0xa58   :  { %v833_v30 = vmul.f32 %v3307_v17, %v831_v9 }
 0xa5a   :  { %835 = vrot.lane.b32.xlu1 %v833_v30, %s3609_s5 }
 0xa5e   :  { %v858_v31 = vpop.permute.xlu1 %857 }
 0xa5f   :  { %v860_v36 = vmul.f32 %v3309_v21, %v858_v31 }
 0xa61   :  { %862 = vrot.lane.b32.xlu0 %v860_v36, %s3609_s5 }
 0xa63   :  { %v885_v37 = vpop.permute.xlu0 %884 }
 0xa64   :  { %v887_v38 = vmul.f32 %v3311_v25, %v885_v37 }
 0xa66   :  { %889 = vrot.lane.b32.xlu1 %v887_v38, %s3609_s5 }
 0xacc   :  { %v836_v40 = vpop.permute.xlu1 %835 }
 0xacd   :  { %v3934_v41 = vadd.f32 %v836_v40, %v828_v39 }
 0xacf   :  { %3312 = vtanh.f32 %v3934_v41 }
 0xad3   :  { %v863_v46 = vpop.permute.xlu0 %862 }
 0xad4   :  { %v3938_v47 = vadd.f32 %v863_v46, %v855_v44 }
 0xad6   :  { %3314 = vtanh.f32 %v3938_v47 }
 0xad8   :  { %v890_v50 = vpop.permute.xlu1 %889 }
 0xad9   :  { %v3313_v52 = vpop.eup %3312  ;;  %v3942_v53 = vadd.f32 %v890_v50, %v882_v49 }
 0xada   :  { %841 = vrot.lane.b32.xlu0 %v3313_v52, %s3603_s2 }
 0xadb   :  { %3316 = vtanh.f32 %v3942_v53 }
 0xae0   :  { %v3315_v56 = vpop.eup %3314 }
 0xae1   :  { %868 = vrot.lane.b32.xlu1 %v3315_v56, %s3603_s2 }
 0xae5   :  { %v3317_v54 = vpop.eup %3316 }
 0xae6   :  { %895 = vrot.lane.b32.xlu0 %v3317_v54, %s3603_s2 }
 0xb4c   :  { %v842_v60 = vpop.permute.xlu0 %841 }
 0xb4d   :  { %v844_v55 = vmul.f32 %v3307_v17, %v842_v60 }
 0xb4f   :  { %v899_v57 = vpack.c.bf16 %v844_v55, %v844_v55 }
 0xb51   :  { %901 = vrot.lane.b32.xlu1 %v899_v57, %s3609_s5 }
 0xb53   :  { %v869_v58 = vpop.permute.xlu1 %868 }
 0xb54   :  { %v871_v61 = vmul.f32 %v3309_v21, %v869_v58 }
 0xb56   :  { %v947_v62 = vpack.c.bf16 %v871_v61, %v871_v61 }
 0xb58   :  { %949 = vrot.lane.b32.xlu0 %v947_v62, %s3609_s5  ;;  %v896_v6 = vpop.permute.xlu0 %895 }
 0xb59   :  { %v898_v24 = vmul.f32 %v3311_v25, %v896_v6 }
 0xb5b   :  { %v995_v13 = vpack.c.bf16 %v898_v24, %v898_v24 }
 0xb5c   :  { %158 = vperm.xlu0 %3174, %v3751_v4  }
 0xb5d   :  { %997 = vrot.lane.b32.xlu1 %v995_v13, %s3609_s5 }
 0xbc3   :  { %v902_v27 = vpop.permute.xlu1 %901 }
 0xbc4   :  { %2963 = vmatmul.mubr.msk.bf16.vlgmr.msra.gmra.mrb[16].mxu1 %vm201_vm0, %v902_v27 }
 0xbc5   :  { %1003 = vmatpush1.bf16.msra.mxu1 %v3847_v42  ;;  %1034 = vmatprep.mubr.bf16.mxu1 %v3608_v0 }
 0xbc6   :  { %1004 = vmatprep.subr.bf16.mxu1 %v3849_v43 }
 0xbc9   :  { %1005 = vmatpush1.bf16.msra.mxu1 %v3853_v45 }
 0xbca   :  { %v950_v15 = vpop.permute.xlu0 %949  ;;  %1177 = vmatprep.subr.bf16.mxu1 %v3791_v32 }
 0xbcb   :  { %2964 = vmatmul.mubr.msk.bf16.vlgmr.msra.gmra.mrb[20].mxu0 %vm201_vm0, %v950_v15 }
 0xbcc   :  { %1130 = vmatpush1.bf16.msra.mxu0 %v3746_v2  ;;  %1161 = vmatprep.mubr.bf16.mxu0 %v3608_v0 }
 0xbcd   :  { %1131 = vmatprep.subr.bf16.mxu0 %v3749_v3 }
 0xbcf   :  { %v998_v4 = vpop.permute.xlu1 %997 }
 0xbd0   :  { %2965 = vmatmul.mubr.msk.bf16.vlgmr.msra.gmra.mrb[20].mxu1 %vm201_vm0, %v998_v4  ;;  %1132 = vmatpush1.bf16.msra.mxu0 %v3755_v5 }
 0xbd1   :  { %1178 = vmatpush1.bf16.msra.mxu1 %v3793_v33  ;;  %1225 = vmatprep.subr.bf16.mxu0 %v3839_v28 }
 0xbd2   :  { %1179 = vmatprep.subr.bf16.mxu1 %v3795_v34  ;;  %1209 = vmatprep.mubr.bf16.mxu1 %v3608_v0 }
 0xbd5   :  { %1180 = vmatpush1.bf16.msra.mxu1 %v3799_v35 }
 0xbd6   :  { %1352 = vmatprep.subr.bf16.mxu1 %v3744_v1 }
 0xbdb   :  { %v159_v2 = vpop.permute.xlu0 %158 }
 0xbdc   :  { %v161_v3 = vmul.f32 %v159_v2, %v3775_v10 }
 0xbde   :  { %v162_v16 = vadd.f32 %v161_v3, %v3783_v14 }
 0xc97   :  { %v940_v17 = vpop.f32.mrb[16].mxu1 }
 0xc98   :  { %v1042_v18 = vadd.f32 %v940_v17, %v162_v16  ;;  %v942_v5 = vpop.f32.mrb[17].mxu1 }
 0xc99   :  { %v944_v19 = vpop.f32.mrb[18].mxu1 }
 0xc9a   :  { %v2966_v20 = vmul.f32 -1.442695, %v1042_v18  ;;  %v945_v21 = vpop.f32.mrb[19].mxu1 }
 0xc9c   :  { %3318 = vpow2.f32 %v2966_v20 }
 0xc9e   :  { %v988_v22 = vpop.f32.mrb[20].mxu0 }
 0xc9f   :  { %v1068_v23 = vadd.f32 %v988_v22, %v942_v5  ;;  %v990_v25 = vpop.f32.mrb[21].mxu0 }
 0xca0   :  { %v992_v26 = vpop.f32.mrb[22].mxu0 }
 0xca1   :  { %v1069_v29 = vadd.f32 %v1068_v23, %v3825_v51  ;;  %v993_v9 = vpop.f32.mrb[23].mxu0 }
 0xca2   :  { %v3614_v9 = vmov 5  }
 0xca3   :  { %v2968_v1 = vmul.f32 -1.442695, %v1069_v29  ;;  %v1036_v30 = vpop.f32.mrb[20].mxu1  ;;  %3175 = vset.pattern.permute.xlu0 %v3614_v9 }
 0xca4   :  { %v1095_v31 = vadd.f32 %v1036_v30, %v990_v25  ;;  %v1038_v36 = vpop.f32.mrb[21].mxu1 }
 0xca5   :  { %3320 = vpow2.f32 %v2968_v1  ;;  %v1039_v37 = vpop.f32.mrb[22].mxu1 }
 0xca6   :  { %v3319_v38 = vpop.eup %3318  ;;  %v1096_v39 = vadd.f32 %v1095_v31, %v3878_v12  ;;  %v1040_v40 = vpop.f32.mrb[23].mxu1 }
 0xca7   :  { %v1046_v44 = vadd.f32 1.0, %v3319_v38  ;;  %v3997_v38 = vld [vmem:[#allocation2] sm:$0xff] }
 0xca8   :  { %v2970_v46 = vmul.f32 -1.442695, %v1096_v39 }
 0xca9   :  { %3322 = vrcp.f32 %v1046_v44  ;;  %v4008_v44 = vld [vmem:[#allocation7] ss:$8 sps:$4 sm:$0xff]  }
 0xcaa   :  { %3324 = vpow2.f32 %v2970_v46  ;;  %v4012_v46 = vld [vmem:[#allocation7 + $0x14] ss:$8 sps:$4 sm:$0xff]  }
 0xcaf   :  { %v3321_v49 = vpop.eup %3320 }
 0xcb0   :  { %v1073_v50 = vadd.f32 1.0, %v3321_v49 }
 0xcb2   :  { %3326 = vrcp.f32 %v1073_v50  ;;  %v4016_v50 = vld [vmem:[#allocation7 + $0x10] ss:$8 sps:$4 sm:$0xff]  }
 0xcb3   :  { %v3323_v52 = vpop.eup %3322 }
 0xcb4   :  { %v3325_v56 = vpop.eup %3324  ;;  %v1049_v54 = vmul.f32 2.0, %v3323_v52  ;;  %v1051_v3 = vmul.f32 %v3323_v52, %v3934_v41 }
 0xcb5   :  { %v1100_v60 = vadd.f32 1.0, %v3325_v56 }
 0xcb6   :  { %v2967_v55 = vadd.f32 -1.0, %v1049_v54 }
 0xcb7   :  { %3328 = vrcp.f32 %v1100_v60 }
 0xcb8   :  { %1053 = vrot.lane.b32.xlu1 %v2967_v55, %s3603_s2 }
 0xcbc   :  { %v3327_v57 = vpop.eup %3326 }
 0xcbd   :  { %v1076_v63 = vmul.f32 2.0, %v3327_v57  ;;  %v1078_v18 = vmul.f32 %v3327_v57, %v3938_v47 }
 0xcbf   :  { %v2969_v58 = vadd.f32 -1.0, %v1076_v63 }
 0xcc1   :  { %v3329_v61 = vpop.eup %3328  ;;  %1080 = vrot.lane.b32.xlu1 %v2969_v58, %s3603_s2 }
 0xcc2   :  { %v1103_v62 = vmul.f32 2.0, %v3329_v61  ;;  %v1105_v21 = vmul.f32 %v3329_v61, %v3942_v53 }
 0xcc4   :  { %v2971_v6 = vadd.f32 -1.0, %v1103_v62 }
 0xcc6   :  { %1107 = vrot.lane.b32.xlu0 %v2971_v6, %s3603_s2 }
 0xd2a   :  { %v1054_v24 = vpop.permute.xlu1 %1053 }
 0xd2b   :  { %v1056_v13 = vmul.f32 %v3323_v52, %v1054_v24 }
 0xd2d   :  { %1058 = vrot.lane.b32.xlu1 %v1056_v13, %s3609_s5 }
 0xd33   :  { %v1081_v27 = vpop.permute.xlu1 %1080 }
 0xd34   :  { %v1083_v15 = vmul.f32 %v3327_v57, %v1081_v27 }
 0xd36   :  { %1085 = vrot.lane.b32.xlu0 %v1083_v15, %s3609_s5 }
 0xd38   :  { %v1108_v4 = vpop.permute.xlu0 %1107 }
 0xd39   :  { %v1110_v2 = vmul.f32 %v3329_v61, %v1108_v4 }
 0xd3b   :  { %1112 = vrot.lane.b32.xlu1 %v1110_v2, %s3609_s5 }
 0xd9f   :  { %v1059_v16 = vpop.permute.xlu1 %1058 }
 0xda0   :  { %v3981_v17 = vadd.f32 %v1059_v16, %v1051_v3 }
 0xda2   :  { %3330 = vtanh.f32 %v3981_v17 }
 0xda8   :  { %v1086_v5 = vpop.permute.xlu0 %1085 }
 0xda9   :  { %v3985_v19 = vadd.f32 %v1086_v5, %v1078_v18 }
 0xdab   :  { %3332 = vtanh.f32 %v3985_v19 }
 0xdac   :  { %v3331_v20 = vpop.eup %3330 }
 0xdad   :  { %1064 = vrot.lane.b32.xlu0 %v3331_v20, %s3603_s2  ;;  %v1113_v22 = vpop.permute.xlu1 %1112 }
 0xdae   :  { %v3990_v23 = vadd.f32 %v1113_v22, %v1105_v21 }
 0xdb0   :  { %3334 = vtanh.f32 %v3990_v23 }
 0xdb5   :  { %v3333_v41 = vpop.eup %3332 }
 0xdb6   :  { %1091 = vrot.lane.b32.xlu1 %v3333_v41, %s3603_s2 }
 0xdba   :  { %v3335_v25 = vpop.eup %3334 }
 0xdbb   :  { %1118 = vrot.lane.b32.xlu0 %v3335_v25, %s3603_s2 }
 0xe1f   :  { %v1065_v47 = vpop.permute.xlu0 %1064 }
 0xe20   :  { %v1067_v26 = vmul.f32 %v3323_v52, %v1065_v47 }
 0xe22   :  { %v1122_v29 = vpack.c.bf16 %v1067_v26, %v1067_v26 }
 0xe24   :  { %1124 = vrot.lane.b32.xlu1 %v1122_v29, %s3609_s5 }
 0xe28   :  { %v1092_v53 = vpop.permute.xlu1 %1091 }
 0xe29   :  { %v1094_v1 = vmul.f32 %v3327_v57, %v1092_v53 }
 0xe2b   :  { %v1170_v30 = vpack.c.bf16 %v1094_v1, %v1094_v1 }
 0xe2d   :  { %1172 = vrot.lane.b32.xlu0 %v1170_v30, %s3609_s5  ;;  %v1119_v31 = vpop.permute.xlu0 %1118 }
 0xe2e   :  { %v1121_v36 = vmul.f32 %v3329_v61, %v1119_v31 }
 0xe30   :  { %v1218_v37 = vpack.c.bf16 %v1121_v36, %v1121_v36 }
 0xe31   :  { %164 = vperm.xlu0 %3175, %v3997_v38  }
 0xe32   :  { %1220 = vrot.lane.b32.xlu1 %v1218_v37, %s3609_s5 }
 0xe96   :  { %v1125_v39 = vpop.permute.xlu1 %1124 }
 0xe97   :  { %2972 = vmatmul.mubr.msk.bf16.vlgmr.msra.gmra.mrb[24].mxu0 %vm201_vm0, %v1125_v39 }
 0xe98   :  { %1226 = vmatpush1.bf16.msra.mxu0 %v3847_v42  ;;  %1257 = vmatprep.mubr.bf16.mxu0 %v3608_v0 }
 0xe99   :  { %1227 = vmatprep.subr.bf16.mxu0 %v3849_v43 }
 0xe9c   :  { %1228 = vmatpush1.bf16.msra.mxu0 %v3853_v45 }
 0xe9d   :  { %1400 = vmatprep.subr.bf16.mxu0 %v3791_v32  ;;  %v4024_v32 = vld [vmem:[#allocation7 + $0x4] ss:$8 sps:$4 sm:$0xff]  }
 0xe9f   :  { %v1173_v40 = vpop.permute.xlu0 %1172 }
 0xea0   :  { %2973 = vmatmul.mubr.msk.bf16.vlgmr.msra.gmra.mrb[24].mxu1 %vm201_vm0, %v1173_v40 }
 0xea1   :  { %1353 = vmatpush1.bf16.msra.mxu1 %v4008_v44  ;;  %1384 = vmatprep.mubr.bf16.mxu1 %v3608_v0 }
 0xea2   :  { %1354 = vmatprep.subr.bf16.mxu1 %v4012_v46 }
 0xea4   :  { %v1221_v49 = vpop.permute.xlu1 %1220 }
 0xea5   :  { %2974 = vmatmul.mubr.msk.bf16.vlgmr.msra.gmra.mrb[28].mxu0 %vm201_vm0, %v1221_v49  ;;  %1355 = vmatpush1.bf16.msra.mxu1 %v4016_v50 }
 0xea6   :  { %1401 = vmatpush1.bf16.msra.mxu0 %v3793_v33  ;;  %1448 = vmatprep.subr.bf16.mxu1 %v3839_v28 }
 0xea7   :  { %1402 = vmatprep.subr.bf16.mxu0 %v3795_v34  ;;  %1432 = vmatprep.mubr.bf16.mxu0 %v3608_v0 }
 0xeaa   :  { %1403 = vmatpush1.bf16.msra.mxu0 %v3799_v35 }
 0xeab   :  { %1575 = vmatprep.subr.bf16.mxu0 %v4024_v32 }
 0xeb0   :  { %v165_v52 = vpop.permute.xlu0 %164 }
 0xeb1   :  { %v167_v56 = vmul.f32 %v165_v52, %v3775_v10 }
 0xeb3   :  { %v168_v54 = vadd.f32 %v167_v56, %v3783_v14 }
 0xf6a   :  { %v1163_v60 = vpop.f32.mrb[24].mxu0 }
 0xf6b   :  { %v1265_v55 = vadd.f32 %v1163_v60, %v168_v54  ;;  %v1165_v33 = vpop.f32.mrb[25].mxu0 }
 0xf6c   :  { %v1167_v57 = vpop.f32.mrb[26].mxu0 }
 0xf6d   :  { %v2975_v63 = vmul.f32 -1.442695, %v1265_v55  ;;  %v1168_v58 = vpop.f32.mrb[27].mxu0 }
 0xf6f   :  { %3336 = vpow2.f32 %v2975_v63 }
 0xf73   :  { %v1211_v34 = vpop.f32.mrb[24].mxu1 }
 0xf74   :  { %v1291_v61 = vadd.f32 %v1211_v34, %v1165_v33  ;;  %v1213_v62 = vpop.f32.mrb[25].mxu1 }
 0xf75   :  { %v1215_v35 = vpop.f32.mrb[26].mxu1 }
 0xf76   :  { %v1292_v6 = vadd.f32 %v1291_v61, %v3825_v51  ;;  %v1216_v24 = vpop.f32.mrb[27].mxu1 }
 0xf78   :  { %v2977_v13 = vmul.f32 -1.442695, %v1292_v6  ;;  %v1259_v27 = vpop.f32.mrb[28].mxu0 }
 0xf79   :  { %v3337_v15 = vpop.eup %3336  ;;  %v1318_v4 = vadd.f32 %v1259_v27, %v1213_v62  ;;  %v1261_v2 = vpop.f32.mrb[29].mxu0 }
 0xf7a   :  { %v1269_v3 = vadd.f32 1.0, %v3337_v15  ;;  %3338 = vpow2.f32 %v2977_v13  ;;  %v1262_v16 = vpop.f32.mrb[30].mxu0  ;;  %v3615_v13 = vmov 6  }
 0xf7b   :  { %v1319_v18 = vadd.f32 %v1318_v4, %v3878_v12  ;;  %v1263_v5 = vpop.f32.mrb[31].mxu0  ;;  %3176 = vset.pattern.permute.xlu0 %v3615_v13 }
 0xf7c   :  { %3340 = vrcp.f32 %v1269_v3 }
 0xf7d   :  { %v2979_v20 = vmul.f32 -1.442695, %v1319_v18  ;;  %v4061_v18 = vld [vmem:[#allocation7 + $0x24] ss:$8 sps:$4 sm:$0xff]  }
 0xf7f   :  { %3342 = vpow2.f32 %v2979_v20  ;;  %v4078_v20 = vld [vmem:[#allocation7 + $0x30] ss:$8 sps:$4 sm:$0xff]  }
 0xf84   :  { %v3339_v21 = vpop.eup %3338 }
 0xf85   :  { %v1296_v22 = vadd.f32 1.0, %v3339_v21 }
 0xf86   :  { %v3341_v41 = vpop.eup %3340 }
 0xf87   :  { %3344 = vrcp.f32 %v1296_v22  ;;  %v1272_v25 = vmul.f32 2.0, %v3341_v41  ;;  %v1274_v54 = vmul.f32 %v3341_v41, %v3981_v17 }
 0xf89   :  { %v3343_v47 = vpop.eup %3342  ;;  %v2976_v26 = vadd.f32 -1.0, %v1272_v25 }
 0xf8a   :  { %v1323_v29 = vadd.f32 1.0, %v3343_v47 }
 0xf8b   :  { %1276 = vrot.lane.b32.xlu1 %v2976_v26, %s3603_s2 }
 0xf8c   :  { %3346 = vrcp.f32 %v1323_v29 }
 0xf91   :  { %v3345_v9 = vpop.eup %3344 }
 0xf92   :  { %v1299_v53 = vmul.f32 2.0, %v3345_v9  ;;  %v1301_v33 = vmul.f32 %v3345_v9, %v3985_v19 }
 0xf94   :  { %v2978_v1 = vadd.f32 -1.0, %v1299_v53 }
 0xf96   :  { %v3347_v30 = vpop.eup %3346  ;;  %1303 = vrot.lane.b32.xlu1 %v2978_v1, %s3603_s2 }
 0xf97   :  { %v1326_v31 = vmul.f32 2.0, %v3347_v30  ;;  %v1328_v34 = vmul.f32 %v3347_v30, %v3990_v23 }
 0xf99   :  { %v2980_v36 = vadd.f32 -1.0, %v1326_v31 }
 0xf9b   :  { %1330 = vrot.lane.b32.xlu0 %v2980_v36, %s3603_s2 }
 0xffd   :  { %v1277_v37 = vpop.permute.xlu1 %1276 }
 0xffe   :  { %v1279_v39 = vmul.f32 %v3341_v41, %v1277_v37 }
0x1000   :  { %1281 = vrot.lane.b32.xlu1 %v1279_v39, %s3609_s5 }
0x1008   :  { %v1304_v40 = vpop.permute.xlu1 %1303 }
0x1009   :  { %v1306_v49 = vmul.f32 %v3345_v9, %v1304_v40 }
0x100b   :  { %1308 = vrot.lane.b32.xlu0 %v1306_v49, %s3609_s5 }
0x100d   :  { %v1331_v52 = vpop.permute.xlu0 %1330 }
0x100e   :  { %v1333_v56 = vmul.f32 %v3347_v30, %v1331_v52 }
0x1010   :  { %1335 = vrot.lane.b32.xlu1 %v1333_v56, %s3609_s5 }
0x1072   :  { %v1282_v60 = vpop.permute.xlu1 %1281 }
0x1073   :  { %v4038_v55 = vadd.f32 %v1282_v60, %v1274_v54 }
0x1075   :  { %3348 = vtanh.f32 %v4038_v55 }
0x107d   :  { %v1309_v57 = vpop.permute.xlu0 %1308 }
0x107e   :  { %v4042_v63 = vadd.f32 %v1309_v57, %v1301_v33 }
0x107f   :  { %v3349_v58 = vpop.eup %3348 }
0x1080   :  { %3350 = vtanh.f32 %v4042_v63  ;;  %1287 = vrot.lane.b32.xlu0 %v3349_v58, %s3603_s2 }
0x1082   :  { %v1336_v61 = vpop.permute.xlu1 %1335 }
0x1083   :  { %v4047_v62 = vadd.f32 %v1336_v61, %v1328_v34 }
0x1085   :  { %3352 = vtanh.f32 %v4047_v62 }
0x108a   :  { %v3351_v17 = vpop.eup %3350 }
0x108b   :  { %1314 = vrot.lane.b32.xlu1 %v3351_v17, %s3603_s2 }
0x108f   :  { %v3353_v35 = vpop.eup %3352 }
0x1090   :  { %1341 = vrot.lane.b32.xlu0 %v3353_v35, %s3603_s2 }
0x10f2   :  { %v1288_v19 = vpop.permute.xlu0 %1287 }
0x10f3   :  { %v1290_v6 = vmul.f32 %v3341_v41, %v1288_v19 }
0x10f5   :  { %v1345_v24 = vpack.c.bf16 %v1290_v6, %v1290_v6 }
0x10f7   :  { %1347 = vrot.lane.b32.xlu1 %v1345_v24, %s3609_s5 }
0x10fd   :  { %v1315_v27 = vpop.permute.xlu1 %1314 }
0x10fe   :  { %v1317_v23 = vmul.f32 %v3345_v9, %v1315_v27 }
0x1100   :  { %v1393_v15 = vpack.c.bf16 %v1317_v23, %v1317_v23 }
0x1102   :  { %1395 = vrot.lane.b32.xlu0 %v1393_v15, %s3609_s5  ;;  %v1342_v4 = vpop.permute.xlu0 %1341 }
0x1103   :  { %v1344_v2 = vmul.f32 %v3347_v30, %v1342_v4 }
0x1105   :  { %v1441_v3 = vpack.c.bf16 %v1344_v2, %v1344_v2 }
0x1106   :  { %170 = vperm.xlu0 %3176, %v3997_v38  }
0x1107   :  { %1443 = vrot.lane.b32.xlu1 %v1441_v3, %s3609_s5 }
0x1169   :  { %v1348_v16 = vpop.permute.xlu1 %1347 }
0x116a   :  { %2981 = vmatmul.mubr.msk.bf16.vlgmr.msra.gmra.mrb[28].mxu1 %vm201_vm0, %v1348_v16 }
0x116b   :  { %1449 = vmatpush1.bf16.msra.mxu1 %v3847_v42  ;;  %1480 = vmatprep.mubr.bf16.mxu1 %v3608_v0 }
0x116c   :  { %1450 = vmatprep.subr.bf16.mxu1 %v3849_v43  ;;  %v4070_v43 = vld [vmem:[#allocation7 + $0x20] ss:$8 sps:$4 sm:$0xff]  }
0x116f   :  { %1451 = vmatpush1.bf16.msra.mxu1 %v3853_v45  ;;  %v4074_v45 = vld [vmem:[#allocation7 + $0x34] ss:$8 sps:$4 sm:$0xff]  }
0x1170   :  { %1623 = vmatprep.subr.bf16.mxu1 %v4061_v18 }
0x1174   :  { %v1396_v5 = vpop.permute.xlu0 %1395 }
0x1175   :  { %2982 = vmatmul.mubr.msk.bf16.vlgmr.msra.gmra.mrb[32].mxu0 %vm201_vm0, %v1396_v5 }
0x1176   :  { %1576 = vmatpush1.bf16.msra.mxu0 %v4008_v44  ;;  %1607 = vmatprep.mubr.bf16.mxu0 %v3608_v0 }
0x1177   :  { %1577 = vmatprep.subr.bf16.mxu0 %v4012_v46 }
0x1179   :  { %v1444_v42 = vpop.permute.xlu1 %1443 }
0x117a   :  { %2983 = vmatmul.mubr.msk.bf16.vlgmr.msra.gmra.mrb[32].mxu1 %vm201_vm0, %v1444_v42  ;;  %1578 = vmatpush1.bf16.msra.mxu0 %v4016_v50 }
0x117b   :  { %1624 = vmatpush1.bf16.msra.mxu1 %v4070_v43  ;;  %1671 = vmatprep.subr.bf16.mxu0 %v3839_v28 }
0x117c   :  { %1625 = vmatprep.subr.bf16.mxu1 %v4074_v45  ;;  %1655 = vmatprep.mubr.bf16.mxu1 %v3608_v0 }
0x117f   :  { %1626 = vmatpush1.bf16.msra.mxu1 %v4078_v20 }
0x1180   :  { %1798 = vmatprep.subr.bf16.mxu1 %v4024_v32 }
0x1185   :  { %v171_v21 = vpop.permute.xlu0 %170 }
0x1186   :  { %v173_v22 = vmul.f32 %v171_v21, %v3775_v10 }
0x1188   :  { %v174_v41 = vadd.f32 %v173_v22, %v3783_v14 }
0x123d   :  { %v1386_v25 = vpop.f32.mrb[28].mxu1 }
0x123e   :  { %v1488_v47 = vadd.f32 %v1386_v25, %v174_v41  ;;  %v1388_v28 = vpop.f32.mrb[29].mxu1 }
0x123f   :  { %v1390_v26 = vpop.f32.mrb[30].mxu1 }
0x1240   :  { %v2984_v29 = vmul.f32 -1.442695, %v1488_v47  ;;  %v1391_v9 = vpop.f32.mrb[31].mxu1 }
0x1242   :  { %3354 = vpow2.f32 %v2984_v29 }
0x1248   :  { %v1434_v53 = vpop.f32.mrb[32].mxu0 }
0x1249   :  { %v1514_v1 = vadd.f32 %v1434_v53, %v1388_v28  ;;  %v1436_v30 = vpop.f32.mrb[33].mxu0 }
0x124a   :  { %v1438_v31 = vpop.f32.mrb[34].mxu0 }
0x124b   :  { %v1515_v36 = vadd.f32 %v1514_v1, %v3825_v51  ;;  %v1439_v37 = vpop.f32.mrb[35].mxu0 }
0x124c   :  { %v3355_v32 = vpop.eup %3354  ;;  %v3616_v37 = vmov 7  }
0x124d   :  { %v1492_v39 = vadd.f32 1.0, %v3355_v32  ;;  %v2986_v40 = vmul.f32 -1.442695, %v1515_v36  ;;  %v1482_v49 = vpop.f32.mrb[32].mxu1  ;;  %3177 = vset.pattern.permute.xlu0 %v3616_v37 }
0x124e   :  { %v1541_v52 = vadd.f32 %v1482_v49, %v1436_v30  ;;  %v1484_v56 = vpop.f32.mrb[33].mxu1 }
0x124f   :  { %3356 = vrcp.f32 %v1492_v39  ;;  %v1485_v54 = vpop.f32.mrb[34].mxu1 }
0x1250   :  { %3358 = vpow2.f32 %v2986_v40  ;;  %v1542_v60 = vadd.f32 %v1541_v52, %v3878_v12  ;;  %v1486_v33 = vpop.f32.mrb[35].mxu1  ;;  %v4112_v54 = vld [vmem:[#allocation7 + $0x40] ss:$8 sps:$4 sm:$0xff]  }
0x1251   :  { %v4119_v33 = vld [vmem:[#allocation7 + $0x50] ss:$8 sps:$4 sm:$0xff]  }
0x1252   :  { %v2988_v57 = vmul.f32 -1.442695, %v1542_v60  ;;  %v4116_v60 = vld [vmem:[#allocation7 + $0x54] ss:$8 sps:$4 sm:$0xff]  }
0x1254   :  { %3360 = vpow2.f32 %v2988_v57 }
0x1259   :  { %v3357_v58 = vpop.eup %3356 }
0x125a   :  { %v3359_v34 = vpop.eup %3358  ;;  %v1495_v61 = vmul.f32 2.0, %v3357_v58  ;;  %v1497_v22 = vmul.f32 %v3357_v58, %v4038_v55 }
0x125b   :  { %v1519_v17 = vadd.f32 1.0, %v3359_v34 }
0x125c   :  { %v2985_v35 = vadd.f32 -1.0, %v1495_v61 }
0x125d   :  { %3362 = vrcp.f32 %v1519_v17 }
0x125e   :  { %v3361_v19 = vpop.eup %3360  ;;  %1499 = vrot.lane.b32.xlu1 %v2985_v35, %s3603_s2 }
0x125f   :  { %v1546_v6 = vadd.f32 1.0, %v3361_v19 }
0x1261   :  { %3364 = vrcp.f32 %v1546_v6 }
0x1267   :  { %v3363_v24 = vpop.eup %3362 }
0x1268   :  { %v1522_v13 = vmul.f32 2.0, %v3363_v24  ;;  %v1524_v28 = vmul.f32 %v3363_v24, %v4042_v63 }
0x126a   :  { %v2987_v27 = vadd.f32 -1.0, %v1522_v13 }
0x126b   :  { %v3365_v23 = vpop.eup %3364 }
0x126c   :  { %1526 = vrot.lane.b32.xlu1 %v2987_v27, %s3603_s2  ;;  %v1549_v15 = vmul.f32 2.0, %v3365_v23  ;;  %v1551_v9 = vmul.f32 %v3365_v23, %v4047_v62 }
0x126e   :  { %v2989_v4 = vadd.f32 -1.0, %v1549_v15 }
0x1270   :  { %1553 = vrot.lane.b32.xlu0 %v2989_v4, %s3603_s2 }
0x12d0   :  { %v1500_v2 = vpop.permute.xlu1 %1499 }
0x12d1   :  { %v1502_v3 = vmul.f32 %v3357_v58, %v1500_v2 }
0x12d3   :  { %1504 = vrot.lane.b32.xlu1 %v1502_v3, %s3609_s5 }
0x12de   :  { %v1527_v16 = vpop.permute.xlu1 %1526 }
0x12df   :  { %v1529_v5 = vmul.f32 %v3363_v24, %v1527_v16 }
0x12e1   :  { %1531 = vrot.lane.b32.xlu0 %v1529_v5, %s3609_s5 }
0x12e2   :  { %v1554_v42 = vpop.permute.xlu0 %1553 }
0x12e3   :  { %v1556_v21 = vmul.f32 %v3365_v23, %v1554_v42 }
0x12e5   :  { %1558 = vrot.lane.b32.xlu1 %v1556_v21, %s3609_s5 }
0x1345   :  { %v1505_v41 = vpop.permute.xlu1 %1504 }
0x1346   :  { %v4093_v25 = vadd.f32 %v1505_v41, %v1497_v22 }
0x1348   :  { %3366 = vtanh.f32 %v4093_v25 }
0x1352   :  { %v3367_v47 = vpop.eup %3366 }
0x1353   :  { %v1532_v26 = vpop.permute.xlu0 %1531  ;;  %1510 = vrot.lane.b32.xlu0 %v3367_v47, %s3603_s2 }
0x1354   :  { %v4098_v29 = vadd.f32 %v1532_v26, %v1524_v28 }
0x1356   :  { %3368 = vtanh.f32 %v4098_v29 }
0x1357   :  { %v1559_v53 = vpop.permute.xlu1 %1558 }
0x1358   :  { %v4102_v1 = vadd.f32 %v1559_v53, %v1551_v9 }
0x135a   :  { %3370 = vtanh.f32 %v4102_v1 }
0x1360   :  { %v3369_v55 = vpop.eup %3368 }
0x1361   :  { %1537 = vrot.lane.b32.xlu1 %v3369_v55, %s3603_s2 }
0x1364   :  { %v3371_v30 = vpop.eup %3370 }
0x1365   :  { %1564 = vrot.lane.b32.xlu0 %v3371_v30, %s3603_s2 }
0x13c5   :  { %v1511_v63 = vpop.permute.xlu0 %1510 }
0x13c6   :  { %v1513_v31 = vmul.f32 %v3357_v58, %v1511_v63  ;;  %v4131_v58 = vld [vmem:[#allocation7 + $0x44] ss:$8 sps:$4 sm:$0xff]  }
0x13c8   :  { %v1568_v36 = vpack.c.bf16 %v1513_v31, %v1513_v31 }
0x13ca   :  { %1570 = vrot.lane.b32.xlu1 %v1568_v36, %s3609_s5 }
0x13d3   :  { %v1538_v32 = vpop.permute.xlu1 %1537 }
0x13d4   :  { %v1540_v62 = vmul.f32 %v3363_v24, %v1538_v32 }
0x13d6   :  { %v1616_v39 = vpack.c.bf16 %v1540_v62, %v1540_v62 }
0x13d7   :  { %v1565_v40 = vpop.permute.xlu0 %1564 }
0x13d8   :  { %1618 = vrot.lane.b32.xlu0 %v1616_v39, %s3609_s5  ;;  %v1567_v49 = vmul.f32 %v3365_v23, %v1565_v40 }
0x13da   :  { %v1664_v52 = vpack.c.bf16 %v1567_v49, %v1567_v49 }
0x13dc   :  { %1666 = vrot.lane.b32.xlu1 %v1664_v52, %s3609_s5  ;;  %176 = vperm.xlu0 %3177, %v3997_v38  }
0x143c   :  { %v1571_v56 = vpop.permute.xlu1 %1570 }
0x143d   :  { %2990 = vmatmul.mubr.msk.bf16.vlgmr.msra.gmra.mrb[36].mxu0 %vm201_vm0, %v1571_v56 }
0x143e   :  { %1672 = vmatpush1.bf16.msra.mxu0 %v4112_v54  ;;  %1703 = vmatprep.mubr.bf16.mxu0 %v3608_v0 }
0x143f   :  { %1673 = vmatprep.subr.bf16.mxu0 %v4116_v60 }
0x1442   :  { %1674 = vmatpush1.bf16.msra.mxu0 %v4119_v33 }
0x1443   :  { %1845 = vmatprep.subr.bf16.mxu0 %v4061_v18 }
0x144a   :  { %v1619_v38 = vpop.permute.xlu0 %1618 }
0x144b   :  { %2991 = vmatmul.mubr.msk.bf16.vlgmr.msra.gmra.mrb[36].mxu1 %vm201_vm0, %v1619_v38 }
0x144c   :  { %1799 = vmatpush1.bf16.msra.mxu1 %v4008_v44  ;;  %1830 = vmatprep.mubr.bf16.mxu1 %v3608_v0 }
0x144d   :  { %1800 = vmatprep.subr.bf16.mxu1 %v4012_v46 }
0x144e   :  { %v1667_v57 = vpop.permute.xlu1 %1666 }
0x144f   :  { %2992 = vmatmul.mubr.msk.bf16.vlgmr.msra.gmra.mrb[40].mxu0 %vm201_vm0, %v1667_v57 }
0x1450   :  { %1801 = vmatpush1.bf16.msra.mxu1 %v4016_v50  ;;  %1846 = vmatpush1.bf16.msra.mxu0 %v4070_v43 }
0x1451   :  { %1847 = vmatprep.subr.bf16.mxu0 %v4074_v45  ;;  %1893 = vmatprep.subr.bf16.mxu1 %v4131_v58 }
0x1452   :  { %1877 = vmatprep.mubr.bf16.mxu0 %v3608_v0 }
0x1454   :  { %1848 = vmatpush1.bf16.msra.mxu0 %v4078_v20 }
0x1455   :  { %1994 = vmatprep.subr.bf16.mxu0 %v4061_v18 }
0x145b   :  { %v177_v44 = vpop.permute.xlu0 %176 }
0x145c   :  { %v179_v46 = vmul.f32 %v177_v44, %v3775_v10 }
0x145e   :  { %v180_v34 = vadd.f32 %v179_v46, %v3783_v14 }
0x1510   :  { %v1609_v50 = vpop.f32.mrb[36].mxu0 }
0x1511   :  { %v1711_v61 = vadd.f32 %v1609_v50, %v180_v34  ;;  %v1611_v17 = vpop.f32.mrb[37].mxu0 }
0x1512   :  { %v1613_v35 = vpop.f32.mrb[38].mxu0 }
0x1513   :  { %v2993_v19 = vmul.f32 -1.442695, %v1711_v61  ;;  %v1614_v6 = vpop.f32.mrb[39].mxu0 }
0x1515   :  { %3372 = vpow2.f32 %v2993_v19 }
0x151e   :  { %v1657_v24 = vpop.f32.mrb[36].mxu1 }
0x151f   :  { %v3373_v13 = vpop.eup %3372  ;;  %v1737_v27 = vadd.f32 %v1657_v24, %v1611_v17  ;;  %v1659_v23 = vpop.f32.mrb[37].mxu1 }
0x1520   :  { %v1715_v15 = vadd.f32 1.0, %v3373_v13  ;;  %v1661_v4 = vpop.f32.mrb[38].mxu1 }
0x1521   :  { %v1738_v18 = vadd.f32 %v1737_v27, %v3825_v51  ;;  %v1662_v2 = vpop.f32.mrb[39].mxu1 }
0x1522   :  { %3374 = vrcp.f32 %v1715_v15  ;;  %v1705_v10 = vpop.f32.mrb[40].mxu0 }
0x1523   :  { %v2995_v3 = vmul.f32 -1.442695, %v1738_v18  ;;  %v1764_v14 = vadd.f32 %v1705_v10, %v1659_v23  ;;  %v1707_v16 = vpop.f32.mrb[41].mxu0 }
0x1524   :  { %v1708_v5 = vpop.f32.mrb[42].mxu0 }
0x1525   :  { %3376 = vpow2.f32 %v2995_v3  ;;  %v1765_v42 = vadd.f32 %v1764_v14, %v3878_v12  ;;  %v1709_v21 = vpop.f32.mrb[43].mxu0 }
0x1527   :  { %v2997_v22 = vmul.f32 -1.442695, %v1765_v42 }
0x1529   :  { %3378 = vpow2.f32 %v2997_v22 }
0x152c   :  { %v3375_v41 = vpop.eup %3374 }
0x152d   :  { %v1718_v47 = vmul.f32 2.0, %v3375_v41  ;;  %v1720_v38 = vmul.f32 %v3375_v41, %v4093_v25 }
0x152f   :  { %v3377_v28 = vpop.eup %3376  ;;  %v2994_v26 = vadd.f32 -1.0, %v1718_v47 }
0x1530   :  { %v1742_v9 = vadd.f32 1.0, %v3377_v28 }
0x1531   :  { %1722 = vrot.lane.b32.xlu1 %v2994_v26, %s3603_s2 }
0x1532   :  { %3380 = vrcp.f32 %v1742_v9 }
0x1533   :  { %v3379_v53 = vpop.eup %3378 }
0x1534   :  { %v1769_v55 = vadd.f32 1.0, %v3379_v53 }
0x1536   :  { %3382 = vrcp.f32 %v1769_v55 }
0x153c   :  { %v3381_v30 = vpop.eup %3380 }
0x153d   :  { %v1745_v63 = vmul.f32 2.0, %v3381_v30  ;;  %v1747_v34 = vmul.f32 %v3381_v30, %v4098_v29 }
0x153f   :  { %v2996_v31 = vadd.f32 -1.0, %v1745_v63 }
0x1540   :  { %v3383_v36 = vpop.eup %3382 }
0x1541   :  { %1749 = vrot.lane.b32.xlu1 %v2996_v31, %s3603_s2  ;;  %v1772_v37 = vmul.f32 2.0, %v3383_v36  ;;  %v1774_v17 = vmul.f32 %v3383_v36, %v4102_v1 }
0x1543   :  { %v2998_v32 = vadd.f32 -1.0, %v1772_v37 }
0x1545   :  { %1776 = vrot.lane.b32.xlu0 %v2998_v32, %s3603_s2 }
0x15a3   :  { %v1723_v62 = vpop.permute.xlu1 %1722 }
0x15a4   :  { %v1725_v39 = vmul.f32 %v3375_v41, %v1723_v62 }
0x15a6   :  { %1727 = vrot.lane.b32.xlu1 %v1725_v39, %s3609_s5 }
0x15b3   :  { %v1750_v40 = vpop.permute.xlu1 %1749 }
0x15b4   :  { %v1752_v49 = vmul.f32 %v3381_v30, %v1750_v40 }
0x15b6   :  { %1754 = vrot.lane.b32.xlu0 %v1752_v49, %s3609_s5 }
0x15b7   :  { %v1777_v52 = vpop.permute.xlu0 %1776 }
0x15b8   :  { %v1779_v56 = vmul.f32 %v3383_v36, %v1777_v52 }
0x15ba   :  { %1781 = vrot.lane.b32.xlu1 %v1779_v56, %s3609_s5 }
0x1618   :  { %v1728_v57 = vpop.permute.xlu1 %1727 }
0x1619   :  { %v1730_v44 = vadd.f32 %v1728_v57, %v1720_v38 }
0x161b   :  { %3384 = vtanh.f32 %v1730_v44 }
0x1625   :  { %v3385_v46 = vpop.eup %3384 }
0x1626   :  { %1733 = vrot.lane.b32.xlu0 %v3385_v46, %s3603_s2 }
0x1628   :  { %v1755_v50 = vpop.permute.xlu0 %1754 }
0x1629   :  { %v4150_v61 = vadd.f32 %v1755_v50, %v1747_v34 }
0x162b   :  { %3386 = vtanh.f32 %v4150_v61 }
0x162c   :  { %v1782_v35 = vpop.permute.xlu1 %1781 }
0x162d   :  { %v4154_v19 = vadd.f32 %v1782_v35, %v1774_v17 }
0x162f   :  { %3388 = vtanh.f32 %v4154_v19 }
0x1635   :  { %v3387_v25 = vpop.eup %3386 }
0x1636   :  { %1760 = vrot.lane.b32.xlu1 %v3387_v25, %s3603_s2 }
0x1639   :  { %v3389_v6 = vpop.eup %3388 }
0x163a   :  { %1787 = vrot.lane.b32.xlu0 %v3389_v6, %s3603_s2 }
0x1698   :  { %v1734_v24 = vpop.permute.xlu0 %1733 }
0x1699   :  { %v1736_v29 = vmul.f32 %v3375_v41, %v1734_v24 }
0x169b   :  { %v1791_v13 = vpack.c.bf16 %v1736_v29, %v1736_v29 }
0x169d   :  { %1793 = vrot.lane.b32.xlu1 %v1791_v13, %s3609_s5 }
0x16a8   :  { %v1761_v27 = vpop.permute.xlu1 %1760 }
0x16a9   :  { %v1763_v23 = vmul.f32 %v3381_v30, %v1761_v27 }
0x16ab   :  { %v1838_v15 = vpack.c.bf16 %v1763_v23, %v1763_v23 }
0x16ac   :  { %v1788_v1 = vpop.permute.xlu0 %1787 }
0x16ad   :  { %1840 = vrot.lane.b32.xlu0 %v1838_v15, %s3609_s5  ;;  %v1790_v4 = vmul.f32 %v3383_v36, %v1788_v1 }
0x16af   :  { %v1886_v18 = vpack.c.bf16 %v1790_v4, %v1790_v4 }
0x16b1   :  { %1888 = vrot.lane.b32.xlu1 %v1886_v18, %s3609_s5 }
0x170f   :  { %v1794_v2 = vpop.permute.xlu1 %1793 }
0x1710   :  { %2999 = vmatmul.mubr.msk.bf16.vlgmr.msra.gmra.mrb[40].mxu1 %vm201_vm0, %v1794_v2 }
0x1711   :  { %1894 = vmatpush1.bf16.msra.mxu1 %v4112_v54  ;;  %1925 = vmatprep.mubr.bf16.mxu1 %v3608_v0 }
0x1712   :  { %1895 = vmatprep.subr.bf16.mxu1 %v4116_v60 }
0x1715   :  { %1896 = vmatpush1.bf16.msra.mxu1 %v4119_v33 }
0x1716   :  { %2041 = vmatprep.subr.bf16.mxu1 %v4131_v58 }
0x171f   :  { %v1841_v10 = vpop.permute.xlu0 %1840 }
0x1720   :  { %3000 = vmatmul.mubr.msk.bf16.vlgmr.msra.gmra.mrb[44].mxu0 %vm201_vm0, %v1841_v10 }
0x1721   :  { %1995 = vmatpush1.bf16.msra.mxu0 %v4070_v43  ;;  %2026 = vmatprep.mubr.bf16.mxu0 %v3608_v0 }
0x1722   :  { %1996 = vmatprep.subr.bf16.mxu0 %v4074_v45 }
0x1723   :  { %v1889_v3 = vpop.permute.xlu1 %1888 }
0x1724   :  { %3001 = vmatmul.mubr.msk.bf16.vlgmr.msra.gmra.mrb[44].mxu1 %vm201_vm0, %v1889_v3 }
0x1725   :  { %1997 = vmatpush1.bf16.msra.mxu0 %v4078_v20  ;;  %2042 = vmatpush1.bf16.msra.mxu1 %v4112_v54 }
0x1726   :  { %2043 = vmatprep.subr.bf16.mxu1 %v4116_v60  ;;  %2073 = vmatprep.mubr.bf16.mxu1 %v3608_v0 }
0x1729   :  { %2044 = vmatpush1.bf16.msra.mxu1 %v4119_v33 }
0x17e3   :  { %v1832_v58 = vpop.f32.mrb[40].mxu1 }
0x17e4   :  { %v1833_v14 = vpop.f32.mrb[41].mxu1 }
0x17e5   :  { %v1835_v43 = vpop.f32.mrb[42].mxu1 }
0x17e6   :  { %v1836_v16 = vpop.f32.mrb[43].mxu1 }
0x17f3   :  { %v1879_v5 = vpop.f32.mrb[44].mxu0 }
0x17f4   :  { %v1933_v42 = vadd.f32 %v1879_v5, %v1833_v14  ;;  %v1881_v45 = vpop.f32.mrb[45].mxu0 }
0x17f5   :  { %v1883_v21 = vpop.f32.mrb[46].mxu0 }
0x17f6   :  { %v1934_v22 = vadd.f32 %v1933_v42, %v3825_v51  ;;  %v1884_v41 = vpop.f32.mrb[47].mxu0 }
0x17f7   :  { %v1927_v20 = vpop.f32.mrb[44].mxu1 }
0x17f8   :  { %v3002_v47 = vmul.f32 -1.442695, %v1934_v22  ;;  %v1960_v54 = vadd.f32 %v1927_v20, %v1881_v45  ;;  %v1929_v28 = vpop.f32.mrb[45].mxu1 }
0x17f9   :  { %v1930_v60 = vpop.f32.mrb[46].mxu1 }
0x17fa   :  { %3390 = vpow2.f32 %v3002_v47  ;;  %v1961_v26 = vadd.f32 %v1960_v54, %v3878_v12  ;;  %v1931_v33 = vpop.f32.mrb[47].mxu1 }
0x17fb   :  { %v2132_v33 = vsub.s32 4, %v3766_v7 }
0x17fc   :  { %v3004_v9 = vmul.f32 -1.442695, %v1961_v26 }
0x17fe   :  { %3392 = vpow2.f32 %v3004_v9  ;;  %v4199_v9 = vld [vmem:[#allocation8] sm:$0xff] }
0x1804   :  { %v3391_v53 = vpop.eup %3390 }
0x1805   :  { %v1938_v55 = vadd.f32 1.0, %v3391_v53  ;;  %v2133_v53 = vrot.slane %v4199_v9, %v2132_v33 }
0x1807   :  { %3394 = vrcp.f32 %v1938_v55 }
0x1808   :  { %v3393_v30 = vpop.eup %3392 }
0x1809   :  { %v1965_v63 = vadd.f32 1.0, %v3393_v30 }
0x180b   :  { %3396 = vrcp.f32 %v1965_v63 }
0x1811   :  { %v3395_v31 = vpop.eup %3394 }
0x1812   :  { %v1941_v51 = vmul.f32 2.0, %v3395_v31  ;;  %v1943_v56 = vmul.f32 %v3395_v31, %v4150_v61 }
0x1814   :  { %v3003_v36 = vadd.f32 -1.0, %v1941_v51 }
0x1815   :  { %v3397_v37 = vpop.eup %3396 }
0x1816   :  { %1945 = vrot.lane.b32.xlu0 %v3003_v36, %s3603_s2  ;;  %v1968_v32 = vmul.f32 2.0, %v3397_v37  ;;  %v1970_v44 = vmul.f32 %v3397_v37, %v4154_v19 }
0x1818   :  { %v3005_v62 = vadd.f32 -1.0, %v1968_v32 }
0x181a   :  { %1972 = vrot.lane.b32.xlu1 %v3005_v62, %s3603_s2  ;;  %v3196_v62 = vld [vmem:[#allocation10] sm:$0xff]  }
0x1888   :  { %v1946_v39 = vpop.permute.xlu0 %1945 }
0x1889   :  { %v1948_v40 = vmul.f32 %v3395_v31, %v1946_v39  ;;  %v3618_v39 = vmov 0.0  }
0x188a   :  { %3089 = vmatprep.subr.bf16.mxu0 %v3618_v39  ;;  %3097 = vmatprep.subr.bf16.mxu1 %v3618_v39 }
0x188b   :  { %1950 = vrot.lane.b32.xlu0 %v1948_v40, %s3609_s5  ;;  %v3197_v40 = vld [vmem:[#allocation10 + $0x8] sm:$0xff]  }
0x188c   :  { %v1973_v49 = vpop.permute.xlu1 %1972 }
0x188d   :  { %v1975_v52 = vmul.f32 %v3397_v37, %v1973_v49 }
0x188f   :  { %1977 = vrot.lane.b32.xlu1 %v1975_v52, %s3609_s5 }
0x18fd   :  { %v1951_v38 = vpop.permute.xlu0 %1950 }
0x18fe   :  { %v1953_v57 = vadd.f32 %v1951_v38, %v1943_v56  ;;  %v3198_v38 = vld [vmem:[#allocation10 + $0x10] sm:$0xff]  }
0x1900   :  { %3398 = vtanh.f32 %v1953_v57  ;;  %v3199_v57 = vld [vmem:[#allocation10 + $0x18] sm:$0xff]  }
0x1901   :  { %v1978_v46 = vpop.permute.xlu1 %1977 }
0x1902   :  { %v1980_v34 = vadd.f32 %v1978_v46, %v1970_v44 }
0x1904   :  { %3400 = vtanh.f32 %v1980_v34 }
0x190a   :  { %v3399_v50 = vpop.eup %3398 }
0x190b   :  { %1956 = vrot.lane.b32.xlu0 %v3399_v50, %s3603_s2 }
0x190e   :  { %v3401_v17 = vpop.eup %3400 }
0x190f   :  { %1983 = vrot.lane.b32.xlu1 %v3401_v17, %s3603_s2  ;;  %v3200_v17 = vld [vmem:[#allocation10 + $0x20] sm:$0xff]  }
0x197d   :  { %v1957_v35 = vpop.permute.xlu0 %1956 }
0x197e   :  { %v1959_v25 = vmul.f32 %v3395_v31, %v1957_v35 }
0x1980   :  { %v1987_v6 = vpack.c.bf16 %v1959_v25, %v1959_v25 }
0x1981   :  { %v1984_v24 = vpop.permute.xlu1 %1983 }
0x1982   :  { %1989 = vrot.lane.b32.xlu0 %v1987_v6, %s3609_s5  ;;  %v1986_v61 = vmul.f32 %v3397_v37, %v1984_v24  ;;  %v2141_v37 = vsub.s32 5, %v3766_v7  ;;  %v3201_v6 = vld [vmem:[#allocation10 + $0x28] sm:$0xff]  }
0x1984   :  { %v2034_v29 = vpack.c.bf16 %v1986_v61, %v1986_v61  ;;  %v2142_v32 = vrot.slane %v4199_v9, %v2141_v37  ;;  %v3202_v61 = vld [vmem:[#allocation10 + $0x30] sm:$0xff]  }
0x1986   :  { %2036 = vrot.lane.b32.xlu1 %v2034_v29, %s3609_s5  ;;  %v3203_v29 = vld [vmem:[#allocation10 + $0x38] sm:$0xff]  }
0x19f4   :  { %v1990_v19 = vpop.permute.xlu0 %1989 }
0x19f5   :  { %3006 = vmatmul.mubr.msk.bf16.vlgmr.msra.gmra.mrb[48].mxu0 %vm201_vm0, %v1990_v19 }
0x19f6   :  { %3093 = vmatprep.mubr.msk.bf16.mxu0 %vm3619_vm1, %v3618_v39  ;;  %3090 = vmatpush3.bf16.msra.mxu0 %v3196_v62 }
0x19f7   :  { %3091 = vmatprep.subr.bf16.mxu0 %v3618_v39 }
0x19f8   :  { %v2037_v13 = vpop.permute.xlu1 %2036 }
0x19f9   :  { %3007 = vmatmul.mubr.msk.bf16.vlgmr.msra.gmra.mrb[48].mxu1 %vm201_vm0, %v2037_v13  ;;  %v3204_v13 = vld [vmem:[#allocation10 + $0x40] sm:$0xff]  }
0x19fa   :  { %3113 = vmatprep.mubr.msk.bf16.mxu1 %vm3619_vm1, %v3618_v39  ;;  %3092 = vmatpush3.bf16.msra.mxu0 %v3197_v40 }
0x19fb   :  { %3117 = vmatprep.subr.bf16.mxu0 %v3618_v39  ;;  %3098 = vmatpush3.bf16.msra.mxu1 %v3198_v38 }
0x19fc   :  { %3099 = vmatprep.subr.bf16.mxu1 %v3618_v39 }
0x19ff   :  { %3100 = vmatpush3.bf16.msra.mxu1 %v3199_v57 }
0x1a00   :  { %3101 = vmatprep.subr.bf16.mxu1 %v3618_v39 }
0x1a03   :  { %3102 = vmatpush3.bf16.msra.mxu1 %v3200_v17  ;;  %v3218_v17 = vld [vmem:[#allocation11 + $0x4] ss:$16 sps:$4 sm:$0xff]  }
0x1a04   :  { %3103 = vmatprep.subr.bf16.mxu1 %v3618_v39 }
0x1a07   :  { %3104 = vmatpush3.bf16.msra.mxu1 %v3201_v6 }
0x1a08   :  { %3105 = vmatprep.subr.bf16.mxu1 %v3618_v39 }
0x1a0b   :  { %3106 = vmatpush3.bf16.msra.mxu1 %v3202_v61  ;;  %v3222_v61 = vld [vmem:[#allocation11 + $0x20] ss:$16 sps:$4 sm:$0xff]  }
0x1a0c   :  { %3107 = vmatprep.subr.bf16.mxu1 %v3618_v39 }
0x1a0f   :  { %3108 = vmatpush3.bf16.msra.mxu1 %v3203_v29 }
0x1a10   :  { %3109 = vmatprep.subr.bf16.mxu1 %v3618_v39 }
0x1a13   :  { %3110 = vmatpush3.bf16.msra.mxu1 %v3204_v13 }
0x1a14   :  { %3111 = vmatprep.subr.bf16.mxu1 %v3618_v39 }
0x1ac8   :  { %v2028_v27 = vpop.f32.mrb[48].mxu0 }
0x1ac9   :  { %v2029_v23 = vpop.f32.mrb[49].mxu0  ;;  %v3205_v27 = vld [vmem:[#allocation10 + $0x48] sm:$0xff]  }
0x1aca   :  { %v2031_v15 = vpop.f32.mrb[50].mxu0  ;;  %3112 = vmatpush3.bf16.msra.mxu1 %v3205_v27 }
0x1acb   :  { %v2032_v1 = vpop.f32.mrb[51].mxu0  ;;  %3137 = vmatprep.subr.bf16.mxu1 %v3618_v39  ;;  %v3207_v15 = vld [vmem:[#allocation10 + $0x58] sm:$0xff]  }
0x1acc   :  { %v2075_v4 = vpop.f32.mrb[48].mxu1  ;;  %v3208_v1 = vld [vmem:[#allocation10 + $0x60] sm:$0xff]  }
0x1acd   :  { %v2081_v18 = vadd.f32 %v2075_v4, %v2029_v23  ;;  %v2077_v2 = vpop.f32.mrb[49].mxu1  ;;  %v3206_v23 = vld [vmem:[#allocation10 + $0x50] sm:$0xff]   ;;  %v3209_v4 = vld [vmem:[#allocation10 + $0x68] sm:$0xff]  }
0x1ace   :  { %v2078_v10 = vpop.f32.mrb[50].mxu1  ;;  %v3211_v2 = vld [vmem:[#allocation10 + $0x78] sm:$0xff]  }
0x1acf   :  { %v2082_v3 = vadd.f32 %v2081_v18, %v3878_v12  ;;  %v2079_v58 = vpop.f32.mrb[51].mxu1  ;;  %v3210_v18 = vld [vmem:[#allocation10 + $0x70] sm:$0xff]   ;;  %v2191_v10 = vsub.s32 6, %v3766_v7 }
0x1ad1   :  { %v3008_v14 = vmul.f32 -1.442695, %v2082_v3  ;;  %v2192_v3 = vrot.slane %v4199_v9, %v2191_v10 }
0x1ad3   :  { %3402 = vpow2.f32 %v3008_v14 }
0x1add   :  { %v3403_v43 = vpop.eup %3402 }
0x1ade   :  { %v2086_v16 = vadd.f32 1.0, %v3403_v43 }
0x1ae0   :  { %3404 = vrcp.f32 %v2086_v16 }
0x1aea   :  { %v3405_v5 = vpop.eup %3404 }
0x1aeb   :  { %v2089_v42 = vmul.f32 2.0, %v3405_v5  ;;  %v2091_v41 = vmul.f32 %v3405_v5, %v1980_v34 }
0x1aed   :  { %v3009_v45 = vadd.f32 -1.0, %v2089_v42 }
0x1aef   :  { %2093 = vrot.lane.b32.xlu0 %v3009_v45, %s3603_s2 }
0x1b61   :  { %v2094_v21 = vpop.permute.xlu0 %2093 }
0x1b62   :  { %v2096_v22 = vmul.f32 %v3405_v5, %v2094_v21  ;;  %v3212_v21 = vld [vmem:[#allocation10 + $0x80] sm:$0xff]  }
0x1b64   :  { %2098 = vrot.lane.b32.xlu1 %v2096_v22, %s3609_s5  ;;  %v3213_v22 = vld [vmem:[#allocation10 + $0x88] sm:$0xff]  }
0x1bd6   :  { %v2099_v20 = vpop.permute.xlu1 %2098 }
0x1bd7   :  { %v2101_v47 = vadd.f32 %v2099_v20, %v2091_v41  ;;  %v2442_v41 = vld [vmem:[#allocation5] sm:$0xff] }
0x1bd8   :  { %v2444_v20 = vsub.f32 1.0, %v2442_v41 }
0x1bd9   :  { %3406 = vtanh.f32 %v2101_v47 }
0x1be3   :  { %v3407_v12 = vpop.eup %3406 }
0x1be4   :  { %2104 = vrot.lane.b32.xlu0 %v3407_v12, %s3603_s2 }
0x1c56   :  { %v2105_v54 = vpop.permute.xlu0 %2104 }
0x1c57   :  { %v2107_v28 = vmul.f32 %v3405_v5, %v2105_v54  ;;  %v2255_v54 = vsub.s32 7, %v3766_v7 }
0x1c59   :  { %2109 = vrot.lane.b32.xlu1 %v2107_v28, %s3609_s5 }
0x1ccb   :  { %v2110_v60 = vpop.permute.xlu1 %2109 }
0x1ccc   :  { %v2112_v26 = vsel %vm201_vm0, %v2110_v60, 0.0 }
0x1ccd   :  { %2113 = vadd.xlane.f32.xlu0 %v2112_v26 }
0x1ce3   :  { %2135 = vrot.lane.b32.xlu0 %v2133_v53, %s3617_s16 }
0x1d5a   :  { %v2114_v55 = vpop.xlane.xlu0 %2113 }
0x1d5b   :  { %v2116_v30 = vmul.f32 0.03125, %v2114_v55 }
0x1d5d   :  { %v2117_v63 = vsub.f32 %v2107_v28, %v2116_v30  ;;  %v2256_v28 = vrot.slane %v4199_v9, %v2255_v54 }
0x1d5e   :  { %v2136_v46 = vpop.permute.xlu0 %2135 }
0x1d5f   :  { %v2118_v31 = vmul.f32 %v2117_v63, %v2117_v63 }
0x1d61   :  { %2120 = vrot.lane.b32.xlu1 %v2118_v31, %s3609_s5 }
0x1dd3   :  { %v2121_v51 = vpop.permute.xlu1 %2120 }
0x1dd4   :  { %v2123_v36 = vsel %vm201_vm0, %v2121_v51, 0.0  ;;  %v3214_v51 = vld [vmem:[#allocation10 + $0x90] sm:$0xff]  }
0x1dd5   :  { %2124 = vadd.xlane.f32.xlu1 %v2123_v36  ;;  %v4251_v36 = vld [vmem:[#allocation8 + $0x8] sm:$0xff] }
0x1de6   :  { %2144 = vrot.lane.b32.xlu1 %v2142_v32, %s3617_s16  ;;  %v2350_v32 = vrot.slane %v4251_v36, %v3769_v8 }
0x1e62   :  { %v2125_v49 = vpop.xlane.xlu1 %2124 }
0x1e63   :  { %v2126_v52 = vmul.f32 0.03125, %v2125_v49 }
0x1e65   :  { %v2127_v56 = vadd.f32 1e-05, %v2126_v52 }
0x1e66   :  { %v2145_v50 = vpop.permute.xlu1 %2144 }
0x1e67   :  { %3408 = vrsqrt.f32 %v2127_v56 }
0x1e68   :  { %3410 = vlog2.f32 %v2444_v20  ;;  %v3219_v20 = vld [vmem:[#allocation11 + $0x8] ss:$16 sps:$4 sm:$0xff]  }
0x1e71   :  { %v3409_v44 = vpop.eup %3408 }
0x1e72   :  { %v2129_v34 = vmul.f32 %v3409_v44, %v2117_v63  ;;  %v3411_v47 = vpop.eup %3410 }
0x1e73   :  { %v2446_v12 = vmul.f32 0.6931472, %v3411_v47 }
0x1e74   :  { %v2138_v35 = vmul.f32 %v2136_v46, %v2129_v34 }
0x1e76   :  { %v2147_v25 = vadd.f32 %v2145_v50, %v2138_v35  ;;  %v3216_v50 = vld [vmem:[#allocation11] ss:$16 sps:$4 sm:$0xff]   ;;  %v3221_v35 = vld [vmem:[#allocation11 + $0xc] ss:$16 sps:$4 sm:$0xff]  }
0x1e78   :  { %v2188_v24 = vpack.c.bf16 %v2147_v25, %v2147_v25  ;;  %v3224_v25 = vld [vmem:[#allocation11 + $0x24] ss:$16 sps:$4 sm:$0xff]  }
0x1e7a   :  { %2194 = vrot.lane.b32.xlu0 %v2188_v24, %s3609_s5 }
0x1e7e   :  { %2448 = vrot.lane.b32.xlu0 %v2446_v12, %s3609_s5  ;;  %v3227_v12 = vld [vmem:[#allocation11 + $0x2c] ss:$16 sps:$4 sm:$0xff]  }
0x1eec   :  { %v2195_v19 = vpop.permute.xlu0 %2194 }
0x1eed   :  { %3094 = vmatmul.mubr.msk.bf16.vlgmr.msra.gmra.mrb[52].mxu0 %vm201_vm0, %v2195_v19  ;;  %v3230_v19 = vld [vmem:[#allocation11 + $0x44] ss:$16 sps:$4 sm:$0xff]  }
0x1eee   :  { %3133 = vmatprep.mubr.msk.bf16.mxu0 %vm3619_vm1, %v3618_v39  ;;  %3118 = vmatpush3.bf16.msra.mxu0 %v3206_v23  ;;  %v3228_v23 = vld [vmem:[#allocation11 + $0x40] ss:$16 sps:$4 sm:$0xff]  }
0x1eef   :  { %3119 = vmatprep.subr.bf16.mxu0 %v3618_v39 }
0x1ef0   :  { %v2449_v38 = vpop.permute.xlu0 %2448 }
0x1ef2   :  { %3120 = vmatpush3.bf16.msra.mxu0 %v3207_v15 }
0x1ef3   :  { %3121 = vmatprep.subr.bf16.mxu0 %v3618_v39 }
0x1ef6   :  { %3122 = vmatpush3.bf16.msra.mxu0 %v3208_v1  ;;  %v3236_v1 = vld [vmem:[#allocation11 + $0x64] ss:$16 sps:$4 sm:$0xff]  }
0x1ef7   :  { %3123 = vmatprep.subr.bf16.mxu0 %v3618_v39 }
0x1efa   :  { %3124 = vmatpush3.bf16.msra.mxu0 %v3209_v4  ;;  %v3234_v4 = vld [vmem:[#allocation11 + $0x60] ss:$16 sps:$4 sm:$0xff]  }
0x1efb   :  { %3125 = vmatprep.subr.bf16.mxu0 %v3618_v39 }
0x1efe   :  { %3126 = vmatpush3.bf16.msra.mxu0 %v3210_v18  ;;  %v3242_v18 = vld [vmem:[#allocation11 + $0x84] ss:$16 sps:$4 sm:$0xff]  }
0x1eff   :  { %3127 = vmatprep.subr.bf16.mxu0 %v3618_v39 }
0x1f02   :  { %3128 = vmatpush3.bf16.msra.mxu0 %v3211_v2  ;;  %v3240_v2 = vld [vmem:[#allocation11 + $0x80] ss:$16 sps:$4 sm:$0xff]  }
0x1f03   :  { %3129 = vmatprep.subr.bf16.mxu0 %v3618_v39 }
0x1f06   :  { %3130 = vmatpush3.bf16.msra.mxu0 %v3212_v21 }
0x1f07   :  { %3131 = vmatprep.subr.bf16.mxu0 %v3618_v39 }
0x1f0a   :  { %3132 = vmatpush3.bf16.msra.mxu0 %v3213_v22 }
0x1f0b   :  { %2763 = vmatprep.subr.bf16.mxu0 %v3218_v17  ;;  %v122_v17 = vld [vmem:[%s4317_s6] sm:$0xff]  ;;  %s3620_s6 = smov [#allocation13]  }
0x1f0c   :  { %s2915_s29 = sshll.u32 %s3620_s6, 4  ;;  %s2916_s29 = int_to_ptr.vmem [resolvable:$true] %s2915_s29 }
0x1f0d   :  { %s3564_s30 = scalar_lea.vmem %s2916_s29, 128  ;;  %p3569_p7 = scmp.lt.s32.totalorder %s2916_s29, %s2916_s29 }
0x1f0e   :  { %p3565_p6 = scmp.ne.s32.totalorder %s2916_s29, %s3564_s30  ;;  %p3570_p8 = scmp.lt.s32.totalorder %s3564_s30, %s3564_s30 }
0x1f10   :  { %p3571_p9 = por %p3570_p8, %p3569_p7 }
0x1f12   :  { %p3572_p10 = pnand %p3571_p9, %p3565_p6 }
0x1fc0   :  { %v2245_v58 = vpop.f32.mrb[52].mxu0 }
0x1fc1   :  { %v2246_v14 = vadd.f32 %v2245_v58, %v2192_v3  ;;  %v3095_v43 = vpop.f32.mrb[53].mxu0  ;;  %v3248_v3 = vld [vmem:[#allocation11 + $0xa4] ss:$16 sps:$4 sm:$0xff]   ;;  %v3246_v58 = vld [vmem:[#allocation11 + $0xa0] ss:$16 sps:$4 sm:$0xff]  }
0x1fc2   :  { %v2248_v16 = vpop.f32.mrb[54].mxu0  ;;  %v3252_v43 = vld [vmem:[#allocation11 + $0xc0] ss:$16 sps:$4 sm:$0xff]  }
0x1fc3   :  { %v2251_v5 = vmax.f32 %v2246_v14, 0.0  ;;  %v3096_v42 = vpop.f32.mrb[55].mxu0  ;;  %v3254_v14 = vld [vmem:[#allocation11 + $0xc4] ss:$16 sps:$4 sm:$0xff]  }
0x1fc5   :  { %v2252_v45 = vpack.c.bf16 %v2251_v5, %v2251_v5 }
0x1fc7   :  { %3114 = vmatmul.mubr.bf16.vlgmr.msra.gmra.mrb[52].mxu1 %v2252_v45 }
0x1fc8   :  { %3141 = vmatprep.mubr.msk.bf16.mxu1 %vm3619_vm1, %v3618_v39  ;;  %3138 = vmatpush3.bf16.msra.mxu1 %v3214_v51  ;;  %v3249_v51 = vld [vmem:[#allocation11 + $0xa8] ss:$16 sps:$4 sm:$0xff]  }
0x1fc9   :  { %3139 = vmatprep.subr.bf16.mxu1 %v3618_v39  ;;  %v3215_v39 = vld [vmem:[#allocation10 + $0x98] sm:$0xff]  }
0x1fcc   :  { %3140 = vmatpush3.bf16.msra.mxu1 %v3215_v39 }
0x1fcd   :  { %2804 = vmatprep.subr.bf16.mxu1 %v3221_v35  ;;  %v2570_v35 = vrot.slane %v122_v17, %v3769_v8 }
0x209a   :  { %v2339_v60 = vpop.f32.mrb[52].mxu1 }
0x209b   :  { %v2340_v26 = vadd.f32 %v2339_v60, %v2256_v28  ;;  %v3115_v53 = vpop.f32.mrb[53].mxu1  ;;  %v3225_v28 = vld [vmem:[#allocation11 + $0x28] ss:$16 sps:$4 sm:$0xff]   ;;  %v3233_v60 = vld [vmem:[#allocation11 + $0x4c] ss:$16 sps:$4 sm:$0xff]  }
0x209c   :  { %v2342_v55 = vpop.f32.mrb[54].mxu1  ;;  %v3239_v53 = vld [vmem:[#allocation11 + $0x6c] ss:$16 sps:$4 sm:$0xff]  }
0x209d   :  { %v2345_v30 = vmax.f32 %v2340_v26, 0.0  ;;  %v3116_v63 = vpop.f32.mrb[55].mxu1  ;;  %v3231_v26 = vld [vmem:[#allocation11 + $0x48] ss:$16 sps:$4 sm:$0xff]  }
0x209e   :  { %v3237_v55 = vld [vmem:[#allocation11 + $0x68] ss:$16 sps:$4 sm:$0xff]  }
0x209f   :  { %v2346_v31 = vpack.c.bf16 %v2345_v30, %v2345_v30  ;;  %v3245_v30 = vld [vmem:[#allocation11 + $0x8c] ss:$16 sps:$4 sm:$0xff]   ;;  %v3243_v63 = vld [vmem:[#allocation11 + $0x88] ss:$16 sps:$4 sm:$0xff]  }
0x20a1   :  { %3134 = vmatmul.mubr.bf16.vlgmr.msra.gmra.mrb[56].mxu0 %v2346_v31  ;;  %v3251_v31 = vld [vmem:[#allocation11 + $0xac] ss:$16 sps:$4 sm:$0xff]  }
0x20a2   :  { %2795 = vmatprep.mubr.bf16.mxu0 %v3608_v0  ;;  %2764 = vmatpush1.bf16.msra.mxu0 %v3216_v50 }
0x20a3   :  { %2765 = vmatprep.subr.bf16.mxu0 %v3224_v25  ;;  %v2578_v25 = vrot.slane %v122_v17, %v2132_v33 }
0x20a6   :  { %2766 = vmatpush1.bf16.msra.mxu0 %v3222_v61  ;;  %v2590_v61 = vrot.slane %v2570_v35, %v3769_v8 }
0x20a7   :  { %2767 = vmatprep.subr.bf16.mxu0 %v3230_v19  ;;  %v2598_v19 = vrot.slane %v2578_v25, %v3769_v8 }
0x20aa   :  { %2768 = vmatpush1.bf16.msra.mxu0 %v3228_v23 }
0x20ab   :  { %2769 = vmatprep.subr.bf16.mxu0 %v3236_v1  ;;  %v2860_v1 = vrot.slane %v122_v17, %v2141_v37 }
0x20ad   :  { %v2880_v37 = vrot.slane %v2860_v1, %v3778_v11 }
0x20ae   :  { %2770 = vmatpush1.bf16.msra.mxu0 %v3234_v4 }
0x20af   :  { %2771 = vmatprep.subr.bf16.mxu0 %v3242_v18 }
0x20b2   :  { %2772 = vmatpush1.bf16.msra.mxu0 %v3240_v2 }
0x20b3   :  { %2773 = vmatprep.subr.bf16.mxu0 %v3248_v3 }
0x20b6   :  { %2774 = vmatpush1.bf16.msra.mxu0 %v3246_v58  ;;  %v2864_v58 = vrot.slane %v122_v17, %v2255_v54 }
0x20b7   :  { %2775 = vmatprep.subr.bf16.mxu0 %v3254_v14 }
0x20ba   :  { %2776 = vmatpush1.bf16.msra.mxu0 %v3252_v43 }
0x2174   :  { %v2433_v9 = vpop.f32.mrb[56].mxu0 }
0x2175   :  { %v2434_v62 = vadd.f32 %v2433_v9, %v2350_v32  ;;  %v3135_v40 = vpop.f32.mrb[57].mxu0  ;;  %v3257_v32 = vld [vmem:[#allocation11 + $0xcc] ss:$16 sps:$4 sm:$0xff]   ;;  %v3260_v9 = vld [vmem:[#allocation11 + $0xe4] ss:$16 sps:$4 sm:$0xff]  }
0x2176   :  { %v2436_v49 = vpop.f32.mrb[58].mxu0  ;;  %v3258_v40 = vld [vmem:[#allocation11 + $0xe0] ss:$16 sps:$4 sm:$0xff]   ;;  %2777 = vmatprep.subr.bf16.mxu0 %v3260_v9 }
0x2177   :  { %v4256_v52 = vmax.f32 %v2434_v62, 1e-06  ;;  %v3136_v56 = vpop.f32.mrb[59].mxu0  ;;  %v2439_v5 = vmul.f32 1.442695, %v2434_v62  ;;  %2778 = vmatpush1.bf16.msra.mxu0 %v3258_v40 }
0x2178   :  { %v3263_v62 = vld [vmem:[#allocation11 + $0xec] ss:$16 sps:$4 sm:$0xff]   ;;  %v3261_v49 = vld [vmem:[#allocation11 + $0xe8] ss:$16 sps:$4 sm:$0xff]   ;;  %v2476_v56 = vrot.slane %v4251_v36, %v3778_v11 }
0x2179   :  { %2453 = vrot.lane.b32.xlu1 %v4256_v52, %s3617_s16  ;;  %v2443_v57 = vsub.f32 0.0, %v4256_v52 }
0x217b   :  { %v2451_v44 = vmul.f32 %v2449_v38, %v2443_v57 }
0x217d   :  { %v2463_v46 = vmul.f32 1.442695, %v2451_v44  ;;  %v2460_v34 = vmul.f32 0.5, %v2451_v44  ;;  %v2458_v24 = vand.u32 2147483647, %v2451_v44 }
0x217f   :  { %3412 = vpow2.f32 %v2463_v46  ;;  %v2461_v6 = vmul.f32 %v2460_v34, %v2451_v44  ;;  %vm2459_vm2 = vcmp.lt.f32.partialorder %v2458_v24, 0.001  ;;  %v2582_v24 = vrot.slane %v122_v17, %v2191_v10 }
0x2181   :  { %v2462_v13 = vadd.f32 %v2461_v6, %v2451_v44  ;;  %v2574_v6 = vrot.slane %v122_v17, %v3820_v48  ;;  %v2602_v23 = vrot.slane %v2582_v24, %v3769_v8 }
0x2189   :  { %v3413_v29 = vpop.eup %3412 }
0x218a   :  { %v3029_v27 = vadd.f32 -1.0, %v3413_v29  ;;  %v2852_v29 = vrot.slane %v122_v17, %v3778_v11 }
0x218c   :  { %v2466_v15 = vsel %vm2459_vm2, %v2462_v13, %v3029_v27  ;;  %v2594_v13 = vrot.slane %v2574_v6, %v3769_v8  ;;  %v2856_v27 = vrot.slane %v122_v17, %v648_v59  ;;  %v2872_v10 = vrot.slane %v2852_v29, %v3778_v11 }
0x218d   :  { %2468 = vrot.lane.b32.xlu0 %v2466_v15, %s3617_s16 }
0x218e   :  { %v2876_v43 = vrot.slane %v2856_v27, %v3778_v11 }
0x21eb   :  { %v2454_v16 = vpop.permute.xlu1 %2453 }
0x21ec   :  { %3414 = vrcp.f32 %v2454_v16 }
0x21ed   :  { %3416 = vpow2.f32 %v2439_v5 }
0x21f6   :  { %v3415_v42 = vpop.eup %3414 }
0x21f7   :  { %v4262_v45 = vpop.eup %3416 }
0x21f8   :  { %v2457_v21 = vmul.f32 %v4262_v45, %v3415_v42 }
0x21ff   :  { %v2469_v22 = vpop.permute.xlu0 %2468 }
0x2200   :  { %v2471_v41 = vmul.f32 %v2469_v22, %v2457_v21 }
0x2202   :  { %v2472_v47 = vpack.c.bf16 %v2471_v41, %v2471_v41 }
0x2204   :  { %3142 = vmatmul.mubr.msk.bf16.vlgmr.msra.gmra.mrb[56].mxu1 %vm201_vm0, %v2472_v47 }
0x2205   :  { %2805 = vmatpush1.bf16.msra.mxu1 %v3219_v20  ;;  %2836 = vmatprep.mubr.bf16.mxu1 %v3608_v0  ;;  %v3255_v0 = vld [vmem:[#allocation11 + $0xc8] ss:$16 sps:$4 sm:$0xff]  }
0x2206   :  { %2806 = vmatprep.subr.bf16.mxu1 %v3227_v12 }
0x2209   :  { %2807 = vmatpush1.bf16.msra.mxu1 %v3225_v28  ;;  %v2884_v28 = vrot.slane %v2864_v58, %v3778_v11  ;;  %v2903_v11 = vsel %vm201_vm0, %v4262_v45, %v4256_v52 }
0x220a   :  { %2808 = vmatprep.subr.bf16.mxu1 %v3233_v60 }
0x220d   :  { %2809 = vmatpush1.bf16.msra.mxu1 %v3231_v26 }
0x220e   :  { %2810 = vmatprep.subr.bf16.mxu1 %v3239_v53 }
0x2211   :  { %2811 = vmatpush1.bf16.msra.mxu1 %v3237_v55  ;;  %v2897_v55 = vrot.slane %v4251_v36, %v3820_v48 }
0x2212   :  { %2812 = vmatprep.subr.bf16.mxu1 %v3245_v30 }
0x2215   :  { %2813 = vmatpush1.bf16.msra.mxu1 %v3243_v63 }
0x2216   :  { %2814 = vmatprep.subr.bf16.mxu1 %v3251_v31 }
0x2219   :  { %2815 = vmatpush1.bf16.msra.mxu1 %v3249_v51 }
0x221a   :  { %2816 = vmatprep.subr.bf16.mxu1 %v3257_v32 }
0x221d   :  { %2817 = vmatpush1.bf16.msra.mxu1 %v3255_v0 }
0x221e   :  { %2818 = vmatprep.subr.bf16.mxu1 %v3263_v62 }
0x2221   :  { %2819 = vmatpush1.bf16.msra.mxu1 %v3261_v49 }
0x22d7   :  { %v2526_v38 = vpop.f32.mrb[56].mxu1 }
0x22d8   :  { %v2527_v57 = vadd.f32 %v2526_v38, %v2476_v56  ;;  %v3143_v44 = vpop.f32.mrb[57].mxu1 }
0x22d9   :  { %v2529_v46 = vpop.f32.mrb[58].mxu1 }
0x22da   :  { %v2532_v39 = vmax.f32 %v2527_v57, 0.0  ;;  %v3144_v34 = vpop.f32.mrb[59].mxu1 }
0x22dc   :  { %v2565_v50 = vpack.c.bf16 %v2532_v39, %v2532_v39 }
0x22de   :  { %2796 = vmatmul.mubr.bf16.vlgmr.msra.gmra.mrb[60].mxu0 %v2565_v50  ;;  %2837 = vmatmul.mubr.bf16.vlgmr.msra.gmra.mrb[60].mxu1 %v2565_v50 }
0x23b1   :  { %v2797_v15 = vpop.f32.mrb[60].mxu0  ;;  %v2838_v33 = vpop.f32.mrb[60].mxu1 }
0x23b2   :  { %v2798_v4 = vadd.f32 %v2797_v15, %v2590_v61  ;;  %v2839_v18 = vadd.f32 %v2838_v33, %v2598_v19  ;;  %v2799_v2 = vpop.f32.mrb[61].mxu0  ;;  %v2840_v3 = vpop.f32.mrb[61].mxu1 }
0x23b3   :  { %v2800_v14 = vadd.f32 %v2799_v2, %v2594_v13  ;;  %v2841_v59 = vadd.f32 %v2840_v3, %v2602_v23  ;;  %v2801_v16 = vpop.f32.mrb[62].mxu0  ;;  %v2842_v8 = vpop.f32.mrb[62].mxu1 }
0x23b4   :  { %v2845_v5 = vmax.f32 %v2798_v4, 0.0  ;;  %v2802_v42 = vpop.f32.mrb[63].mxu0  ;;  %v2843_v21 = vpop.f32.mrb[63].mxu1  ;;  %v2847_v22 = vmax.f32 %v2839_v18, 0.0 }
0x23b5   :  { %v2846_v41 = vmax.f32 %v2800_v14, 0.0  ;;  %v2848_v12 = vmax.f32 %v2841_v59, 0.0 }
0x23b6   :  { %v2885_v20 = vmul.f32 %v2872_v10, %v2845_v5  ;;  %v2887_v7 = vmul.f32 %v2880_v37, %v2847_v22 }
0x23b7   :  { %v2886_v47 = vmul.f32 %v2876_v43, %v2846_v41  ;;  %v2888_v60 = vmul.f32 %v2884_v28, %v2848_v12 }
0x23b9   :  { %v2889_v54 = vadd.f32 %v2886_v47, %v2885_v20 }
0x23bb   :  { %v2890_v26 = vadd.f32 %v2889_v54, %v2887_v7 }
0x23bd   :  { %v2891_v53 = vadd.f32 %v2890_v26, %v2888_v60 }
0x23bf   :  { %2892 = vadd.xlane.f32.xlu1 %v2891_v53 }
0x244c   :  { %v2893_v30 = vpop.xlane.xlu1 %2892 }
0x244d   :  { %v2898_v63 = vadd.f32 %v2897_v55, %v2893_v30 }
0x244f   :  { %2900 = vrot.lane.b32.xlu0 %v2898_v63, %s3603_s2 }
0x24c1   :  { %v2901_v31 = vpop.permute.xlu0 %2900 }
0x24c2   :  { %v2905_v51 = vsel %vm2904_vm3, %v2903_v11, %v2901_v31 }
0x24c3   :  { %v2907_v32 = vsel %vm2906_vm4, %v2905_v51, 0.0 }
0x24c4   :  { %2908 = vst [vmem:[#allocation13] sm:$0xff] %v2907_v32 }
0x24c5   :  { %3575 = shalt.err (!%p3572_p10)
}
0x24c6   :  { %s3576_s10 = scalar_lea.hbm %s4318_s7, 128 }
0x24c7   :  { %p3577_p11 = scmp.ne.s32.totalorder %s4318_s7, %s3576_s10  ;;  %p3580_p12 = scmp.lt.u32.totalorder %s3576_s10, %s4318_s7 }
0x24c9   :  { %p3582_p13 = pnand %p3580_p12, %p3577_p11 }
0x24cb   :  { %3585 = shalt.err (!%p3582_p13)
}
0x24cc   :  { %2918 = dma.vmem_to_hbm [thread:$0]  %s2916_s29, 128, %s4318_s7, [#allocation4]  }
0x24cd   :  { %3594 = dma.done.wait [#allocation4], 128  }
0x24ce   :  { %3595 = vsyncadd [#allocation4], 4294967168 }
0x24cf   :  { %2922 = vsyncpa [#allocation3], 1 }
0x24d0   :  { %2923 = vsyncpa [#allocation6], 1 }
0x24d1   :  { %2924 = vsyncpa [#allocation9], 1 }
0x24d2   :  { %2925 = vsyncpa [#allocation12], 1 }
0x24d3   :  { %2926 = vsyncpa [#allocation4], 1 }

</bundles_post_ra>
